<compile_context>
chip_gen: v5e
topology: v5e:2x2
jax: 0.10.0
libtpu: 0.0.40
codegen_flags: <defaults>
</compile_context>

<pallas_src>
import functools
import numpy as np

import jax
import jax.numpy as jnp
from jax.experimental import pallas as pl
from jax.experimental.pallas import tpu as pltpu


# ----------------------------------------------------------------------------
# Fused whole-model kernel
# ----------------------------------------------------------------------------

def _seq2seq_kernel(xe_ref, xd_ref,
                    e_wq, e_bq, e_wk, e_bk, e_wv, e_bv, e_wo, e_bo,
                    e_w1, e_b1, e_w2, e_b2, e_g, e_lb,
                    d_wq, d_bq, d_wk, d_bk, d_wv, d_bv, d_wo, d_bo,
                    d_w1, d_b1, d_w2, d_b2, d_g, d_lb,
                    ow_ref, ob_ref,
                    out_ref, oh_buf,
                    *, B, L, H, Dh, n_layers, eps):
    D = H * Dh
    BL = B * L
    scale = 1.0 / float(np.sqrt(Dh))

    # Hoisted causal mask (built once, reused by every masked head).
    row = jax.lax.broadcasted_iota(jnp.int32, (L, L), 0)
    col = jax.lax.broadcasted_iota(jnp.int32, (L, L), 1)
    causal_mask = col > row
    neg_inf = jnp.float32(-1e9)   # matches torch masked_fill_(mask, -1e9)

    def layer_norm(z, g_ref, b_ref):
        mu = jnp.mean(z, axis=-1, keepdims=True)
        var = jnp.mean(jnp.square(z - mu), axis=-1, keepdims=True)  # biased, like torch
        return (z - mu) * jax.lax.rsqrt(var + eps) * g_ref[...] + b_ref[...]

    def mha(xq, xkv, wq, bq, wk, bk, wv, bv, wo, bo, masked):
        # wq/wk/wv: [H, D, Dh] refs, bq/bk/bv: [H, 1, Dh] refs,
        # wo: [H, Dh, D] ref (per-head slice of the concat projection), bo: [1, D].
        acc = jnp.zeros((BL, D), jnp.float32)
        for h in range(H):
            q_h = (jnp.dot(xq, wq[h], preferred_element_type=jnp.float32)
                   + bq[h]) * scale                                    # [BL, Dh]
            k_h = jnp.dot(xkv, wk[h], preferred_element_type=jnp.float32) + bk[h]
            v_h = jnp.dot(xkv, wv[h], preferred_element_type=jnp.float32) + bv[h]
            for b in range(B):
                r0, r1 = b * L, (b + 1) * L
                s = jnp.dot(q_h[r0:r1], k_h[r0:r1].T,
                            preferred_element_type=jnp.float32)        # [L, L]
                if masked:
                    s = jnp.where(causal_mask, neg_inf, s)
                m = jnp.max(s, axis=-1, keepdims=True)
                e = jnp.exp(s - m)
                p = e * pl.reciprocal(jnp.sum(e, axis=-1, keepdims=True),
                                      approx=True)
                oh_buf[r0:r1, :] = jnp.dot(p, v_h[r0:r1],
                                           preferred_element_type=jnp.float32)
            # concat(heads) @ Wo  ==  sum_h head_h @ Wo[h*Dh:(h+1)*Dh, :]
            acc = acc + jnp.dot(oh_buf[...], wo[h],
                                preferred_element_type=jnp.float32)
        return acc + bo[...]

    def ffn(x, w1, b1, w2, b2):
        # Conv1d(kernel_size=1) == per-token linear over the feature axis.
        hdn = jnp.maximum(
            jnp.dot(x, w1[...], preferred_element_type=jnp.float32) + b1[...], 0.0)
        return jnp.dot(hdn, w2[...], preferred_element_type=jnp.float32) + b2[...]

    # ---------------- encoder ----------------
    x = xe_ref[...]
    for _ in range(n_layers):
        out = mha(x, x, e_wq, e_bq, e_wk, e_bk, e_wv, e_bv, e_wo, e_bo,
                  masked=False)
        x = layer_norm(out + x, e_g, e_lb)
        out = ffn(x, e_w1, e_b1, e_w2, e_b2)
        x = layer_norm(out + x, e_g, e_lb)
    enc_out = x

    # ---------------- decoder (training path) ----------------
    y = xd_ref[...]
    for _ in range(n_layers):
        out = mha(y, y, d_wq, d_bq, d_wk, d_bk, d_wv, d_bv, d_wo, d_bo,
                  masked=True)
        y = layer_norm(out + y, d_g, d_lb)
        out = mha(y, enc_out, d_wq, d_bq, d_wk, d_bk, d_wv, d_bv, d_wo, d_bo,
                  masked=False)
        y = layer_norm(out + y, d_g, d_lb)
        # PyTorch quirk: FFN consumes the RAW cross-attention output.
        out = ffn(out, d_w1, d_b1, d_w2, d_b2)
        y = layer_norm(out + y, d_g, d_lb)

    # ---------------- output projection ----------------
    out_ref[...] = (jnp.dot(y, ow_ref[...], preferred_element_type=jnp.float32)
                    + ob_ref[...]).astype(out_ref.dtype)


# ----------------------------------------------------------------------------
# JAX wrapper: embeddings / token shift (tiny gathers) + the single pallas_call
# ----------------------------------------------------------------------------

def transformer_forward(params, data, *, sos_idx, n_layers, n_head, n_dim):
    """data: [B, 2, L] int tokens -> logits [B, L, vocab]."""
    B, _, L = data.shape
    H, Dh = n_head, n_dim
    D = H * Dh

    pe, pd = params["enc"], params["dec"]

    enc_tok = data[:, 0]
    dec_tok = data[:, 1]
    # shift right: prepend SOS, drop last token (training-mode path)
    dec_tok = jnp.concatenate(
        [jnp.full((B, 1), sos_idx, dtype=dec_tok.dtype), dec_tok[:, :-1]], axis=-1)

    # NOTE: positional table indexed by token id -- faithful to the PyTorch code.
    xe = (pe["emb"][enc_tok] + pe["pos"][enc_tok]).reshape(B * L, D)
    xd = (pd["emb"][dec_tok] + pd["pos"][dec_tok]).reshape(B * L, D)

    # Pre-split projection weights per head (trace-time reshapes on tiny arrays)
    def heads_in(w):   # [D, D] -> [H, D, Dh]
        return w.reshape(D, H, Dh).transpose(1, 0, 2)

    def heads_b(b):    # [D] -> [H, 1, Dh]
        return b.reshape(H, 1, Dh)

    def heads_out(w):  # [D, D] -> [H, Dh, D]
        return w.reshape(H, Dh, D)

    def rowv(b):       # [N] -> [1, N]
        return b.reshape(1, -1)

    def block_inputs(p):
        m, f = p["mha"], p["ffn"]
        return (heads_in(m["wq"]), heads_b(m["bq"]),
                heads_in(m["wk"]), heads_b(m["bk"]),
                heads_in(m["wv"]), heads_b(m["bv"]),
                heads_out(m["wo"]), rowv(m["bo"]),
                f["w1"], rowv(f["b1"]), f["w2"], rowv(f["b2"]),
                rowv(p["ln_g"]), rowv(p["ln_b"]))

    inputs = (xe, xd) + block_inputs(pe) + block_inputs(pd) + (
        params["out_w"], rowv(params["out_b"]))

    V = params["out_w"].shape[1]

    def full_spec(a):
        zeros = (0,) * a.ndim
        return pl.BlockSpec(a.shape, lambda i, _z=zeros: _z)

    kernel = functools.partial(
        _seq2seq_kernel, B=B, L=L, H=H, Dh=Dh, n_layers=n_layers, eps=1e-5)

    logits = pl.pallas_call(
        kernel,
        out_shape=jax.ShapeDtypeStruct((B * L, V), jnp.float32),
        grid=(1,),
        in_specs=[full_spec(a) for a in inputs],
        out_specs=pl.BlockSpec((B * L, V), lambda i: (0, 0)),
        scratch_shapes=[pltpu.VMEM((B * L, Dh), jnp.float32)],
        compiler_params=pltpu.CompilerParams(
            dimension_semantics=("arbitrary",)),
    )(*inputs)
    return logits.reshape(B, L, V)


# ----------------------------------------------------------------------------
# Deterministic parameter initialization (shapes follow the PyTorch __init__)
# ----------------------------------------------------------------------------

def get_sinusoid_encoding_table(n_position, d_hid):
    pos = np.arange(n_position, dtype=np.float64)[:, None]
    idx = np.arange(d_hid, dtype=np.float64)[None, :]
    angle = pos / np.power(10000.0, 2.0 * (idx // 2) / d_hid)
    table = np.zeros((n_position, d_hid), dtype=np.float64)
    table[:, 0::2] = np.sin(angle[:, 0::2])
    table[:, 1::2] = np.cos(angle[:, 1::2])
    return jnp.asarray(table, dtype=jnp.float32)


def init_params(key, vocab_size, n_dim, n_head):
    d_model = n_dim * n_head
    d_ff = n_dim * 2
    keys = iter(jax.random.split(key, 40))

    def w(shape):
        return jax.random.normal(next(keys), shape, jnp.float32) * 0.05

    def mha_params():
        return {
            "wq": w((d_model, d_model)), "bq": jnp.zeros((d_model,), jnp.float32),
            "wk": w((d_model, d_model)), "bk": jnp.zeros((d_model,), jnp.float32),
            "wv": w((d_model, d_model)), "bv": jnp.zeros((d_model,), jnp.float32),
            "wo": w((d_model, d_model)), "bo": jnp.zeros((d_model,), jnp.float32),
        }

    def ffn_params():
        return {
            "w1": w((d_model, d_ff)), "b1": jnp.zeros((d_ff,), jnp.float32),
            "w2": w((d_ff, d_model)), "b2": jnp.zeros((d_model,), jnp.float32),
        }

    pos_table = get_sinusoid_encoding_table(vocab_size, d_model)

    def block_params():
        return {
            "emb": w((vocab_size, d_model)),
            "pos": pos_table,
            "mha": mha_params(),
            "ffn": ffn_params(),
            "ln_g": jnp.ones((d_model,), jnp.float32),
            "ln_b": jnp.zeros((d_model,), jnp.float32),
        }

    return {
        "enc": block_params(),
        "dec": block_params(),
        "out_w": w((d_model, vocab_size)),
        "out_b": jnp.zeros((vocab_size,), jnp.float32),
    }


# ----------------------------------------------------------------------------
# Main
# ----------------------------------------------------------------------------

if __name__ == "__main__":
    VOCAB = 16
    MAX_LEN = 8          # sequence length
    N_DIM = 8            # per-head dim
    N_HEAD = 4           # d_model = 32
    BATCH = 2
    N_LAYERS = 1
    SOS_IDX = 1          # char_dict.char2idx['SOS']

    root = jax.random.PRNGKey(0)
    pkey, dkey = jax.random.split(root)

    params = init_params(pkey, VOCAB, N_DIM, N_HEAD)
    # data[:, 0] = encoder tokens, data[:, 1] = decoder target tokens
    data = jax.random.randint(dkey, (BATCH, 2, MAX_LEN), 0, VOCAB, dtype=jnp.int32)

    fwd = jax.jit(functools.partial(
        transformer_forward, sos_idx=SOS_IDX, n_layers=N_LAYERS,
        n_head=N_HEAD, n_dim=N_DIM))

    logits = jax.block_until_ready(fwd(params, data))

    assert logits.shape == (BATCH, MAX_LEN, VOCAB), logits.shape
    assert bool(jnp.all(jnp.isfinite(logits)))
    print("KERNEL_OK")
</pallas_src>

<mosaic_0001>
module attributes {stable_mosaic.version = 11 : i64} {
  func.func @_seq2seq_kernel(%arg0: i32, %arg1: memref<16x32xf32, #tpu.memory_space<vmem>>, %arg2: memref<16x32xf32, #tpu.memory_space<vmem>>, %arg3: memref<4x32x8xf32, #tpu.memory_space<vmem>>, %arg4: memref<4x1x8xf32, #tpu.memory_space<vmem>>, %arg5: memref<4x32x8xf32, #tpu.memory_space<vmem>>, %arg6: memref<4x1x8xf32, #tpu.memory_space<vmem>>, %arg7: memref<4x32x8xf32, #tpu.memory_space<vmem>>, %arg8: memref<4x1x8xf32, #tpu.memory_space<vmem>>, %arg9: memref<4x8x32xf32, #tpu.memory_space<vmem>>, %arg10: memref<1x32xf32, #tpu.memory_space<vmem>>, %arg11: memref<32x16xf32, #tpu.memory_space<vmem>>, %arg12: memref<1x16xf32, #tpu.memory_space<vmem>>, %arg13: memref<16x32xf32, #tpu.memory_space<vmem>>, %arg14: memref<1x32xf32, #tpu.memory_space<vmem>>, %arg15: memref<1x32xf32, #tpu.memory_space<vmem>>, %arg16: memref<1x32xf32, #tpu.memory_space<vmem>>, %arg17: memref<4x32x8xf32, #tpu.memory_space<vmem>>, %arg18: memref<4x1x8xf32, #tpu.memory_space<vmem>>, %arg19: memref<4x32x8xf32, #tpu.memory_space<vmem>>, %arg20: memref<4x1x8xf32, #tpu.memory_space<vmem>>, %arg21: memref<4x32x8xf32, #tpu.memory_space<vmem>>, %arg22: memref<4x1x8xf32, #tpu.memory_space<vmem>>, %arg23: memref<4x8x32xf32, #tpu.memory_space<vmem>>, %arg24: memref<1x32xf32, #tpu.memory_space<vmem>>, %arg25: memref<32x16xf32, #tpu.memory_space<vmem>>, %arg26: memref<1x16xf32, #tpu.memory_space<vmem>>, %arg27: memref<16x32xf32, #tpu.memory_space<vmem>>, %arg28: memref<1x32xf32, #tpu.memory_space<vmem>>, %arg29: memref<1x32xf32, #tpu.memory_space<vmem>>, %arg30: memref<1x32xf32, #tpu.memory_space<vmem>>, %arg31: memref<32x16xf32, #tpu.memory_space<vmem>>, %arg32: memref<1x16xf32, #tpu.memory_space<vmem>>, %arg33: memref<16x16xf32, #tpu.memory_space<vmem>>, %arg34: memref<16x8xf32, #tpu.memory_space<vmem>>) attributes {dimension_semantics = [#tpu.dimension_semantics<arbitrary>], iteration_bounds = array<i64: 1>, scalar_prefetch = 0 : i64, scratch_operands = 1 : i64, tpu.core_type = #tpu.core_type<tc>, window_params = [{pipeline_mode = #tpu.pipeline_mode<synchronous>, transform_indices = @transform_0, window_bounds = array<i64: 16, 32>}, {pipeline_mode = #tpu.pipeline_mode<synchronous>, transform_indices = @transform_1, window_bounds = array<i64: 16, 32>}, {pipeline_mode = #tpu.pipeline_mode<synchronous>, transform_indices = @transform_2, window_bounds = array<i64: 4, 32, 8>}, {pipeline_mode = #tpu.pipeline_mode<synchronous>, transform_indices = @transform_3, window_bounds = array<i64: 4, 1, 8>}, {pipeline_mode = #tpu.pipeline_mode<synchronous>, transform_indices = @transform_4, window_bounds = array<i64: 4, 32, 8>}, {pipeline_mode = #tpu.pipeline_mode<synchronous>, transform_indices = @transform_5, window_bounds = array<i64: 4, 1, 8>}, {pipeline_mode = #tpu.pipeline_mode<synchronous>, transform_indices = @transform_6, window_bounds = array<i64: 4, 32, 8>}, {pipeline_mode = #tpu.pipeline_mode<synchronous>, transform_indices = @transform_7, window_bounds = array<i64: 4, 1, 8>}, {pipeline_mode = #tpu.pipeline_mode<synchronous>, transform_indices = @transform_8, window_bounds = array<i64: 4, 8, 32>}, {pipeline_mode = #tpu.pipeline_mode<synchronous>, transform_indices = @transform_9, window_bounds = array<i64: 1, 32>}, {pipeline_mode = #tpu.pipeline_mode<synchronous>, transform_indices = @transform_10, window_bounds = array<i64: 32, 16>}, {pipeline_mode = #tpu.pipeline_mode<synchronous>, transform_indices = @transform_11, window_bounds = array<i64: 1, 16>}, {pipeline_mode = #tpu.pipeline_mode<synchronous>, transform_indices = @transform_12, window_bounds = array<i64: 16, 32>}, {pipeline_mode = #tpu.pipeline_mode<synchronous>, transform_indices = @transform_13, window_bounds = array<i64: 1, 32>}, {pipeline_mode = #tpu.pipeline_mode<synchronous>, transform_indices = @transform_14, window_bounds = array<i64: 1, 32>}, {pipeline_mode = #tpu.pipeline_mode<synchronous>, transform_indices = @transform_15, window_bounds = array<i64: 1, 32>}, {pipeline_mode = #tpu.pipeline_mode<synchronous>, transform_indices = @transform_16, window_bounds = array<i64: 4, 32, 8>}, {pipeline_mode = #tpu.pipeline_mode<synchronous>, transform_indices = @transform_17, window_bounds = array<i64: 4, 1, 8>}, {pipeline_mode = #tpu.pipeline_mode<synchronous>, transform_indices = @transform_18, window_bounds = array<i64: 4, 32, 8>}, {pipeline_mode = #tpu.pipeline_mode<synchronous>, transform_indices = @transform_19, window_bounds = array<i64: 4, 1, 8>}, {pipeline_mode = #tpu.pipeline_mode<synchronous>, transform_indices = @transform_20, window_bounds = array<i64: 4, 32, 8>}, {pipeline_mode = #tpu.pipeline_mode<synchronous>, transform_indices = @transform_21, window_bounds = array<i64: 4, 1, 8>}, {pipeline_mode = #tpu.pipeline_mode<synchronous>, transform_indices = @transform_22, window_bounds = array<i64: 4, 8, 32>}, {pipeline_mode = #tpu.pipeline_mode<synchronous>, transform_indices = @transform_23, window_bounds = array<i64: 1, 32>}, {pipeline_mode = #tpu.pipeline_mode<synchronous>, transform_indices = @transform_24, window_bounds = array<i64: 32, 16>}, {pipeline_mode = #tpu.pipeline_mode<synchronous>, transform_indices = @transform_25, window_bounds = array<i64: 1, 16>}, {pipeline_mode = #tpu.pipeline_mode<synchronous>, transform_indices = @transform_26, window_bounds = array<i64: 16, 32>}, {pipeline_mode = #tpu.pipeline_mode<synchronous>, transform_indices = @transform_27, window_bounds = array<i64: 1, 32>}, {pipeline_mode = #tpu.pipeline_mode<synchronous>, transform_indices = @transform_28, window_bounds = array<i64: 1, 32>}, {pipeline_mode = #tpu.pipeline_mode<synchronous>, transform_indices = @transform_29, window_bounds = array<i64: 1, 32>}, {pipeline_mode = #tpu.pipeline_mode<synchronous>, transform_indices = @transform_30, window_bounds = array<i64: 32, 16>}, {pipeline_mode = #tpu.pipeline_mode<synchronous>, transform_indices = @transform_31, window_bounds = array<i64: 1, 16>}, {pipeline_mode = #tpu.pipeline_mode<synchronous>, transform_indices = @transform_32, window_bounds = array<i64: 16, 16>}]} {
    %0 = tpu.iota {dimensions = array<i32: 0>} : vector<8x8xi32>
    %1 = tpu.iota {dimensions = array<i32: 1>} : vector<8x8xi32>
    %2 = arith.cmpi sgt, %1, %0 : vector<8x8xi32>
    %c0 = arith.constant 0 : index
    %c0_0 = arith.constant 0 : index
    %3 = vector.load %arg1[%c0, %c0_0] : memref<16x32xf32, #tpu.memory_space<vmem>>, vector<16x32xf32>
    %cst = arith.constant 0.000000e+00 : f32
    %4 = vector.broadcast %cst : f32 to vector<16x32xf32>
    %c0_1 = arith.constant 0 : index
    %c0_2 = arith.constant 0 : index
    %c0_3 = arith.constant 0 : index
    %5 = vector.load %arg3[%c0_1, %c0_2, %c0_3] : memref<4x32x8xf32, #tpu.memory_space<vmem>>, vector<1x32x8xf32>
    %6 = vector.shape_cast %5 : vector<1x32x8xf32> to vector<32x8xf32>
    %cst_4 = arith.constant dense<0.000000e+00> : vector<16x8xf32>
    %7 = tpu.matmul %3, %6, %cst_4 {dimension_numbers = #tpu.dot_dimension_numbers<[1], [0], [0], [1], [0, 0, 1, 1], [], []>} : vector<16x32xf32>, vector<32x8xf32>, vector<16x8xf32> -> vector<16x8xf32>
    %c0_5 = arith.constant 0 : index
    %c0_6 = arith.constant 0 : index
    %c0_7 = arith.constant 0 : index
    %8 = vector.load %arg4[%c0_5, %c0_6, %c0_7] : memref<4x1x8xf32, #tpu.memory_space<vmem>>, vector<1x1x8xf32>
    %9 = vector.shape_cast %8 : vector<1x1x8xf32> to vector<1x8xf32>
    %10 = vector.broadcast %9 : vector<1x8xf32> to vector<16x8xf32>
    %11 = arith.addf %7, %10 : vector<16x8xf32>
    %cst_8 = arith.constant 0.353553385 : f32
    %12 = vector.broadcast %cst_8 : f32 to vector<16x8xf32>
    %13 = arith.mulf %11, %12 : vector<16x8xf32>
    %c0_9 = arith.constant 0 : index
    %c0_10 = arith.constant 0 : index
    %c0_11 = arith.constant 0 : index
    %14 = vector.load %arg5[%c0_9, %c0_10, %c0_11] : memref<4x32x8xf32, #tpu.memory_space<vmem>>, vector<1x32x8xf32>
    %15 = vector.shape_cast %14 : vector<1x32x8xf32> to vector<32x8xf32>
    %cst_12 = arith.constant dense<0.000000e+00> : vector<16x8xf32>
    %16 = tpu.matmul %3, %15, %cst_12 {dimension_numbers = #tpu.dot_dimension_numbers<[1], [0], [0], [1], [0, 0, 1, 1], [], []>} : vector<16x32xf32>, vector<32x8xf32>, vector<16x8xf32> -> vector<16x8xf32>
    %c0_13 = arith.constant 0 : index
    %c0_14 = arith.constant 0 : index
    %c0_15 = arith.constant 0 : index
    %17 = vector.load %arg6[%c0_13, %c0_14, %c0_15] : memref<4x1x8xf32, #tpu.memory_space<vmem>>, vector<1x1x8xf32>
    %18 = vector.shape_cast %17 : vector<1x1x8xf32> to vector<1x8xf32>
    %19 = vector.broadcast %18 : vector<1x8xf32> to vector<16x8xf32>
    %20 = arith.addf %16, %19 : vector<16x8xf32>
    %c0_16 = arith.constant 0 : index
    %c0_17 = arith.constant 0 : index
    %c0_18 = arith.constant 0 : index
    %21 = vector.load %arg7[%c0_16, %c0_17, %c0_18] : memref<4x32x8xf32, #tpu.memory_space<vmem>>, vector<1x32x8xf32>
    %22 = vector.shape_cast %21 : vector<1x32x8xf32> to vector<32x8xf32>
    %cst_19 = arith.constant dense<0.000000e+00> : vector<16x8xf32>
    %23 = tpu.matmul %3, %22, %cst_19 {dimension_numbers = #tpu.dot_dimension_numbers<[1], [0], [0], [1], [0, 0, 1, 1], [], []>} : vector<16x32xf32>, vector<32x8xf32>, vector<16x8xf32> -> vector<16x8xf32>
    %c0_20 = arith.constant 0 : index
    %c0_21 = arith.constant 0 : index
    %c0_22 = arith.constant 0 : index
    %24 = vector.load %arg8[%c0_20, %c0_21, %c0_22] : memref<4x1x8xf32, #tpu.memory_space<vmem>>, vector<1x1x8xf32>
    %25 = vector.shape_cast %24 : vector<1x1x8xf32> to vector<1x8xf32>
    %26 = vector.broadcast %25 : vector<1x8xf32> to vector<16x8xf32>
    %27 = arith.addf %23, %26 : vector<16x8xf32>
    %28 = vector.extract_strided_slice %13 {offsets = [0, 0], sizes = [8, 8], strides = [1, 1]} : vector<16x8xf32> to vector<8x8xf32>
    %29 = vector.extract_strided_slice %20 {offsets = [0, 0], sizes = [8, 8], strides = [1, 1]} : vector<16x8xf32> to vector<8x8xf32>
    %30 = tpu.transpose %29, [1, 0] : vector<8x8xf32> -> vector<8x8xf32>
    %cst_23 = arith.constant dense<0.000000e+00> : vector<8x8xf32>
    %31 = tpu.matmul %28, %30, %cst_23 {dimension_numbers = #tpu.dot_dimension_numbers<[1], [0], [0], [1], [0, 0, 1, 1], [], []>} : vector<8x8xf32>, vector<8x8xf32>, vector<8x8xf32> -> vector<8x8xf32>
    %cst_24 = arith.constant dense<0xFF800000> : vector<8xf32>
    %32 = vector.multi_reduction <maximumf>, %31, %cst_24 [1] : vector<8x8xf32> to vector<8xf32>
    %33 = vector.shape_cast %32 : vector<8xf32> to vector<8x1xf32>
    %34 = vector.broadcast %33 : vector<8x1xf32> to vector<8x8xf32>
    %35 = arith.subf %31, %34 : vector<8x8xf32>
    %36 = math.exp %35 : vector<8x8xf32>
    %cst_25 = arith.constant dense<0.000000e+00> : vector<8xf32>
    %37 = vector.multi_reduction <add>, %36, %cst_25 [1] : vector<8x8xf32> to vector<8xf32>
    %38 = vector.shape_cast %37 : vector<8xf32> to vector<8x1xf32>
    %39 = tpu.reciprocal %38 {approx = true} : vector<8x1xf32> -> vector<8x1xf32>
    %40 = vector.broadcast %39 : vector<8x1xf32> to vector<8x8xf32>
    %41 = arith.mulf %36, %40 : vector<8x8xf32>
    %42 = vector.extract_strided_slice %27 {offsets = [0, 0], sizes = [8, 8], strides = [1, 1]} : vector<16x8xf32> to vector<8x8xf32>
    %cst_26 = arith.constant dense<0.000000e+00> : vector<8x8xf32>
    %43 = tpu.matmul %41, %42, %cst_26 {dimension_numbers = #tpu.dot_dimension_numbers<[1], [0], [0], [1], [0, 0, 1, 1], [], []>} : vector<8x8xf32>, vector<8x8xf32>, vector<8x8xf32> -> vector<8x8xf32>
    %c0_27 = arith.constant 0 : index
    %c0_28 = arith.constant 0 : index
    %44 = vector.load %arg34[%c0_27, %c0_28] : memref<16x8xf32, #tpu.memory_space<vmem>>, vector<8x8xf32>
    tpu.vector_store %arg34[%c0_27, %c0_28], %43 {strides = array<i32>} : memref<16x8xf32, #tpu.memory_space<vmem>>, vector<8x8xf32>,
    %45 = vector.extract_strided_slice %13 {offsets = [8, 0], sizes = [8, 8], strides = [1, 1]} : vector<16x8xf32> to vector<8x8xf32>
    %46 = vector.extract_strided_slice %20 {offsets = [8, 0], sizes = [8, 8], strides = [1, 1]} : vector<16x8xf32> to vector<8x8xf32>
    %47 = tpu.transpose %46, [1, 0] : vector<8x8xf32> -> vector<8x8xf32>
    %cst_29 = arith.constant dense<0.000000e+00> : vector<8x8xf32>
    %48 = tpu.matmul %45, %47, %cst_29 {dimension_numbers = #tpu.dot_dimension_numbers<[1], [0], [0], [1], [0, 0, 1, 1], [], []>} : vector<8x8xf32>, vector<8x8xf32>, vector<8x8xf32> -> vector<8x8xf32>
    %cst_30 = arith.constant dense<0xFF800000> : vector<8xf32>
    %49 = vector.multi_reduction <maximumf>, %48, %cst_30 [1] : vector<8x8xf32> to vector<8xf32>
    %50 = vector.shape_cast %49 : vector<8xf32> to vector<8x1xf32>
    %51 = vector.broadcast %50 : vector<8x1xf32> to vector<8x8xf32>
    %52 = arith.subf %48, %51 : vector<8x8xf32>
    %53 = math.exp %52 : vector<8x8xf32>
    %cst_31 = arith.constant dense<0.000000e+00> : vector<8xf32>
    %54 = vector.multi_reduction <add>, %53, %cst_31 [1] : vector<8x8xf32> to vector<8xf32>
    %55 = vector.shape_cast %54 : vector<8xf32> to vector<8x1xf32>
    %56 = tpu.reciprocal %55 {approx = true} : vector<8x1xf32> -> vector<8x1xf32>
    %57 = vector.broadcast %56 : vector<8x1xf32> to vector<8x8xf32>
    %58 = arith.mulf %53, %57 : vector<8x8xf32>
    %59 = vector.extract_strided_slice %27 {offsets = [8, 0], sizes = [8, 8], strides = [1, 1]} : vector<16x8xf32> to vector<8x8xf32>
    %cst_32 = arith.constant dense<0.000000e+00> : vector<8x8xf32>
    %60 = tpu.matmul %58, %59, %cst_32 {dimension_numbers = #tpu.dot_dimension_numbers<[1], [0], [0], [1], [0, 0, 1, 1], [], []>} : vector<8x8xf32>, vector<8x8xf32>, vector<8x8xf32> -> vector<8x8xf32>
    %c8 = arith.constant 8 : index
    %c0_33 = arith.constant 0 : index
    %61 = vector.load %arg34[%c8, %c0_33] : memref<16x8xf32, #tpu.memory_space<vmem>>, vector<8x8xf32>
    tpu.vector_store %arg34[%c8, %c0_33], %60 {strides = array<i32>} : memref<16x8xf32, #tpu.memory_space<vmem>>, vector<8x8xf32>,
    %c0_34 = arith.constant 0 : index
    %c0_35 = arith.constant 0 : index
    %62 = vector.load %arg34[%c0_34, %c0_35] : memref<16x8xf32, #tpu.memory_space<vmem>>, vector<16x8xf32>
    %c0_36 = arith.constant 0 : index
    %c0_37 = arith.constant 0 : index
    %c0_38 = arith.constant 0 : index
    %63 = vector.load %arg9[%c0_36, %c0_37, %c0_38] : memref<4x8x32xf32, #tpu.memory_space<vmem>>, vector<1x8x32xf32>
    %64 = vector.shape_cast %63 : vector<1x8x32xf32> to vector<8x32xf32>
    %cst_39 = arith.constant dense<0.000000e+00> : vector<16x32xf32>
    %65 = tpu.matmul %62, %64, %cst_39 {dimension_numbers = #tpu.dot_dimension_numbers<[1], [0], [0], [1], [0, 0, 1, 1], [], []>} : vector<16x8xf32>, vector<8x32xf32>, vector<16x32xf32> -> vector<16x32xf32>
    %66 = arith.addf %4, %65 : vector<16x32xf32>
    %c1 = arith.constant 1 : index
    %c0_40 = arith.constant 0 : index
    %c0_41 = arith.constant 0 : index
    %67 = vector.load %arg3[%c1, %c0_40, %c0_41] : memref<4x32x8xf32, #tpu.memory_space<vmem>>, vector<1x32x8xf32>
    %68 = vector.shape_cast %67 : vector<1x32x8xf32> to vector<32x8xf32>
    %cst_42 = arith.constant dense<0.000000e+00> : vector<16x8xf32>
    %69 = tpu.matmul %3, %68, %cst_42 {dimension_numbers = #tpu.dot_dimension_numbers<[1], [0], [0], [1], [0, 0, 1, 1], [], []>} : vector<16x32xf32>, vector<32x8xf32>, vector<16x8xf32> -> vector<16x8xf32>
    %c1_43 = arith.constant 1 : index
    %c0_44 = arith.constant 0 : index
    %c0_45 = arith.constant 0 : index
    %70 = vector.load %arg4[%c1_43, %c0_44, %c0_45] : memref<4x1x8xf32, #tpu.memory_space<vmem>>, vector<1x1x8xf32>
    %71 = vector.shape_cast %70 : vector<1x1x8xf32> to vector<1x8xf32>
    %72 = vector.broadcast %71 : vector<1x8xf32> to vector<16x8xf32>
    %73 = arith.addf %69, %72 : vector<16x8xf32>
    %cst_46 = arith.constant 0.353553385 : f32
    %74 = vector.broadcast %cst_46 : f32 to vector<16x8xf32>
    %75 = arith.mulf %73, %74 : vector<16x8xf32>
    %c1_47 = arith.constant 1 : index
    %c0_48 = arith.constant 0 : index
    %c0_49 = arith.constant 0 : index
    %76 = vector.load %arg5[%c1_47, %c0_48, %c0_49] : memref<4x32x8xf32, #tpu.memory_space<vmem>>, vector<1x32x8xf32>
    %77 = vector.shape_cast %76 : vector<1x32x8xf32> to vector<32x8xf32>
    %cst_50 = arith.constant dense<0.000000e+00> : vector<16x8xf32>
    %78 = tpu.matmul %3, %77, %cst_50 {dimension_numbers = #tpu.dot_dimension_numbers<[1], [0], [0], [1], [0, 0, 1, 1], [], []>} : vector<16x32xf32>, vector<32x8xf32>, vector<16x8xf32> -> vector<16x8xf32>
    %c1_51 = arith.constant 1 : index
    %c0_52 = arith.constant 0 : index
    %c0_53 = arith.constant 0 : index
    %79 = vector.load %arg6[%c1_51, %c0_52, %c0_53] : memref<4x1x8xf32, #tpu.memory_space<vmem>>, vector<1x1x8xf32>
    %80 = vector.shape_cast %79 : vector<1x1x8xf32> to vector<1x8xf32>
    %81 = vector.broadcast %80 : vector<1x8xf32> to vector<16x8xf32>
    %82 = arith.addf %78, %81 : vector<16x8xf32>
    %c1_54 = arith.constant 1 : index
    %c0_55 = arith.constant 0 : index
    %c0_56 = arith.constant 0 : index
    %83 = vector.load %arg7[%c1_54, %c0_55, %c0_56] : memref<4x32x8xf32, #tpu.memory_space<vmem>>, vector<1x32x8xf32>
    %84 = vector.shape_cast %83 : vector<1x32x8xf32> to vector<32x8xf32>
    %cst_57 = arith.constant dense<0.000000e+00> : vector<16x8xf32>
    %85 = tpu.matmul %3, %84, %cst_57 {dimension_numbers = #tpu.dot_dimension_numbers<[1], [0], [0], [1], [0, 0, 1, 1], [], []>} : vector<16x32xf32>, vector<32x8xf32>, vector<16x8xf32> -> vector<16x8xf32>
    %c1_58 = arith.constant 1 : index
    %c0_59 = arith.constant 0 : index
    %c0_60 = arith.constant 0 : index
    %86 = vector.load %arg8[%c1_58, %c0_59, %c0_60] : memref<4x1x8xf32, #tpu.memory_space<vmem>>, vector<1x1x8xf32>
    %87 = vector.shape_cast %86 : vector<1x1x8xf32> to vector<1x8xf32>
    %88 = vector.broadcast %87 : vector<1x8xf32> to vector<16x8xf32>
    %89 = arith.addf %85, %88 : vector<16x8xf32>
    %90 = vector.extract_strided_slice %75 {offsets = [0, 0], sizes = [8, 8], strides = [1, 1]} : vector<16x8xf32> to vector<8x8xf32>
    %91 = vector.extract_strided_slice %82 {offsets = [0, 0], sizes = [8, 8], strides = [1, 1]} : vector<16x8xf32> to vector<8x8xf32>
    %92 = tpu.transpose %91, [1, 0] : vector<8x8xf32> -> vector<8x8xf32>
    %cst_61 = arith.constant dense<0.000000e+00> : vector<8x8xf32>
    %93 = tpu.matmul %90, %92, %cst_61 {dimension_numbers = #tpu.dot_dimension_numbers<[1], [0], [0], [1], [0, 0, 1, 1], [], []>} : vector<8x8xf32>, vector<8x8xf32>, vector<8x8xf32> -> vector<8x8xf32>
    %cst_62 = arith.constant dense<0xFF800000> : vector<8xf32>
    %94 = vector.multi_reduction <maximumf>, %93, %cst_62 [1] : vector<8x8xf32> to vector<8xf32>
    %95 = vector.shape_cast %94 : vector<8xf32> to vector<8x1xf32>
    %96 = vector.broadcast %95 : vector<8x1xf32> to vector<8x8xf32>
    %97 = arith.subf %93, %96 : vector<8x8xf32>
    %98 = math.exp %97 : vector<8x8xf32>
    %cst_63 = arith.constant dense<0.000000e+00> : vector<8xf32>
    %99 = vector.multi_reduction <add>, %98, %cst_63 [1] : vector<8x8xf32> to vector<8xf32>
    %100 = vector.shape_cast %99 : vector<8xf32> to vector<8x1xf32>
    %101 = tpu.reciprocal %100 {approx = true} : vector<8x1xf32> -> vector<8x1xf32>
    %102 = vector.broadcast %101 : vector<8x1xf32> to vector<8x8xf32>
    %103 = arith.mulf %98, %102 : vector<8x8xf32>
    %104 = vector.extract_strided_slice %89 {offsets = [0, 0], sizes = [8, 8], strides = [1, 1]} : vector<16x8xf32> to vector<8x8xf32>
    %cst_64 = arith.constant dense<0.000000e+00> : vector<8x8xf32>
    %105 = tpu.matmul %103, %104, %cst_64 {dimension_numbers = #tpu.dot_dimension_numbers<[1], [0], [0], [1], [0, 0, 1, 1], [], []>} : vector<8x8xf32>, vector<8x8xf32>, vector<8x8xf32> -> vector<8x8xf32>
    %c0_65 = arith.constant 0 : index
    %c0_66 = arith.constant 0 : index
    %106 = vector.load %arg34[%c0_65, %c0_66] : memref<16x8xf32, #tpu.memory_space<vmem>>, vector<8x8xf32>
    tpu.vector_store %arg34[%c0_65, %c0_66], %105 {strides = array<i32>} : memref<16x8xf32, #tpu.memory_space<vmem>>, vector<8x8xf32>,
    %107 = vector.extract_strided_slice %75 {offsets = [8, 0], sizes = [8, 8], strides = [1, 1]} : vector<16x8xf32> to vector<8x8xf32>
    %108 = vector.extract_strided_slice %82 {offsets = [8, 0], sizes = [8, 8], strides = [1, 1]} : vector<16x8xf32> to vector<8x8xf32>
    %109 = tpu.transpose %108, [1, 0] : vector<8x8xf32> -> vector<8x8xf32>
    %cst_67 = arith.constant dense<0.000000e+00> : vector<8x8xf32>
    %110 = tpu.matmul %107, %109, %cst_67 {dimension_numbers = #tpu.dot_dimension_numbers<[1], [0], [0], [1], [0, 0, 1, 1], [], []>} : vector<8x8xf32>, vector<8x8xf32>, vector<8x8xf32> -> vector<8x8xf32>
    %cst_68 = arith.constant dense<0xFF800000> : vector<8xf32>
    %111 = vector.multi_reduction <maximumf>, %110, %cst_68 [1] : vector<8x8xf32> to vector<8xf32>
    %112 = vector.shape_cast %111 : vector<8xf32> to vector<8x1xf32>
    %113 = vector.broadcast %112 : vector<8x1xf32> to vector<8x8xf32>
    %114 = arith.subf %110, %113 : vector<8x8xf32>
    %115 = math.exp %114 : vector<8x8xf32>
    %cst_69 = arith.constant dense<0.000000e+00> : vector<8xf32>
    %116 = vector.multi_reduction <add>, %115, %cst_69 [1] : vector<8x8xf32> to vector<8xf32>
    %117 = vector.shape_cast %116 : vector<8xf32> to vector<8x1xf32>
    %118 = tpu.reciprocal %117 {approx = true} : vector<8x1xf32> -> vector<8x1xf32>
    %119 = vector.broadcast %118 : vector<8x1xf32> to vector<8x8xf32>
    %120 = arith.mulf %115, %119 : vector<8x8xf32>
    %121 = vector.extract_strided_slice %89 {offsets = [8, 0], sizes = [8, 8], strides = [1, 1]} : vector<16x8xf32> to vector<8x8xf32>
    %cst_70 = arith.constant dense<0.000000e+00> : vector<8x8xf32>
    %122 = tpu.matmul %120, %121, %cst_70 {dimension_numbers = #tpu.dot_dimension_numbers<[1], [0], [0], [1], [0, 0, 1, 1], [], []>} : vector<8x8xf32>, vector<8x8xf32>, vector<8x8xf32> -> vector<8x8xf32>
    %c8_71 = arith.constant 8 : index
    %c0_72 = arith.constant 0 : index
    %123 = vector.load %arg34[%c8_71, %c0_72] : memref<16x8xf32, #tpu.memory_space<vmem>>, vector<8x8xf32>
    tpu.vector_store %arg34[%c8_71, %c0_72], %122 {strides = array<i32>} : memref<16x8xf32, #tpu.memory_space<vmem>>, vector<8x8xf32>,
    %c0_73 = arith.constant 0 : index
    %c0_74 = arith.constant 0 : index
    %124 = vector.load %arg34[%c0_73, %c0_74] : memref<16x8xf32, #tpu.memory_space<vmem>>, vector<16x8xf32>
    %c1_75 = arith.constant 1 : index
    %c0_76 = arith.constant 0 : index
    %c0_77 = arith.constant 0 : index
    %125 = vector.load %arg9[%c1_75, %c0_76, %c0_77] : memref<4x8x32xf32, #tpu.memory_space<vmem>>, vector<1x8x32xf32>
    %126 = vector.shape_cast %125 : vector<1x8x32xf32> to vector<8x32xf32>
    %cst_78 = arith.constant dense<0.000000e+00> : vector<16x32xf32>
    %127 = tpu.matmul %124, %126, %cst_78 {dimension_numbers = #tpu.dot_dimension_numbers<[1], [0], [0], [1], [0, 0, 1, 1], [], []>} : vector<16x8xf32>, vector<8x32xf32>, vector<16x32xf32> -> vector<16x32xf32>
    %128 = arith.addf %66, %127 : vector<16x32xf32>
    %c2 = arith.constant 2 : index
    %c0_79 = arith.constant 0 : index
    %c0_80 = arith.constant 0 : index
    %129 = vector.load %arg3[%c2, %c0_79, %c0_80] : memref<4x32x8xf32, #tpu.memory_space<vmem>>, vector<1x32x8xf32>
    %130 = vector.shape_cast %129 : vector<1x32x8xf32> to vector<32x8xf32>
    %cst_81 = arith.constant dense<0.000000e+00> : vector<16x8xf32>
    %131 = tpu.matmul %3, %130, %cst_81 {dimension_numbers = #tpu.dot_dimension_numbers<[1], [0], [0], [1], [0, 0, 1, 1], [], []>} : vector<16x32xf32>, vector<32x8xf32>, vector<16x8xf32> -> vector<16x8xf32>
    %c2_82 = arith.constant 2 : index
    %c0_83 = arith.constant 0 : index
    %c0_84 = arith.constant 0 : index
    %132 = vector.load %arg4[%c2_82, %c0_83, %c0_84] : memref<4x1x8xf32, #tpu.memory_space<vmem>>, vector<1x1x8xf32>
    %133 = vector.shape_cast %132 : vector<1x1x8xf32> to vector<1x8xf32>
    %134 = vector.broadcast %133 : vector<1x8xf32> to vector<16x8xf32>
    %135 = arith.addf %131, %134 : vector<16x8xf32>
    %cst_85 = arith.constant 0.353553385 : f32
    %136 = vector.broadcast %cst_85 : f32 to vector<16x8xf32>
    %137 = arith.mulf %135, %136 : vector<16x8xf32>
    %c2_86 = arith.constant 2 : index
    %c0_87 = arith.constant 0 : index
    %c0_88 = arith.constant 0 : index
    %138 = vector.load %arg5[%c2_86, %c0_87, %c0_88] : memref<4x32x8xf32, #tpu.memory_space<vmem>>, vector<1x32x8xf32>
    %139 = vector.shape_cast %138 : vector<1x32x8xf32> to vector<32x8xf32>
    %cst_89 = arith.constant dense<0.000000e+00> : vector<16x8xf32>
    %140 = tpu.matmul %3, %139, %cst_89 {dimension_numbers = #tpu.dot_dimension_numbers<[1], [0], [0], [1], [0, 0, 1, 1], [], []>} : vector<16x32xf32>, vector<32x8xf32>, vector<16x8xf32> -> vector<16x8xf32>
    %c2_90 = arith.constant 2 : index
    %c0_91 = arith.constant 0 : index
    %c0_92 = arith.constant 0 : index
    %141 = vector.load %arg6[%c2_90, %c0_91, %c0_92] : memref<4x1x8xf32, #tpu.memory_space<vmem>>, vector<1x1x8xf32>
    %142 = vector.shape_cast %141 : vector<1x1x8xf32> to vector<1x8xf32>
    %143 = vector.broadcast %142 : vector<1x8xf32> to vector<16x8xf32>
    %144 = arith.addf %140, %143 : vector<16x8xf32>
    %c2_93 = arith.constant 2 : index
    %c0_94 = arith.constant 0 : index
    %c0_95 = arith.constant 0 : index
    %145 = vector.load %arg7[%c2_93, %c0_94, %c0_95] : memref<4x32x8xf32, #tpu.memory_space<vmem>>, vector<1x32x8xf32>
    %146 = vector.shape_cast %145 : vector<1x32x8xf32> to vector<32x8xf32>
    %cst_96 = arith.constant dense<0.000000e+00> : vector<16x8xf32>
    %147 = tpu.matmul %3, %146, %cst_96 {dimension_numbers = #tpu.dot_dimension_numbers<[1], [0], [0], [1], [0, 0, 1, 1], [], []>} : vector<16x32xf32>, vector<32x8xf32>, vector<16x8xf32> -> vector<16x8xf32>
    %c2_97 = arith.constant 2 : index
    %c0_98 = arith.constant 0 : index
    %c0_99 = arith.constant 0 : index
    %148 = vector.load %arg8[%c2_97, %c0_98, %c0_99] : memref<4x1x8xf32, #tpu.memory_space<vmem>>, vector<1x1x8xf32>
    %149 = vector.shape_cast %148 : vector<1x1x8xf32> to vector<1x8xf32>
    %150 = vector.broadcast %149 : vector<1x8xf32> to vector<16x8xf32>
    %151 = arith.addf %147, %150 : vector<16x8xf32>
    %152 = vector.extract_strided_slice %137 {offsets = [0, 0], sizes = [8, 8], strides = [1, 1]} : vector<16x8xf32> to vector<8x8xf32>
    %153 = vector.extract_strided_slice %144 {offsets = [0, 0], sizes = [8, 8], strides = [1, 1]} : vector<16x8xf32> to vector<8x8xf32>
    %154 = tpu.transpose %153, [1, 0] : vector<8x8xf32> -> vector<8x8xf32>
    %cst_100 = arith.constant dense<0.000000e+00> : vector<8x8xf32>
    %155 = tpu.matmul %152, %154, %cst_100 {dimension_numbers = #tpu.dot_dimension_numbers<[1], [0], [0], [1], [0, 0, 1, 1], [], []>} : vector<8x8xf32>, vector<8x8xf32>, vector<8x8xf32> -> vector<8x8xf32>
    %cst_101 = arith.constant dense<0xFF800000> : vector<8xf32>
    %156 = vector.multi_reduction <maximumf>, %155, %cst_101 [1] : vector<8x8xf32> to vector<8xf32>
    %157 = vector.shape_cast %156 : vector<8xf32> to vector<8x1xf32>
    %158 = vector.broadcast %157 : vector<8x1xf32> to vector<8x8xf32>
    %159 = arith.subf %155, %158 : vector<8x8xf32>
    %160 = math.exp %159 : vector<8x8xf32>
    %cst_102 = arith.constant dense<0.000000e+00> : vector<8xf32>
    %161 = vector.multi_reduction <add>, %160, %cst_102 [1] : vector<8x8xf32> to vector<8xf32>
    %162 = vector.shape_cast %161 : vector<8xf32> to vector<8x1xf32>
    %163 = tpu.reciprocal %162 {approx = true} : vector<8x1xf32> -> vector<8x1xf32>
    %164 = vector.broadcast %163 : vector<8x1xf32> to vector<8x8xf32>
    %165 = arith.mulf %160, %164 : vector<8x8xf32>
    %166 = vector.extract_strided_slice %151 {offsets = [0, 0], sizes = [8, 8], strides = [1, 1]} : vector<16x8xf32> to vector<8x8xf32>
    %cst_103 = arith.constant dense<0.000000e+00> : vector<8x8xf32>
    %167 = tpu.matmul %165, %166, %cst_103 {dimension_numbers = #tpu.dot_dimension_numbers<[1], [0], [0], [1], [0, 0, 1, 1], [], []>} : vector<8x8xf32>, vector<8x8xf32>, vector<8x8xf32> -> vector<8x8xf32>
    %c0_104 = arith.constant 0 : index
    %c0_105 = arith.constant 0 : index
    %168 = vector.load %arg34[%c0_104, %c0_105] : memref<16x8xf32, #tpu.memory_space<vmem>>, vector<8x8xf32>
    tpu.vector_store %arg34[%c0_104, %c0_105], %167 {strides = array<i32>} : memref<16x8xf32, #tpu.memory_space<vmem>>, vector<8x8xf32>,
    %169 = vector.extract_strided_slice %137 {offsets = [8, 0], sizes = [8, 8], strides = [1, 1]} : vector<16x8xf32> to vector<8x8xf32>
    %170 = vector.extract_strided_slice %144 {offsets = [8, 0], sizes = [8, 8], strides = [1, 1]} : vector<16x8xf32> to vector<8x8xf32>
    %171 = tpu.transpose %170, [1, 0] : vector<8x8xf32> -> vector<8x8xf32>
    %cst_106 = arith.constant dense<0.000000e+00> : vector<8x8xf32>
    %172 = tpu.matmul %169, %171, %cst_106 {dimension_numbers = #tpu.dot_dimension_numbers<[1], [0], [0], [1], [0, 0, 1, 1], [], []>} : vector<8x8xf32>, vector<8x8xf32>, vector<8x8xf32> -> vector<8x8xf32>
    %cst_107 = arith.constant dense<0xFF800000> : vector<8xf32>
    %173 = vector.multi_reduction <maximumf>, %172, %cst_107 [1] : vector<8x8xf32> to vector<8xf32>
    %174 = vector.shape_cast %173 : vector<8xf32> to vector<8x1xf32>
    %175 = vector.broadcast %174 : vector<8x1xf32> to vector<8x8xf32>
    %176 = arith.subf %172, %175 : vector<8x8xf32>
    %177 = math.exp %176 : vector<8x8xf32>
    %cst_108 = arith.constant dense<0.000000e+00> : vector<8xf32>
    %178 = vector.multi_reduction <add>, %177, %cst_108 [1] : vector<8x8xf32> to vector<8xf32>
    %179 = vector.shape_cast %178 : vector<8xf32> to vector<8x1xf32>
    %180 = tpu.reciprocal %179 {approx = true} : vector<8x1xf32> -> vector<8x1xf32>
    %181 = vector.broadcast %180 : vector<8x1xf32> to vector<8x8xf32>
    %182 = arith.mulf %177, %181 : vector<8x8xf32>
    %183 = vector.extract_strided_slice %151 {offsets = [8, 0], sizes = [8, 8], strides = [1, 1]} : vector<16x8xf32> to vector<8x8xf32>
    %cst_109 = arith.constant dense<0.000000e+00> : vector<8x8xf32>
    %184 = tpu.matmul %182, %183, %cst_109 {dimension_numbers = #tpu.dot_dimension_numbers<[1], [0], [0], [1], [0, 0, 1, 1], [], []>} : vector<8x8xf32>, vector<8x8xf32>, vector<8x8xf32> -> vector<8x8xf32>
    %c8_110 = arith.constant 8 : index
    %c0_111 = arith.constant 0 : index
    %185 = vector.load %arg34[%c8_110, %c0_111] : memref<16x8xf32, #tpu.memory_space<vmem>>, vector<8x8xf32>
    tpu.vector_store %arg34[%c8_110, %c0_111], %184 {strides = array<i32>} : memref<16x8xf32, #tpu.memory_space<vmem>>, vector<8x8xf32>,
    %c0_112 = arith.constant 0 : index
    %c0_113 = arith.constant 0 : index
    %186 = vector.load %arg34[%c0_112, %c0_113] : memref<16x8xf32, #tpu.memory_space<vmem>>, vector<16x8xf32>
    %c2_114 = arith.constant 2 : index
    %c0_115 = arith.constant 0 : index
    %c0_116 = arith.constant 0 : index
    %187 = vector.load %arg9[%c2_114, %c0_115, %c0_116] : memref<4x8x32xf32, #tpu.memory_space<vmem>>, vector<1x8x32xf32>
    %188 = vector.shape_cast %187 : vector<1x8x32xf32> to vector<8x32xf32>
    %cst_117 = arith.constant dense<0.000000e+00> : vector<16x32xf32>
    %189 = tpu.matmul %186, %188, %cst_117 {dimension_numbers = #tpu.dot_dimension_numbers<[1], [0], [0], [1], [0, 0, 1, 1], [], []>} : vector<16x8xf32>, vector<8x32xf32>, vector<16x32xf32> -> vector<16x32xf32>
    %190 = arith.addf %128, %189 : vector<16x32xf32>
    %c3 = arith.constant 3 : index
    %c0_118 = arith.constant 0 : index
    %c0_119 = arith.constant 0 : index
    %191 = vector.load %arg3[%c3, %c0_118, %c0_119] : memref<4x32x8xf32, #tpu.memory_space<vmem>>, vector<1x32x8xf32>
    %192 = vector.shape_cast %191 : vector<1x32x8xf32> to vector<32x8xf32>
    %cst_120 = arith.constant dense<0.000000e+00> : vector<16x8xf32>
    %193 = tpu.matmul %3, %192, %cst_120 {dimension_numbers = #tpu.dot_dimension_numbers<[1], [0], [0], [1], [0, 0, 1, 1], [], []>} : vector<16x32xf32>, vector<32x8xf32>, vector<16x8xf32> -> vector<16x8xf32>
    %c3_121 = arith.constant 3 : index
    %c0_122 = arith.constant 0 : index
    %c0_123 = arith.constant 0 : index
    %194 = vector.load %arg4[%c3_121, %c0_122, %c0_123] : memref<4x1x8xf32, #tpu.memory_space<vmem>>, vector<1x1x8xf32>
    %195 = vector.shape_cast %194 : vector<1x1x8xf32> to vector<1x8xf32>
    %196 = vector.broadcast %195 : vector<1x8xf32> to vector<16x8xf32>
    %197 = arith.addf %193, %196 : vector<16x8xf32>
    %cst_124 = arith.constant 0.353553385 : f32
    %198 = vector.broadcast %cst_124 : f32 to vector<16x8xf32>
    %199 = arith.mulf %197, %198 : vector<16x8xf32>
    %c3_125 = arith.constant 3 : index
    %c0_126 = arith.constant 0 : index
    %c0_127 = arith.constant 0 : index
    %200 = vector.load %arg5[%c3_125, %c0_126, %c0_127] : memref<4x32x8xf32, #tpu.memory_space<vmem>>, vector<1x32x8xf32>
    %201 = vector.shape_cast %200 : vector<1x32x8xf32> to vector<32x8xf32>
    %cst_128 = arith.constant dense<0.000000e+00> : vector<16x8xf32>
    %202 = tpu.matmul %3, %201, %cst_128 {dimension_numbers = #tpu.dot_dimension_numbers<[1], [0], [0], [1], [0, 0, 1, 1], [], []>} : vector<16x32xf32>, vector<32x8xf32>, vector<16x8xf32> -> vector<16x8xf32>
    %c3_129 = arith.constant 3 : index
    %c0_130 = arith.constant 0 : index
    %c0_131 = arith.constant 0 : index
    %203 = vector.load %arg6[%c3_129, %c0_130, %c0_131] : memref<4x1x8xf32, #tpu.memory_space<vmem>>, vector<1x1x8xf32>
    %204 = vector.shape_cast %203 : vector<1x1x8xf32> to vector<1x8xf32>
    %205 = vector.broadcast %204 : vector<1x8xf32> to vector<16x8xf32>
    %206 = arith.addf %202, %205 : vector<16x8xf32>
    %c3_132 = arith.constant 3 : index
    %c0_133 = arith.constant 0 : index
    %c0_134 = arith.constant 0 : index
    %207 = vector.load %arg7[%c3_132, %c0_133, %c0_134] : memref<4x32x8xf32, #tpu.memory_space<vmem>>, vector<1x32x8xf32>
    %208 = vector.shape_cast %207 : vector<1x32x8xf32> to vector<32x8xf32>
    %cst_135 = arith.constant dense<0.000000e+00> : vector<16x8xf32>
    %209 = tpu.matmul %3, %208, %cst_135 {dimension_numbers = #tpu.dot_dimension_numbers<[1], [0], [0], [1], [0, 0, 1, 1], [], []>} : vector<16x32xf32>, vector<32x8xf32>, vector<16x8xf32> -> vector<16x8xf32>
    %c3_136 = arith.constant 3 : index
    %c0_137 = arith.constant 0 : index
    %c0_138 = arith.constant 0 : index
    %210 = vector.load %arg8[%c3_136, %c0_137, %c0_138] : memref<4x1x8xf32, #tpu.memory_space<vmem>>, vector<1x1x8xf32>
    %211 = vector.shape_cast %210 : vector<1x1x8xf32> to vector<1x8xf32>
    %212 = vector.broadcast %211 : vector<1x8xf32> to vector<16x8xf32>
    %213 = arith.addf %209, %212 : vector<16x8xf32>
    %214 = vector.extract_strided_slice %199 {offsets = [0, 0], sizes = [8, 8], strides = [1, 1]} : vector<16x8xf32> to vector<8x8xf32>
    %215 = vector.extract_strided_slice %206 {offsets = [0, 0], sizes = [8, 8], strides = [1, 1]} : vector<16x8xf32> to vector<8x8xf32>
    %216 = tpu.transpose %215, [1, 0] : vector<8x8xf32> -> vector<8x8xf32>
    %cst_139 = arith.constant dense<0.000000e+00> : vector<8x8xf32>
    %217 = tpu.matmul %214, %216, %cst_139 {dimension_numbers = #tpu.dot_dimension_numbers<[1], [0], [0], [1], [0, 0, 1, 1], [], []>} : vector<8x8xf32>, vector<8x8xf32>, vector<8x8xf32> -> vector<8x8xf32>
    %cst_140 = arith.constant dense<0xFF800000> : vector<8xf32>
    %218 = vector.multi_reduction <maximumf>, %217, %cst_140 [1] : vector<8x8xf32> to vector<8xf32>
    %219 = vector.shape_cast %218 : vector<8xf32> to vector<8x1xf32>
    %220 = vector.broadcast %219 : vector<8x1xf32> to vector<8x8xf32>
    %221 = arith.subf %217, %220 : vector<8x8xf32>
    %222 = math.exp %221 : vector<8x8xf32>
    %cst_141 = arith.constant dense<0.000000e+00> : vector<8xf32>
    %223 = vector.multi_reduction <add>, %222, %cst_141 [1] : vector<8x8xf32> to vector<8xf32>
    %224 = vector.shape_cast %223 : vector<8xf32> to vector<8x1xf32>
    %225 = tpu.reciprocal %224 {approx = true} : vector<8x1xf32> -> vector<8x1xf32>
    %226 = vector.broadcast %225 : vector<8x1xf32> to vector<8x8xf32>
    %227 = arith.mulf %222, %226 : vector<8x8xf32>
    %228 = vector.extract_strided_slice %213 {offsets = [0, 0], sizes = [8, 8], strides = [1, 1]} : vector<16x8xf32> to vector<8x8xf32>
    %cst_142 = arith.constant dense<0.000000e+00> : vector<8x8xf32>
    %229 = tpu.matmul %227, %228, %cst_142 {dimension_numbers = #tpu.dot_dimension_numbers<[1], [0], [0], [1], [0, 0, 1, 1], [], []>} : vector<8x8xf32>, vector<8x8xf32>, vector<8x8xf32> -> vector<8x8xf32>
    %c0_143 = arith.constant 0 : index
    %c0_144 = arith.constant 0 : index
    %230 = vector.load %arg34[%c0_143, %c0_144] : memref<16x8xf32, #tpu.memory_space<vmem>>, vector<8x8xf32>
    tpu.vector_store %arg34[%c0_143, %c0_144], %229 {strides = array<i32>} : memref<16x8xf32, #tpu.memory_space<vmem>>, vector<8x8xf32>,
    %231 = vector.extract_strided_slice %199 {offsets = [8, 0], sizes = [8, 8], strides = [1, 1]} : vector<16x8xf32> to vector<8x8xf32>
    %232 = vector.extract_strided_slice %206 {offsets = [8, 0], sizes = [8, 8], strides = [1, 1]} : vector<16x8xf32> to vector<8x8xf32>
    %233 = tpu.transpose %232, [1, 0] : vector<8x8xf32> -> vector<8x8xf32>
    %cst_145 = arith.constant dense<0.000000e+00> : vector<8x8xf32>
    %234 = tpu.matmul %231, %233, %cst_145 {dimension_numbers = #tpu.dot_dimension_numbers<[1], [0], [0], [1], [0, 0, 1, 1], [], []>} : vector<8x8xf32>, vector<8x8xf32>, vector<8x8xf32> -> vector<8x8xf32>
    %cst_146 = arith.constant dense<0xFF800000> : vector<8xf32>
    %235 = vector.multi_reduction <maximumf>, %234, %cst_146 [1] : vector<8x8xf32> to vector<8xf32>
    %236 = vector.shape_cast %235 : vector<8xf32> to vector<8x1xf32>
    %237 = vector.broadcast %236 : vector<8x1xf32> to vector<8x8xf32>
    %238 = arith.subf %234, %237 : vector<8x8xf32>
    %239 = math.exp %238 : vector<8x8xf32>
    %cst_147 = arith.constant dense<0.000000e+00> : vector<8xf32>
    %240 = vector.multi_reduction <add>, %239, %cst_147 [1] : vector<8x8xf32> to vector<8xf32>
    %241 = vector.shape_cast %240 : vector<8xf32> to vector<8x1xf32>
    %242 = tpu.reciprocal %241 {approx = true} : vector<8x1xf32> -> vector<8x1xf32>
    %243 = vector.broadcast %242 : vector<8x1xf32> to vector<8x8xf32>
    %244 = arith.mulf %239, %243 : vector<8x8xf32>
    %245 = vector.extract_strided_slice %213 {offsets = [8, 0], sizes = [8, 8], strides = [1, 1]} : vector<16x8xf32> to vector<8x8xf32>
    %cst_148 = arith.constant dense<0.000000e+00> : vector<8x8xf32>
    %246 = tpu.matmul %244, %245, %cst_148 {dimension_numbers = #tpu.dot_dimension_numbers<[1], [0], [0], [1], [0, 0, 1, 1], [], []>} : vector<8x8xf32>, vector<8x8xf32>, vector<8x8xf32> -> vector<8x8xf32>
    %c8_149 = arith.constant 8 : index
    %c0_150 = arith.constant 0 : index
    %247 = vector.load %arg34[%c8_149, %c0_150] : memref<16x8xf32, #tpu.memory_space<vmem>>, vector<8x8xf32>
    tpu.vector_store %arg34[%c8_149, %c0_150], %246 {strides = array<i32>} : memref<16x8xf32, #tpu.memory_space<vmem>>, vector<8x8xf32>,
    %c0_151 = arith.constant 0 : index
    %c0_152 = arith.constant 0 : index
    %248 = vector.load %arg34[%c0_151, %c0_152] : memref<16x8xf32, #tpu.memory_space<vmem>>, vector<16x8xf32>
    %c3_153 = arith.constant 3 : index
    %c0_154 = arith.constant 0 : index
    %c0_155 = arith.constant 0 : index
    %249 = vector.load %arg9[%c3_153, %c0_154, %c0_155] : memref<4x8x32xf32, #tpu.memory_space<vmem>>, vector<1x8x32xf32>
    %250 = vector.shape_cast %249 : vector<1x8x32xf32> to vector<8x32xf32>
    %cst_156 = arith.constant dense<0.000000e+00> : vector<16x32xf32>
    %251 = tpu.matmul %248, %250, %cst_156 {dimension_numbers = #tpu.dot_dimension_numbers<[1], [0], [0], [1], [0, 0, 1, 1], [], []>} : vector<16x8xf32>, vector<8x32xf32>, vector<16x32xf32> -> vector<16x32xf32>
    %252 = arith.addf %190, %251 : vector<16x32xf32>
    %c0_157 = arith.constant 0 : index
    %c0_158 = arith.constant 0 : index
    %253 = vector.load %arg10[%c0_157, %c0_158] : memref<1x32xf32, #tpu.memory_space<vmem>>, vector<1x32xf32>
    %254 = vector.broadcast %253 : vector<1x32xf32> to vector<16x32xf32>
    %255 = arith.addf %252, %254 : vector<16x32xf32>
    %256 = arith.addf %255, %3 : vector<16x32xf32>
    %cst_159 = arith.constant dense<0.000000e+00> : vector<16xf32>
    %257 = vector.multi_reduction <add>, %256, %cst_159 [1] : vector<16x32xf32> to vector<16xf32>
    %258 = vector.shape_cast %257 : vector<16xf32> to vector<16x1xf32>
    %cst_160 = arith.constant 3.200000e+01 : f32
    %259 = vector.broadcast %cst_160 : f32 to vector<16x1xf32>
    %260 = arith.divf %258, %259 : vector<16x1xf32>
    %261 = vector.broadcast %260 : vector<16x1xf32> to vector<16x32xf32>
    %262 = arith.subf %256, %261 : vector<16x32xf32>
    %263 = arith.mulf %262, %262 : vector<16x32xf32>
    %cst_161 = arith.constant dense<0.000000e+00> : vector<16xf32>
    %264 = vector.multi_reduction <add>, %263, %cst_161 [1] : vector<16x32xf32> to vector<16xf32>
    %265 = vector.shape_cast %264 : vector<16xf32> to vector<16x1xf32>
    %cst_162 = arith.constant 3.200000e+01 : f32
    %266 = vector.broadcast %cst_162 : f32 to vector<16x1xf32>
    %267 = arith.divf %265, %266 : vector<16x1xf32>
    %268 = vector.broadcast %260 : vector<16x1xf32> to vector<16x32xf32>
    %269 = arith.subf %256, %268 : vector<16x32xf32>
    %cst_163 = arith.constant 9.99999974E-6 : f32
    %270 = vector.broadcast %cst_163 : f32 to vector<16x1xf32>
    %271 = arith.addf %267, %270 : vector<16x1xf32>
    %272 = math.rsqrt %271 : vector<16x1xf32>
    %273 = vector.broadcast %272 : vector<16x1xf32> to vector<16x32xf32>
    %274 = arith.mulf %269, %273 : vector<16x32xf32>
    %c0_164 = arith.constant 0 : index
    %c0_165 = arith.constant 0 : index
    %275 = vector.load %arg15[%c0_164, %c0_165] : memref<1x32xf32, #tpu.memory_space<vmem>>, vector<1x32xf32>
    %276 = vector.broadcast %275 : vector<1x32xf32> to vector<16x32xf32>
    %277 = arith.mulf %274, %276 : vector<16x32xf32>
    %c0_166 = arith.constant 0 : index
    %c0_167 = arith.constant 0 : index
    %278 = vector.load %arg16[%c0_166, %c0_167] : memref<1x32xf32, #tpu.memory_space<vmem>>, vector<1x32xf32>
    %279 = vector.broadcast %278 : vector<1x32xf32> to vector<16x32xf32>
    %280 = arith.addf %277, %279 : vector<16x32xf32>
    %c0_168 = arith.constant 0 : index
    %c0_169 = arith.constant 0 : index
    %281 = vector.load %arg11[%c0_168, %c0_169] : memref<32x16xf32, #tpu.memory_space<vmem>>, vector<32x16xf32>
    %cst_170 = arith.constant dense<0.000000e+00> : vector<16x16xf32>
    %282 = tpu.matmul %280, %281, %cst_170 {dimension_numbers = #tpu.dot_dimension_numbers<[1], [0], [0], [1], [0, 0, 1, 1], [], []>} : vector<16x32xf32>, vector<32x16xf32>, vector<16x16xf32> -> vector<16x16xf32>
    %c0_171 = arith.constant 0 : index
    %c0_172 = arith.constant 0 : index
    %283 = vector.load %arg12[%c0_171, %c0_172] : memref<1x16xf32, #tpu.memory_space<vmem>>, vector<1x16xf32>
    %284 = vector.broadcast %283 : vector<1x16xf32> to vector<16x16xf32>
    %285 = arith.addf %282, %284 : vector<16x16xf32>
    %cst_173 = arith.constant 0.000000e+00 : f32
    %286 = vector.broadcast %cst_173 : f32 to vector<16x16xf32>
    %287 = arith.maximumf %285, %286 : vector<16x16xf32>
    %c0_174 = arith.constant 0 : index
    %c0_175 = arith.constant 0 : index
    %288 = vector.load %arg13[%c0_174, %c0_175] : memref<16x32xf32, #tpu.memory_space<vmem>>, vector<16x32xf32>
    %cst_176 = arith.constant dense<0.000000e+00> : vector<16x32xf32>
    %289 = tpu.matmul %287, %288, %cst_176 {dimension_numbers = #tpu.dot_dimension_numbers<[1], [0], [0], [1], [0, 0, 1, 1], [], []>} : vector<16x16xf32>, vector<16x32xf32>, vector<16x32xf32> -> vector<16x32xf32>
    %c0_177 = arith.constant 0 : index
    %c0_178 = arith.constant 0 : index
    %290 = vector.load %arg14[%c0_177, %c0_178] : memref<1x32xf32, #tpu.memory_space<vmem>>, vector<1x32xf32>
    %291 = vector.broadcast %290 : vector<1x32xf32> to vector<16x32xf32>
    %292 = arith.addf %289, %291 : vector<16x32xf32>
    %293 = arith.addf %292, %280 : vector<16x32xf32>
    %cst_179 = arith.constant dense<0.000000e+00> : vector<16xf32>
    %294 = vector.multi_reduction <add>, %293, %cst_179 [1] : vector<16x32xf32> to vector<16xf32>
    %295 = vector.shape_cast %294 : vector<16xf32> to vector<16x1xf32>
    %cst_180 = arith.constant 3.200000e+01 : f32
    %296 = vector.broadcast %cst_180 : f32 to vector<16x1xf32>
    %297 = arith.divf %295, %296 : vector<16x1xf32>
    %298 = vector.broadcast %297 : vector<16x1xf32> to vector<16x32xf32>
    %299 = arith.subf %293, %298 : vector<16x32xf32>
    %300 = arith.mulf %299, %299 : vector<16x32xf32>
    %cst_181 = arith.constant dense<0.000000e+00> : vector<16xf32>
    %301 = vector.multi_reduction <add>, %300, %cst_181 [1] : vector<16x32xf32> to vector<16xf32>
    %302 = vector.shape_cast %301 : vector<16xf32> to vector<16x1xf32>
    %cst_182 = arith.constant 3.200000e+01 : f32
    %303 = vector.broadcast %cst_182 : f32 to vector<16x1xf32>
    %304 = arith.divf %302, %303 : vector<16x1xf32>
    %305 = vector.broadcast %297 : vector<16x1xf32> to vector<16x32xf32>
    %306 = arith.subf %293, %305 : vector<16x32xf32>
    %cst_183 = arith.constant 9.99999974E-6 : f32
    %307 = vector.broadcast %cst_183 : f32 to vector<16x1xf32>
    %308 = arith.addf %304, %307 : vector<16x1xf32>
    %309 = math.rsqrt %308 : vector<16x1xf32>
    %310 = vector.broadcast %309 : vector<16x1xf32> to vector<16x32xf32>
    %311 = arith.mulf %306, %310 : vector<16x32xf32>
    %c0_184 = arith.constant 0 : index
    %c0_185 = arith.constant 0 : index
    %312 = vector.load %arg15[%c0_184, %c0_185] : memref<1x32xf32, #tpu.memory_space<vmem>>, vector<1x32xf32>
    %313 = vector.broadcast %312 : vector<1x32xf32> to vector<16x32xf32>
    %314 = arith.mulf %311, %313 : vector<16x32xf32>
    %c0_186 = arith.constant 0 : index
    %c0_187 = arith.constant 0 : index
    %315 = vector.load %arg16[%c0_186, %c0_187] : memref<1x32xf32, #tpu.memory_space<vmem>>, vector<1x32xf32>
    %316 = vector.broadcast %315 : vector<1x32xf32> to vector<16x32xf32>
    %317 = arith.addf %314, %316 : vector<16x32xf32>
    %c0_188 = arith.constant 0 : index
    %c0_189 = arith.constant 0 : index
    %318 = vector.load %arg2[%c0_188, %c0_189] : memref<16x32xf32, #tpu.memory_space<vmem>>, vector<16x32xf32>
    %cst_190 = arith.constant 0.000000e+00 : f32
    %319 = vector.broadcast %cst_190 : f32 to vector<16x32xf32>
    %c0_191 = arith.constant 0 : index
    %c0_192 = arith.constant 0 : index
    %c0_193 = arith.constant 0 : index
    %320 = vector.load %arg17[%c0_191, %c0_192, %c0_193] : memref<4x32x8xf32, #tpu.memory_space<vmem>>, vector<1x32x8xf32>
    %321 = vector.shape_cast %320 : vector<1x32x8xf32> to vector<32x8xf32>
    %cst_194 = arith.constant dense<0.000000e+00> : vector<16x8xf32>
    %322 = tpu.matmul %318, %321, %cst_194 {dimension_numbers = #tpu.dot_dimension_numbers<[1], [0], [0], [1], [0, 0, 1, 1], [], []>} : vector<16x32xf32>, vector<32x8xf32>, vector<16x8xf32> -> vector<16x8xf32>
    %c0_195 = arith.constant 0 : index
    %c0_196 = arith.constant 0 : index
    %c0_197 = arith.constant 0 : index
    %323 = vector.load %arg18[%c0_195, %c0_196, %c0_197] : memref<4x1x8xf32, #tpu.memory_space<vmem>>, vector<1x1x8xf32>
    %324 = vector.shape_cast %323 : vector<1x1x8xf32> to vector<1x8xf32>
    %325 = vector.broadcast %324 : vector<1x8xf32> to vector<16x8xf32>
    %326 = arith.addf %322, %325 : vector<16x8xf32>
    %cst_198 = arith.constant 0.353553385 : f32
    %327 = vector.broadcast %cst_198 : f32 to vector<16x8xf32>
    %328 = arith.mulf %326, %327 : vector<16x8xf32>
    %c0_199 = arith.constant 0 : index
    %c0_200 = arith.constant 0 : index
    %c0_201 = arith.constant 0 : index
    %329 = vector.load %arg19[%c0_199, %c0_200, %c0_201] : memref<4x32x8xf32, #tpu.memory_space<vmem>>, vector<1x32x8xf32>
    %330 = vector.shape_cast %329 : vector<1x32x8xf32> to vector<32x8xf32>
    %cst_202 = arith.constant dense<0.000000e+00> : vector<16x8xf32>
    %331 = tpu.matmul %318, %330, %cst_202 {dimension_numbers = #tpu.dot_dimension_numbers<[1], [0], [0], [1], [0, 0, 1, 1], [], []>} : vector<16x32xf32>, vector<32x8xf32>, vector<16x8xf32> -> vector<16x8xf32>
    %c0_203 = arith.constant 0 : index
    %c0_204 = arith.constant 0 : index
    %c0_205 = arith.constant 0 : index
    %332 = vector.load %arg20[%c0_203, %c0_204, %c0_205] : memref<4x1x8xf32, #tpu.memory_space<vmem>>, vector<1x1x8xf32>
    %333 = vector.shape_cast %332 : vector<1x1x8xf32> to vector<1x8xf32>
    %334 = vector.broadcast %333 : vector<1x8xf32> to vector<16x8xf32>
    %335 = arith.addf %331, %334 : vector<16x8xf32>
    %c0_206 = arith.constant 0 : index
    %c0_207 = arith.constant 0 : index
    %c0_208 = arith.constant 0 : index
    %336 = vector.load %arg21[%c0_206, %c0_207, %c0_208] : memref<4x32x8xf32, #tpu.memory_space<vmem>>, vector<1x32x8xf32>
    %337 = vector.shape_cast %336 : vector<1x32x8xf32> to vector<32x8xf32>
    %cst_209 = arith.constant dense<0.000000e+00> : vector<16x8xf32>
    %338 = tpu.matmul %318, %337, %cst_209 {dimension_numbers = #tpu.dot_dimension_numbers<[1], [0], [0], [1], [0, 0, 1, 1], [], []>} : vector<16x32xf32>, vector<32x8xf32>, vector<16x8xf32> -> vector<16x8xf32>
    %c0_210 = arith.constant 0 : index
    %c0_211 = arith.constant 0 : index
    %c0_212 = arith.constant 0 : index
    %339 = vector.load %arg22[%c0_210, %c0_211, %c0_212] : memref<4x1x8xf32, #tpu.memory_space<vmem>>, vector<1x1x8xf32>
    %340 = vector.shape_cast %339 : vector<1x1x8xf32> to vector<1x8xf32>
    %341 = vector.broadcast %340 : vector<1x8xf32> to vector<16x8xf32>
    %342 = arith.addf %338, %341 : vector<16x8xf32>
    %343 = vector.extract_strided_slice %328 {offsets = [0, 0], sizes = [8, 8], strides = [1, 1]} : vector<16x8xf32> to vector<8x8xf32>
    %344 = vector.extract_strided_slice %335 {offsets = [0, 0], sizes = [8, 8], strides = [1, 1]} : vector<16x8xf32> to vector<8x8xf32>
    %345 = tpu.transpose %344, [1, 0] : vector<8x8xf32> -> vector<8x8xf32>
    %cst_213 = arith.constant dense<0.000000e+00> : vector<8x8xf32>
    %346 = tpu.matmul %343, %345, %cst_213 {dimension_numbers = #tpu.dot_dimension_numbers<[1], [0], [0], [1], [0, 0, 1, 1], [], []>} : vector<8x8xf32>, vector<8x8xf32>, vector<8x8xf32> -> vector<8x8xf32>
    %cst_214 = arith.constant -1.000000e+09 : f32
    %347 = vector.broadcast %cst_214 : f32 to vector<8x8xf32>
    %348 = arith.select %2, %347, %346 : vector<8x8xi1>, vector<8x8xf32>
    %cst_215 = arith.constant dense<0xFF800000> : vector<8xf32>
    %349 = vector.multi_reduction <maximumf>, %348, %cst_215 [1] : vector<8x8xf32> to vector<8xf32>
    %350 = vector.shape_cast %349 : vector<8xf32> to vector<8x1xf32>
    %351 = vector.broadcast %350 : vector<8x1xf32> to vector<8x8xf32>
    %352 = arith.subf %348, %351 : vector<8x8xf32>
    %353 = math.exp %352 : vector<8x8xf32>
    %cst_216 = arith.constant dense<0.000000e+00> : vector<8xf32>
    %354 = vector.multi_reduction <add>, %353, %cst_216 [1] : vector<8x8xf32> to vector<8xf32>
    %355 = vector.shape_cast %354 : vector<8xf32> to vector<8x1xf32>
    %356 = tpu.reciprocal %355 {approx = true} : vector<8x1xf32> -> vector<8x1xf32>
    %357 = vector.broadcast %356 : vector<8x1xf32> to vector<8x8xf32>
    %358 = arith.mulf %353, %357 : vector<8x8xf32>
    %359 = vector.extract_strided_slice %342 {offsets = [0, 0], sizes = [8, 8], strides = [1, 1]} : vector<16x8xf32> to vector<8x8xf32>
    %cst_217 = arith.constant dense<0.000000e+00> : vector<8x8xf32>
    %360 = tpu.matmul %358, %359, %cst_217 {dimension_numbers = #tpu.dot_dimension_numbers<[1], [0], [0], [1], [0, 0, 1, 1], [], []>} : vector<8x8xf32>, vector<8x8xf32>, vector<8x8xf32> -> vector<8x8xf32>
    %c0_218 = arith.constant 0 : index
    %c0_219 = arith.constant 0 : index
    %361 = vector.load %arg34[%c0_218, %c0_219] : memref<16x8xf32, #tpu.memory_space<vmem>>, vector<8x8xf32>
    tpu.vector_store %arg34[%c0_218, %c0_219], %360 {strides = array<i32>} : memref<16x8xf32, #tpu.memory_space<vmem>>, vector<8x8xf32>,
    %362 = vector.extract_strided_slice %328 {offsets = [8, 0], sizes = [8, 8], strides = [1, 1]} : vector<16x8xf32> to vector<8x8xf32>
    %363 = vector.extract_strided_slice %335 {offsets = [8, 0], sizes = [8, 8], strides = [1, 1]} : vector<16x8xf32> to vector<8x8xf32>
    %364 = tpu.transpose %363, [1, 0] : vector<8x8xf32> -> vector<8x8xf32>
    %cst_220 = arith.constant dense<0.000000e+00> : vector<8x8xf32>
    %365 = tpu.matmul %362, %364, %cst_220 {dimension_numbers = #tpu.dot_dimension_numbers<[1], [0], [0], [1], [0, 0, 1, 1], [], []>} : vector<8x8xf32>, vector<8x8xf32>, vector<8x8xf32> -> vector<8x8xf32>
    %cst_221 = arith.constant -1.000000e+09 : f32
    %366 = vector.broadcast %cst_221 : f32 to vector<8x8xf32>
    %367 = arith.select %2, %366, %365 : vector<8x8xi1>, vector<8x8xf32>
    %cst_222 = arith.constant dense<0xFF800000> : vector<8xf32>
    %368 = vector.multi_reduction <maximumf>, %367, %cst_222 [1] : vector<8x8xf32> to vector<8xf32>
    %369 = vector.shape_cast %368 : vector<8xf32> to vector<8x1xf32>
    %370 = vector.broadcast %369 : vector<8x1xf32> to vector<8x8xf32>
    %371 = arith.subf %367, %370 : vector<8x8xf32>
    %372 = math.exp %371 : vector<8x8xf32>
    %cst_223 = arith.constant dense<0.000000e+00> : vector<8xf32>
    %373 = vector.multi_reduction <add>, %372, %cst_223 [1] : vector<8x8xf32> to vector<8xf32>
    %374 = vector.shape_cast %373 : vector<8xf32> to vector<8x1xf32>
    %375 = tpu.reciprocal %374 {approx = true} : vector<8x1xf32> -> vector<8x1xf32>
    %376 = vector.broadcast %375 : vector<8x1xf32> to vector<8x8xf32>
    %377 = arith.mulf %372, %376 : vector<8x8xf32>
    %378 = vector.extract_strided_slice %342 {offsets = [8, 0], sizes = [8, 8], strides = [1, 1]} : vector<16x8xf32> to vector<8x8xf32>
    %cst_224 = arith.constant dense<0.000000e+00> : vector<8x8xf32>
    %379 = tpu.matmul %377, %378, %cst_224 {dimension_numbers = #tpu.dot_dimension_numbers<[1], [0], [0], [1], [0, 0, 1, 1], [], []>} : vector<8x8xf32>, vector<8x8xf32>, vector<8x8xf32> -> vector<8x8xf32>
    %c8_225 = arith.constant 8 : index
    %c0_226 = arith.constant 0 : index
    %380 = vector.load %arg34[%c8_225, %c0_226] : memref<16x8xf32, #tpu.memory_space<vmem>>, vector<8x8xf32>
    tpu.vector_store %arg34[%c8_225, %c0_226], %379 {strides = array<i32>} : memref<16x8xf32, #tpu.memory_space<vmem>>, vector<8x8xf32>,
    %c0_227 = arith.constant 0 : index
    %c0_228 = arith.constant 0 : index
    %381 = vector.load %arg34[%c0_227, %c0_228] : memref<16x8xf32, #tpu.memory_space<vmem>>, vector<16x8xf32>
    %c0_229 = arith.constant 0 : index
    %c0_230 = arith.constant 0 : index
    %c0_231 = arith.constant 0 : index
    %382 = vector.load %arg23[%c0_229, %c0_230, %c0_231] : memref<4x8x32xf32, #tpu.memory_space<vmem>>, vector<1x8x32xf32>
    %383 = vector.shape_cast %382 : vector<1x8x32xf32> to vector<8x32xf32>
    %cst_232 = arith.constant dense<0.000000e+00> : vector<16x32xf32>
    %384 = tpu.matmul %381, %383, %cst_232 {dimension_numbers = #tpu.dot_dimension_numbers<[1], [0], [0], [1], [0, 0, 1, 1], [], []>} : vector<16x8xf32>, vector<8x32xf32>, vector<16x32xf32> -> vector<16x32xf32>
    %385 = arith.addf %319, %384 : vector<16x32xf32>
    %c1_233 = arith.constant 1 : index
    %c0_234 = arith.constant 0 : index
    %c0_235 = arith.constant 0 : index
    %386 = vector.load %arg17[%c1_233, %c0_234, %c0_235] : memref<4x32x8xf32, #tpu.memory_space<vmem>>, vector<1x32x8xf32>
    %387 = vector.shape_cast %386 : vector<1x32x8xf32> to vector<32x8xf32>
    %cst_236 = arith.constant dense<0.000000e+00> : vector<16x8xf32>
    %388 = tpu.matmul %318, %387, %cst_236 {dimension_numbers = #tpu.dot_dimension_numbers<[1], [0], [0], [1], [0, 0, 1, 1], [], []>} : vector<16x32xf32>, vector<32x8xf32>, vector<16x8xf32> -> vector<16x8xf32>
    %c1_237 = arith.constant 1 : index
    %c0_238 = arith.constant 0 : index
    %c0_239 = arith.constant 0 : index
    %389 = vector.load %arg18[%c1_237, %c0_238, %c0_239] : memref<4x1x8xf32, #tpu.memory_space<vmem>>, vector<1x1x8xf32>
    %390 = vector.shape_cast %389 : vector<1x1x8xf32> to vector<1x8xf32>
    %391 = vector.broadcast %390 : vector<1x8xf32> to vector<16x8xf32>
    %392 = arith.addf %388, %391 : vector<16x8xf32>
    %cst_240 = arith.constant 0.353553385 : f32
    %393 = vector.broadcast %cst_240 : f32 to vector<16x8xf32>
    %394 = arith.mulf %392, %393 : vector<16x8xf32>
    %c1_241 = arith.constant 1 : index
    %c0_242 = arith.constant 0 : index
    %c0_243 = arith.constant 0 : index
    %395 = vector.load %arg19[%c1_241, %c0_242, %c0_243] : memref<4x32x8xf32, #tpu.memory_space<vmem>>, vector<1x32x8xf32>
    %396 = vector.shape_cast %395 : vector<1x32x8xf32> to vector<32x8xf32>
    %cst_244 = arith.constant dense<0.000000e+00> : vector<16x8xf32>
    %397 = tpu.matmul %318, %396, %cst_244 {dimension_numbers = #tpu.dot_dimension_numbers<[1], [0], [0], [1], [0, 0, 1, 1], [], []>} : vector<16x32xf32>, vector<32x8xf32>, vector<16x8xf32> -> vector<16x8xf32>
    %c1_245 = arith.constant 1 : index
    %c0_246 = arith.constant 0 : index
    %c0_247 = arith.constant 0 : index
    %398 = vector.load %arg20[%c1_245, %c0_246, %c0_247] : memref<4x1x8xf32, #tpu.memory_space<vmem>>, vector<1x1x8xf32>
    %399 = vector.shape_cast %398 : vector<1x1x8xf32> to vector<1x8xf32>
    %400 = vector.broadcast %399 : vector<1x8xf32> to vector<16x8xf32>
    %401 = arith.addf %397, %400 : vector<16x8xf32>
    %c1_248 = arith.constant 1 : index
    %c0_249 = arith.constant 0 : index
    %c0_250 = arith.constant 0 : index
    %402 = vector.load %arg21[%c1_248, %c0_249, %c0_250] : memref<4x32x8xf32, #tpu.memory_space<vmem>>, vector<1x32x8xf32>
    %403 = vector.shape_cast %402 : vector<1x32x8xf32> to vector<32x8xf32>
    %cst_251 = arith.constant dense<0.000000e+00> : vector<16x8xf32>
    %404 = tpu.matmul %318, %403, %cst_251 {dimension_numbers = #tpu.dot_dimension_numbers<[1], [0], [0], [1], [0, 0, 1, 1], [], []>} : vector<16x32xf32>, vector<32x8xf32>, vector<16x8xf32> -> vector<16x8xf32>
    %c1_252 = arith.constant 1 : index
    %c0_253 = arith.constant 0 : index
    %c0_254 = arith.constant 0 : index
    %405 = vector.load %arg22[%c1_252, %c0_253, %c0_254] : memref<4x1x8xf32, #tpu.memory_space<vmem>>, vector<1x1x8xf32>
    %406 = vector.shape_cast %405 : vector<1x1x8xf32> to vector<1x8xf32>
    %407 = vector.broadcast %406 : vector<1x8xf32> to vector<16x8xf32>
    %408 = arith.addf %404, %407 : vector<16x8xf32>
    %409 = vector.extract_strided_slice %394 {offsets = [0, 0], sizes = [8, 8], strides = [1, 1]} : vector<16x8xf32> to vector<8x8xf32>
    %410 = vector.extract_strided_slice %401 {offsets = [0, 0], sizes = [8, 8], strides = [1, 1]} : vector<16x8xf32> to vector<8x8xf32>
    %411 = tpu.transpose %410, [1, 0] : vector<8x8xf32> -> vector<8x8xf32>
    %cst_255 = arith.constant dense<0.000000e+00> : vector<8x8xf32>
    %412 = tpu.matmul %409, %411, %cst_255 {dimension_numbers = #tpu.dot_dimension_numbers<[1], [0], [0], [1], [0, 0, 1, 1], [], []>} : vector<8x8xf32>, vector<8x8xf32>, vector<8x8xf32> -> vector<8x8xf32>
    %cst_256 = arith.constant -1.000000e+09 : f32
    %413 = vector.broadcast %cst_256 : f32 to vector<8x8xf32>
    %414 = arith.select %2, %413, %412 : vector<8x8xi1>, vector<8x8xf32>
    %cst_257 = arith.constant dense<0xFF800000> : vector<8xf32>
    %415 = vector.multi_reduction <maximumf>, %414, %cst_257 [1] : vector<8x8xf32> to vector<8xf32>
    %416 = vector.shape_cast %415 : vector<8xf32> to vector<8x1xf32>
    %417 = vector.broadcast %416 : vector<8x1xf32> to vector<8x8xf32>
    %418 = arith.subf %414, %417 : vector<8x8xf32>
    %419 = math.exp %418 : vector<8x8xf32>
    %cst_258 = arith.constant dense<0.000000e+00> : vector<8xf32>
    %420 = vector.multi_reduction <add>, %419, %cst_258 [1] : vector<8x8xf32> to vector<8xf32>
    %421 = vector.shape_cast %420 : vector<8xf32> to vector<8x1xf32>
    %422 = tpu.reciprocal %421 {approx = true} : vector<8x1xf32> -> vector<8x1xf32>
    %423 = vector.broadcast %422 : vector<8x1xf32> to vector<8x8xf32>
    %424 = arith.mulf %419, %423 : vector<8x8xf32>
    %425 = vector.extract_strided_slice %408 {offsets = [0, 0], sizes = [8, 8], strides = [1, 1]} : vector<16x8xf32> to vector<8x8xf32>
    %cst_259 = arith.constant dense<0.000000e+00> : vector<8x8xf32>
    %426 = tpu.matmul %424, %425, %cst_259 {dimension_numbers = #tpu.dot_dimension_numbers<[1], [0], [0], [1], [0, 0, 1, 1], [], []>} : vector<8x8xf32>, vector<8x8xf32>, vector<8x8xf32> -> vector<8x8xf32>
    %c0_260 = arith.constant 0 : index
    %c0_261 = arith.constant 0 : index
    %427 = vector.load %arg34[%c0_260, %c0_261] : memref<16x8xf32, #tpu.memory_space<vmem>>, vector<8x8xf32>
    tpu.vector_store %arg34[%c0_260, %c0_261], %426 {strides = array<i32>} : memref<16x8xf32, #tpu.memory_space<vmem>>, vector<8x8xf32>,
    %428 = vector.extract_strided_slice %394 {offsets = [8, 0], sizes = [8, 8], strides = [1, 1]} : vector<16x8xf32> to vector<8x8xf32>
    %429 = vector.extract_strided_slice %401 {offsets = [8, 0], sizes = [8, 8], strides = [1, 1]} : vector<16x8xf32> to vector<8x8xf32>
    %430 = tpu.transpose %429, [1, 0] : vector<8x8xf32> -> vector<8x8xf32>
    %cst_262 = arith.constant dense<0.000000e+00> : vector<8x8xf32>
    %431 = tpu.matmul %428, %430, %cst_262 {dimension_numbers = #tpu.dot_dimension_numbers<[1], [0], [0], [1], [0, 0, 1, 1], [], []>} : vector<8x8xf32>, vector<8x8xf32>, vector<8x8xf32> -> vector<8x8xf32>
    %cst_263 = arith.constant -1.000000e+09 : f32
    %432 = vector.broadcast %cst_263 : f32 to vector<8x8xf32>
    %433 = arith.select %2, %432, %431 : vector<8x8xi1>, vector<8x8xf32>
    %cst_264 = arith.constant dense<0xFF800000> : vector<8xf32>
    %434 = vector.multi_reduction <maximumf>, %433, %cst_264 [1] : vector<8x8xf32> to vector<8xf32>
    %435 = vector.shape_cast %434 : vector<8xf32> to vector<8x1xf32>
    %436 = vector.broadcast %435 : vector<8x1xf32> to vector<8x8xf32>
    %437 = arith.subf %433, %436 : vector<8x8xf32>
    %438 = math.exp %437 : vector<8x8xf32>
    %cst_265 = arith.constant dense<0.000000e+00> : vector<8xf32>
    %439 = vector.multi_reduction <add>, %438, %cst_265 [1] : vector<8x8xf32> to vector<8xf32>
    %440 = vector.shape_cast %439 : vector<8xf32> to vector<8x1xf32>
    %441 = tpu.reciprocal %440 {approx = true} : vector<8x1xf32> -> vector<8x1xf32>
    %442 = vector.broadcast %441 : vector<8x1xf32> to vector<8x8xf32>
    %443 = arith.mulf %438, %442 : vector<8x8xf32>
    %444 = vector.extract_strided_slice %408 {offsets = [8, 0], sizes = [8, 8], strides = [1, 1]} : vector<16x8xf32> to vector<8x8xf32>
    %cst_266 = arith.constant dense<0.000000e+00> : vector<8x8xf32>
    %445 = tpu.matmul %443, %444, %cst_266 {dimension_numbers = #tpu.dot_dimension_numbers<[1], [0], [0], [1], [0, 0, 1, 1], [], []>} : vector<8x8xf32>, vector<8x8xf32>, vector<8x8xf32> -> vector<8x8xf32>
    %c8_267 = arith.constant 8 : index
    %c0_268 = arith.constant 0 : index
    %446 = vector.load %arg34[%c8_267, %c0_268] : memref<16x8xf32, #tpu.memory_space<vmem>>, vector<8x8xf32>
    tpu.vector_store %arg34[%c8_267, %c0_268], %445 {strides = array<i32>} : memref<16x8xf32, #tpu.memory_space<vmem>>, vector<8x8xf32>,
    %c0_269 = arith.constant 0 : index
    %c0_270 = arith.constant 0 : index
    %447 = vector.load %arg34[%c0_269, %c0_270] : memref<16x8xf32, #tpu.memory_space<vmem>>, vector<16x8xf32>
    %c1_271 = arith.constant 1 : index
    %c0_272 = arith.constant 0 : index
    %c0_273 = arith.constant 0 : index
    %448 = vector.load %arg23[%c1_271, %c0_272, %c0_273] : memref<4x8x32xf32, #tpu.memory_space<vmem>>, vector<1x8x32xf32>
    %449 = vector.shape_cast %448 : vector<1x8x32xf32> to vector<8x32xf32>
    %cst_274 = arith.constant dense<0.000000e+00> : vector<16x32xf32>
    %450 = tpu.matmul %447, %449, %cst_274 {dimension_numbers = #tpu.dot_dimension_numbers<[1], [0], [0], [1], [0, 0, 1, 1], [], []>} : vector<16x8xf32>, vector<8x32xf32>, vector<16x32xf32> -> vector<16x32xf32>
    %451 = arith.addf %385, %450 : vector<16x32xf32>
    %c2_275 = arith.constant 2 : index
    %c0_276 = arith.constant 0 : index
    %c0_277 = arith.constant 0 : index
    %452 = vector.load %arg17[%c2_275, %c0_276, %c0_277] : memref<4x32x8xf32, #tpu.memory_space<vmem>>, vector<1x32x8xf32>
    %453 = vector.shape_cast %452 : vector<1x32x8xf32> to vector<32x8xf32>
    %cst_278 = arith.constant dense<0.000000e+00> : vector<16x8xf32>
    %454 = tpu.matmul %318, %453, %cst_278 {dimension_numbers = #tpu.dot_dimension_numbers<[1], [0], [0], [1], [0, 0, 1, 1], [], []>} : vector<16x32xf32>, vector<32x8xf32>, vector<16x8xf32> -> vector<16x8xf32>
    %c2_279 = arith.constant 2 : index
    %c0_280 = arith.constant 0 : index
    %c0_281 = arith.constant 0 : index
    %455 = vector.load %arg18[%c2_279, %c0_280, %c0_281] : memref<4x1x8xf32, #tpu.memory_space<vmem>>, vector<1x1x8xf32>
    %456 = vector.shape_cast %455 : vector<1x1x8xf32> to vector<1x8xf32>
    %457 = vector.broadcast %456 : vector<1x8xf32> to vector<16x8xf32>
    %458 = arith.addf %454, %457 : vector<16x8xf32>
    %cst_282 = arith.constant 0.353553385 : f32
    %459 = vector.broadcast %cst_282 : f32 to vector<16x8xf32>
    %460 = arith.mulf %458, %459 : vector<16x8xf32>
    %c2_283 = arith.constant 2 : index
    %c0_284 = arith.constant 0 : index
    %c0_285 = arith.constant 0 : index
    %461 = vector.load %arg19[%c2_283, %c0_284, %c0_285] : memref<4x32x8xf32, #tpu.memory_space<vmem>>, vector<1x32x8xf32>
    %462 = vector.shape_cast %461 : vector<1x32x8xf32> to vector<32x8xf32>
    %cst_286 = arith.constant dense<0.000000e+00> : vector<16x8xf32>
    %463 = tpu.matmul %318, %462, %cst_286 {dimension_numbers = #tpu.dot_dimension_numbers<[1], [0], [0], [1], [0, 0, 1, 1], [], []>} : vector<16x32xf32>, vector<32x8xf32>, vector<16x8xf32> -> vector<16x8xf32>
    %c2_287 = arith.constant 2 : index
    %c0_288 = arith.constant 0 : index
    %c0_289 = arith.constant 0 : index
    %464 = vector.load %arg20[%c2_287, %c0_288, %c0_289] : memref<4x1x8xf32, #tpu.memory_space<vmem>>, vector<1x1x8xf32>
    %465 = vector.shape_cast %464 : vector<1x1x8xf32> to vector<1x8xf32>
    %466 = vector.broadcast %465 : vector<1x8xf32> to vector<16x8xf32>
    %467 = arith.addf %463, %466 : vector<16x8xf32>
    %c2_290 = arith.constant 2 : index
    %c0_291 = arith.constant 0 : index
    %c0_292 = arith.constant 0 : index
    %468 = vector.load %arg21[%c2_290, %c0_291, %c0_292] : memref<4x32x8xf32, #tpu.memory_space<vmem>>, vector<1x32x8xf32>
    %469 = vector.shape_cast %468 : vector<1x32x8xf32> to vector<32x8xf32>
    %cst_293 = arith.constant dense<0.000000e+00> : vector<16x8xf32>
    %470 = tpu.matmul %318, %469, %cst_293 {dimension_numbers = #tpu.dot_dimension_numbers<[1], [0], [0], [1], [0, 0, 1, 1], [], []>} : vector<16x32xf32>, vector<32x8xf32>, vector<16x8xf32> -> vector<16x8xf32>
    %c2_294 = arith.constant 2 : index
    %c0_295 = arith.constant 0 : index
    %c0_296 = arith.constant 0 : index
    %471 = vector.load %arg22[%c2_294, %c0_295, %c0_296] : memref<4x1x8xf32, #tpu.memory_space<vmem>>, vector<1x1x8xf32>
    %472 = vector.shape_cast %471 : vector<1x1x8xf32> to vector<1x8xf32>
    %473 = vector.broadcast %472 : vector<1x8xf32> to vector<16x8xf32>
    %474 = arith.addf %470, %473 : vector<16x8xf32>
    %475 = vector.extract_strided_slice %460 {offsets = [0, 0], sizes = [8, 8], strides = [1, 1]} : vector<16x8xf32> to vector<8x8xf32>
    %476 = vector.extract_strided_slice %467 {offsets = [0, 0], sizes = [8, 8], strides = [1, 1]} : vector<16x8xf32> to vector<8x8xf32>
    %477 = tpu.transpose %476, [1, 0] : vector<8x8xf32> -> vector<8x8xf32>
    %cst_297 = arith.constant dense<0.000000e+00> : vector<8x8xf32>
    %478 = tpu.matmul %475, %477, %cst_297 {dimension_numbers = #tpu.dot_dimension_numbers<[1], [0], [0], [1], [0, 0, 1, 1], [], []>} : vector<8x8xf32>, vector<8x8xf32>, vector<8x8xf32> -> vector<8x8xf32>
    %cst_298 = arith.constant -1.000000e+09 : f32
    %479 = vector.broadcast %cst_298 : f32 to vector<8x8xf32>
    %480 = arith.select %2, %479, %478 : vector<8x8xi1>, vector<8x8xf32>
    %cst_299 = arith.constant dense<0xFF800000> : vector<8xf32>
    %481 = vector.multi_reduction <maximumf>, %480, %cst_299 [1] : vector<8x8xf32> to vector<8xf32>
    %482 = vector.shape_cast %481 : vector<8xf32> to vector<8x1xf32>
    %483 = vector.broadcast %482 : vector<8x1xf32> to vector<8x8xf32>
    %484 = arith.subf %480, %483 : vector<8x8xf32>
    %485 = math.exp %484 : vector<8x8xf32>
    %cst_300 = arith.constant dense<0.000000e+00> : vector<8xf32>
    %486 = vector.multi_reduction <add>, %485, %cst_300 [1] : vector<8x8xf32> to vector<8xf32>
    %487 = vector.shape_cast %486 : vector<8xf32> to vector<8x1xf32>
    %488 = tpu.reciprocal %487 {approx = true} : vector<8x1xf32> -> vector<8x1xf32>
    %489 = vector.broadcast %488 : vector<8x1xf32> to vector<8x8xf32>
    %490 = arith.mulf %485, %489 : vector<8x8xf32>
    %491 = vector.extract_strided_slice %474 {offsets = [0, 0], sizes = [8, 8], strides = [1, 1]} : vector<16x8xf32> to vector<8x8xf32>
    %cst_301 = arith.constant dense<0.000000e+00> : vector<8x8xf32>
    %492 = tpu.matmul %490, %491, %cst_301 {dimension_numbers = #tpu.dot_dimension_numbers<[1], [0], [0], [1], [0, 0, 1, 1], [], []>} : vector<8x8xf32>, vector<8x8xf32>, vector<8x8xf32> -> vector<8x8xf32>
    %c0_302 = arith.constant 0 : index
    %c0_303 = arith.constant 0 : index
    %493 = vector.load %arg34[%c0_302, %c0_303] : memref<16x8xf32, #tpu.memory_space<vmem>>, vector<8x8xf32>
    tpu.vector_store %arg34[%c0_302, %c0_303], %492 {strides = array<i32>} : memref<16x8xf32, #tpu.memory_space<vmem>>, vector<8x8xf32>,
    %494 = vector.extract_strided_slice %460 {offsets = [8, 0], sizes = [8, 8], strides = [1, 1]} : vector<16x8xf32> to vector<8x8xf32>
    %495 = vector.extract_strided_slice %467 {offsets = [8, 0], sizes = [8, 8], strides = [1, 1]} : vector<16x8xf32> to vector<8x8xf32>
    %496 = tpu.transpose %495, [1, 0] : vector<8x8xf32> -> vector<8x8xf32>
    %cst_304 = arith.constant dense<0.000000e+00> : vector<8x8xf32>
    %497 = tpu.matmul %494, %496, %cst_304 {dimension_numbers = #tpu.dot_dimension_numbers<[1], [0], [0], [1], [0, 0, 1, 1], [], []>} : vector<8x8xf32>, vector<8x8xf32>, vector<8x8xf32> -> vector<8x8xf32>
    %cst_305 = arith.constant -1.000000e+09 : f32
    %498 = vector.broadcast %cst_305 : f32 to vector<8x8xf32>
    %499 = arith.select %2, %498, %497 : vector<8x8xi1>, vector<8x8xf32>
    %cst_306 = arith.constant dense<0xFF800000> : vector<8xf32>
    %500 = vector.multi_reduction <maximumf>, %499, %cst_306 [1] : vector<8x8xf32> to vector<8xf32>
    %501 = vector.shape_cast %500 : vector<8xf32> to vector<8x1xf32>
    %502 = vector.broadcast %501 : vector<8x1xf32> to vector<8x8xf32>
    %503 = arith.subf %499, %502 : vector<8x8xf32>
    %504 = math.exp %503 : vector<8x8xf32>
    %cst_307 = arith.constant dense<0.000000e+00> : vector<8xf32>
    %505 = vector.multi_reduction <add>, %504, %cst_307 [1] : vector<8x8xf32> to vector<8xf32>
    %506 = vector.shape_cast %505 : vector<8xf32> to vector<8x1xf32>
    %507 = tpu.reciprocal %506 {approx = true} : vector<8x1xf32> -> vector<8x1xf32>
    %508 = vector.broadcast %507 : vector<8x1xf32> to vector<8x8xf32>
    %509 = arith.mulf %504, %508 : vector<8x8xf32>
    %510 = vector.extract_strided_slice %474 {offsets = [8, 0], sizes = [8, 8], strides = [1, 1]} : vector<16x8xf32> to vector<8x8xf32>
    %cst_308 = arith.constant dense<0.000000e+00> : vector<8x8xf32>
    %511 = tpu.matmul %509, %510, %cst_308 {dimension_numbers = #tpu.dot_dimension_numbers<[1], [0], [0], [1], [0, 0, 1, 1], [], []>} : vector<8x8xf32>, vector<8x8xf32>, vector<8x8xf32> -> vector<8x8xf32>
    %c8_309 = arith.constant 8 : index
    %c0_310 = arith.constant 0 : index
    %512 = vector.load %arg34[%c8_309, %c0_310] : memref<16x8xf32, #tpu.memory_space<vmem>>, vector<8x8xf32>
    tpu.vector_store %arg34[%c8_309, %c0_310], %511 {strides = array<i32>} : memref<16x8xf32, #tpu.memory_space<vmem>>, vector<8x8xf32>,
    %c0_311 = arith.constant 0 : index
    %c0_312 = arith.constant 0 : index
    %513 = vector.load %arg34[%c0_311, %c0_312] : memref<16x8xf32, #tpu.memory_space<vmem>>, vector<16x8xf32>
    %c2_313 = arith.constant 2 : index
    %c0_314 = arith.constant 0 : index
    %c0_315 = arith.constant 0 : index
    %514 = vector.load %arg23[%c2_313, %c0_314, %c0_315] : memref<4x8x32xf32, #tpu.memory_space<vmem>>, vector<1x8x32xf32>
    %515 = vector.shape_cast %514 : vector<1x8x32xf32> to vector<8x32xf32>
    %cst_316 = arith.constant dense<0.000000e+00> : vector<16x32xf32>
    %516 = tpu.matmul %513, %515, %cst_316 {dimension_numbers = #tpu.dot_dimension_numbers<[1], [0], [0], [1], [0, 0, 1, 1], [], []>} : vector<16x8xf32>, vector<8x32xf32>, vector<16x32xf32> -> vector<16x32xf32>
    %517 = arith.addf %451, %516 : vector<16x32xf32>
    %c3_317 = arith.constant 3 : index
    %c0_318 = arith.constant 0 : index
    %c0_319 = arith.constant 0 : index
    %518 = vector.load %arg17[%c3_317, %c0_318, %c0_319] : memref<4x32x8xf32, #tpu.memory_space<vmem>>, vector<1x32x8xf32>
    %519 = vector.shape_cast %518 : vector<1x32x8xf32> to vector<32x8xf32>
    %cst_320 = arith.constant dense<0.000000e+00> : vector<16x8xf32>
    %520 = tpu.matmul %318, %519, %cst_320 {dimension_numbers = #tpu.dot_dimension_numbers<[1], [0], [0], [1], [0, 0, 1, 1], [], []>} : vector<16x32xf32>, vector<32x8xf32>, vector<16x8xf32> -> vector<16x8xf32>
    %c3_321 = arith.constant 3 : index
    %c0_322 = arith.constant 0 : index
    %c0_323 = arith.constant 0 : index
    %521 = vector.load %arg18[%c3_321, %c0_322, %c0_323] : memref<4x1x8xf32, #tpu.memory_space<vmem>>, vector<1x1x8xf32>
    %522 = vector.shape_cast %521 : vector<1x1x8xf32> to vector<1x8xf32>
    %523 = vector.broadcast %522 : vector<1x8xf32> to vector<16x8xf32>
    %524 = arith.addf %520, %523 : vector<16x8xf32>
    %cst_324 = arith.constant 0.353553385 : f32
    %525 = vector.broadcast %cst_324 : f32 to vector<16x8xf32>
    %526 = arith.mulf %524, %525 : vector<16x8xf32>
    %c3_325 = arith.constant 3 : index
    %c0_326 = arith.constant 0 : index
    %c0_327 = arith.constant 0 : index
    %527 = vector.load %arg19[%c3_325, %c0_326, %c0_327] : memref<4x32x8xf32, #tpu.memory_space<vmem>>, vector<1x32x8xf32>
    %528 = vector.shape_cast %527 : vector<1x32x8xf32> to vector<32x8xf32>
    %cst_328 = arith.constant dense<0.000000e+00> : vector<16x8xf32>
    %529 = tpu.matmul %318, %528, %cst_328 {dimension_numbers = #tpu.dot_dimension_numbers<[1], [0], [0], [1], [0, 0, 1, 1], [], []>} : vector<16x32xf32>, vector<32x8xf32>, vector<16x8xf32> -> vector<16x8xf32>
    %c3_329 = arith.constant 3 : index
    %c0_330 = arith.constant 0 : index
    %c0_331 = arith.constant 0 : index
    %530 = vector.load %arg20[%c3_329, %c0_330, %c0_331] : memref<4x1x8xf32, #tpu.memory_space<vmem>>, vector<1x1x8xf32>
    %531 = vector.shape_cast %530 : vector<1x1x8xf32> to vector<1x8xf32>
    %532 = vector.broadcast %531 : vector<1x8xf32> to vector<16x8xf32>
    %533 = arith.addf %529, %532 : vector<16x8xf32>
    %c3_332 = arith.constant 3 : index
    %c0_333 = arith.constant 0 : index
    %c0_334 = arith.constant 0 : index
    %534 = vector.load %arg21[%c3_332, %c0_333, %c0_334] : memref<4x32x8xf32, #tpu.memory_space<vmem>>, vector<1x32x8xf32>
    %535 = vector.shape_cast %534 : vector<1x32x8xf32> to vector<32x8xf32>
    %cst_335 = arith.constant dense<0.000000e+00> : vector<16x8xf32>
    %536 = tpu.matmul %318, %535, %cst_335 {dimension_numbers = #tpu.dot_dimension_numbers<[1], [0], [0], [1], [0, 0, 1, 1], [], []>} : vector<16x32xf32>, vector<32x8xf32>, vector<16x8xf32> -> vector<16x8xf32>
    %c3_336 = arith.constant 3 : index
    %c0_337 = arith.constant 0 : index
    %c0_338 = arith.constant 0 : index
    %537 = vector.load %arg22[%c3_336, %c0_337, %c0_338] : memref<4x1x8xf32, #tpu.memory_space<vmem>>, vector<1x1x8xf32>
    %538 = vector.shape_cast %537 : vector<1x1x8xf32> to vector<1x8xf32>
    %539 = vector.broadcast %538 : vector<1x8xf32> to vector<16x8xf32>
    %540 = arith.addf %536, %539 : vector<16x8xf32>
    %541 = vector.extract_strided_slice %526 {offsets = [0, 0], sizes = [8, 8], strides = [1, 1]} : vector<16x8xf32> to vector<8x8xf32>
    %542 = vector.extract_strided_slice %533 {offsets = [0, 0], sizes = [8, 8], strides = [1, 1]} : vector<16x8xf32> to vector<8x8xf32>
    %543 = tpu.transpose %542, [1, 0] : vector<8x8xf32> -> vector<8x8xf32>
    %cst_339 = arith.constant dense<0.000000e+00> : vector<8x8xf32>
    %544 = tpu.matmul %541, %543, %cst_339 {dimension_numbers = #tpu.dot_dimension_numbers<[1], [0], [0], [1], [0, 0, 1, 1], [], []>} : vector<8x8xf32>, vector<8x8xf32>, vector<8x8xf32> -> vector<8x8xf32>
    %cst_340 = arith.constant -1.000000e+09 : f32
    %545 = vector.broadcast %cst_340 : f32 to vector<8x8xf32>
    %546 = arith.select %2, %545, %544 : vector<8x8xi1>, vector<8x8xf32>
    %cst_341 = arith.constant dense<0xFF800000> : vector<8xf32>
    %547 = vector.multi_reduction <maximumf>, %546, %cst_341 [1] : vector<8x8xf32> to vector<8xf32>
    %548 = vector.shape_cast %547 : vector<8xf32> to vector<8x1xf32>
    %549 = vector.broadcast %548 : vector<8x1xf32> to vector<8x8xf32>
    %550 = arith.subf %546, %549 : vector<8x8xf32>
    %551 = math.exp %550 : vector<8x8xf32>
    %cst_342 = arith.constant dense<0.000000e+00> : vector<8xf32>
    %552 = vector.multi_reduction <add>, %551, %cst_342 [1] : vector<8x8xf32> to vector<8xf32>
    %553 = vector.shape_cast %552 : vector<8xf32> to vector<8x1xf32>
    %554 = tpu.reciprocal %553 {approx = true} : vector<8x1xf32> -> vector<8x1xf32>
    %555 = vector.broadcast %554 : vector<8x1xf32> to vector<8x8xf32>
    %556 = arith.mulf %551, %555 : vector<8x8xf32>
    %557 = vector.extract_strided_slice %540 {offsets = [0, 0], sizes = [8, 8], strides = [1, 1]} : vector<16x8xf32> to vector<8x8xf32>
    %cst_343 = arith.constant dense<0.000000e+00> : vector<8x8xf32>
    %558 = tpu.matmul %556, %557, %cst_343 {dimension_numbers = #tpu.dot_dimension_numbers<[1], [0], [0], [1], [0, 0, 1, 1], [], []>} : vector<8x8xf32>, vector<8x8xf32>, vector<8x8xf32> -> vector<8x8xf32>
    %c0_344 = arith.constant 0 : index
    %c0_345 = arith.constant 0 : index
    %559 = vector.load %arg34[%c0_344, %c0_345] : memref<16x8xf32, #tpu.memory_space<vmem>>, vector<8x8xf32>
    tpu.vector_store %arg34[%c0_344, %c0_345], %558 {strides = array<i32>} : memref<16x8xf32, #tpu.memory_space<vmem>>, vector<8x8xf32>,
    %560 = vector.extract_strided_slice %526 {offsets = [8, 0], sizes = [8, 8], strides = [1, 1]} : vector<16x8xf32> to vector<8x8xf32>
    %561 = vector.extract_strided_slice %533 {offsets = [8, 0], sizes = [8, 8], strides = [1, 1]} : vector<16x8xf32> to vector<8x8xf32>
    %562 = tpu.transpose %561, [1, 0] : vector<8x8xf32> -> vector<8x8xf32>
    %cst_346 = arith.constant dense<0.000000e+00> : vector<8x8xf32>
    %563 = tpu.matmul %560, %562, %cst_346 {dimension_numbers = #tpu.dot_dimension_numbers<[1], [0], [0], [1], [0, 0, 1, 1], [], []>} : vector<8x8xf32>, vector<8x8xf32>, vector<8x8xf32> -> vector<8x8xf32>
    %cst_347 = arith.constant -1.000000e+09 : f32
    %564 = vector.broadcast %cst_347 : f32 to vector<8x8xf32>
    %565 = arith.select %2, %564, %563 : vector<8x8xi1>, vector<8x8xf32>
    %cst_348 = arith.constant dense<0xFF800000> : vector<8xf32>
    %566 = vector.multi_reduction <maximumf>, %565, %cst_348 [1] : vector<8x8xf32> to vector<8xf32>
    %567 = vector.shape_cast %566 : vector<8xf32> to vector<8x1xf32>
    %568 = vector.broadcast %567 : vector<8x1xf32> to vector<8x8xf32>
    %569 = arith.subf %565, %568 : vector<8x8xf32>
    %570 = math.exp %569 : vector<8x8xf32>
    %cst_349 = arith.constant dense<0.000000e+00> : vector<8xf32>
    %571 = vector.multi_reduction <add>, %570, %cst_349 [1] : vector<8x8xf32> to vector<8xf32>
    %572 = vector.shape_cast %571 : vector<8xf32> to vector<8x1xf32>
    %573 = tpu.reciprocal %572 {approx = true} : vector<8x1xf32> -> vector<8x1xf32>
    %574 = vector.broadcast %573 : vector<8x1xf32> to vector<8x8xf32>
    %575 = arith.mulf %570, %574 : vector<8x8xf32>
    %576 = vector.extract_strided_slice %540 {offsets = [8, 0], sizes = [8, 8], strides = [1, 1]} : vector<16x8xf32> to vector<8x8xf32>
    %cst_350 = arith.constant dense<0.000000e+00> : vector<8x8xf32>
    %577 = tpu.matmul %575, %576, %cst_350 {dimension_numbers = #tpu.dot_dimension_numbers<[1], [0], [0], [1], [0, 0, 1, 1], [], []>} : vector<8x8xf32>, vector<8x8xf32>, vector<8x8xf32> -> vector<8x8xf32>
    %c8_351 = arith.constant 8 : index
    %c0_352 = arith.constant 0 : index
    %578 = vector.load %arg34[%c8_351, %c0_352] : memref<16x8xf32, #tpu.memory_space<vmem>>, vector<8x8xf32>
    tpu.vector_store %arg34[%c8_351, %c0_352], %577 {strides = array<i32>} : memref<16x8xf32, #tpu.memory_space<vmem>>, vector<8x8xf32>,
    %c0_353 = arith.constant 0 : index
    %c0_354 = arith.constant 0 : index
    %579 = vector.load %arg34[%c0_353, %c0_354] : memref<16x8xf32, #tpu.memory_space<vmem>>, vector<16x8xf32>
    %c3_355 = arith.constant 3 : index
    %c0_356 = arith.constant 0 : index
    %c0_357 = arith.constant 0 : index
    %580 = vector.load %arg23[%c3_355, %c0_356, %c0_357] : memref<4x8x32xf32, #tpu.memory_space<vmem>>, vector<1x8x32xf32>
    %581 = vector.shape_cast %580 : vector<1x8x32xf32> to vector<8x32xf32>
    %cst_358 = arith.constant dense<0.000000e+00> : vector<16x32xf32>
    %582 = tpu.matmul %579, %581, %cst_358 {dimension_numbers = #tpu.dot_dimension_numbers<[1], [0], [0], [1], [0, 0, 1, 1], [], []>} : vector<16x8xf32>, vector<8x32xf32>, vector<16x32xf32> -> vector<16x32xf32>
    %583 = arith.addf %517, %582 : vector<16x32xf32>
    %c0_359 = arith.constant 0 : index
    %c0_360 = arith.constant 0 : index
    %584 = vector.load %arg24[%c0_359, %c0_360] : memref<1x32xf32, #tpu.memory_space<vmem>>, vector<1x32xf32>
    %585 = vector.broadcast %584 : vector<1x32xf32> to vector<16x32xf32>
    %586 = arith.addf %583, %585 : vector<16x32xf32>
    %587 = arith.addf %586, %318 : vector<16x32xf32>
    %cst_361 = arith.constant dense<0.000000e+00> : vector<16xf32>
    %588 = vector.multi_reduction <add>, %587, %cst_361 [1] : vector<16x32xf32> to vector<16xf32>
    %589 = vector.shape_cast %588 : vector<16xf32> to vector<16x1xf32>
    %cst_362 = arith.constant 3.200000e+01 : f32
    %590 = vector.broadcast %cst_362 : f32 to vector<16x1xf32>
    %591 = arith.divf %589, %590 : vector<16x1xf32>
    %592 = vector.broadcast %591 : vector<16x1xf32> to vector<16x32xf32>
    %593 = arith.subf %587, %592 : vector<16x32xf32>
    %594 = arith.mulf %593, %593 : vector<16x32xf32>
    %cst_363 = arith.constant dense<0.000000e+00> : vector<16xf32>
    %595 = vector.multi_reduction <add>, %594, %cst_363 [1] : vector<16x32xf32> to vector<16xf32>
    %596 = vector.shape_cast %595 : vector<16xf32> to vector<16x1xf32>
    %cst_364 = arith.constant 3.200000e+01 : f32
    %597 = vector.broadcast %cst_364 : f32 to vector<16x1xf32>
    %598 = arith.divf %596, %597 : vector<16x1xf32>
    %599 = vector.broadcast %591 : vector<16x1xf32> to vector<16x32xf32>
    %600 = arith.subf %587, %599 : vector<16x32xf32>
    %cst_365 = arith.constant 9.99999974E-6 : f32
    %601 = vector.broadcast %cst_365 : f32 to vector<16x1xf32>
    %602 = arith.addf %598, %601 : vector<16x1xf32>
    %603 = math.rsqrt %602 : vector<16x1xf32>
    %604 = vector.broadcast %603 : vector<16x1xf32> to vector<16x32xf32>
    %605 = arith.mulf %600, %604 : vector<16x32xf32>
    %c0_366 = arith.constant 0 : index
    %c0_367 = arith.constant 0 : index
    %606 = vector.load %arg29[%c0_366, %c0_367] : memref<1x32xf32, #tpu.memory_space<vmem>>, vector<1x32xf32>
    %607 = vector.broadcast %606 : vector<1x32xf32> to vector<16x32xf32>
    %608 = arith.mulf %605, %607 : vector<16x32xf32>
    %c0_368 = arith.constant 0 : index
    %c0_369 = arith.constant 0 : index
    %609 = vector.load %arg30[%c0_368, %c0_369] : memref<1x32xf32, #tpu.memory_space<vmem>>, vector<1x32xf32>
    %610 = vector.broadcast %609 : vector<1x32xf32> to vector<16x32xf32>
    %611 = arith.addf %608, %610 : vector<16x32xf32>
    %cst_370 = arith.constant 0.000000e+00 : f32
    %612 = vector.broadcast %cst_370 : f32 to vector<16x32xf32>
    %c0_371 = arith.constant 0 : index
    %c0_372 = arith.constant 0 : index
    %c0_373 = arith.constant 0 : index
    %613 = vector.load %arg17[%c0_371, %c0_372, %c0_373] : memref<4x32x8xf32, #tpu.memory_space<vmem>>, vector<1x32x8xf32>
    %614 = vector.shape_cast %613 : vector<1x32x8xf32> to vector<32x8xf32>
    %cst_374 = arith.constant dense<0.000000e+00> : vector<16x8xf32>
    %615 = tpu.matmul %611, %614, %cst_374 {dimension_numbers = #tpu.dot_dimension_numbers<[1], [0], [0], [1], [0, 0, 1, 1], [], []>} : vector<16x32xf32>, vector<32x8xf32>, vector<16x8xf32> -> vector<16x8xf32>
    %c0_375 = arith.constant 0 : index
    %c0_376 = arith.constant 0 : index
    %c0_377 = arith.constant 0 : index
    %616 = vector.load %arg18[%c0_375, %c0_376, %c0_377] : memref<4x1x8xf32, #tpu.memory_space<vmem>>, vector<1x1x8xf32>
    %617 = vector.shape_cast %616 : vector<1x1x8xf32> to vector<1x8xf32>
    %618 = vector.broadcast %617 : vector<1x8xf32> to vector<16x8xf32>
    %619 = arith.addf %615, %618 : vector<16x8xf32>
    %cst_378 = arith.constant 0.353553385 : f32
    %620 = vector.broadcast %cst_378 : f32 to vector<16x8xf32>
    %621 = arith.mulf %619, %620 : vector<16x8xf32>
    %c0_379 = arith.constant 0 : index
    %c0_380 = arith.constant 0 : index
    %c0_381 = arith.constant 0 : index
    %622 = vector.load %arg19[%c0_379, %c0_380, %c0_381] : memref<4x32x8xf32, #tpu.memory_space<vmem>>, vector<1x32x8xf32>
    %623 = vector.shape_cast %622 : vector<1x32x8xf32> to vector<32x8xf32>
    %cst_382 = arith.constant dense<0.000000e+00> : vector<16x8xf32>
    %624 = tpu.matmul %317, %623, %cst_382 {dimension_numbers = #tpu.dot_dimension_numbers<[1], [0], [0], [1], [0, 0, 1, 1], [], []>} : vector<16x32xf32>, vector<32x8xf32>, vector<16x8xf32> -> vector<16x8xf32>
    %c0_383 = arith.constant 0 : index
    %c0_384 = arith.constant 0 : index
    %c0_385 = arith.constant 0 : index
    %625 = vector.load %arg20[%c0_383, %c0_384, %c0_385] : memref<4x1x8xf32, #tpu.memory_space<vmem>>, vector<1x1x8xf32>
    %626 = vector.shape_cast %625 : vector<1x1x8xf32> to vector<1x8xf32>
    %627 = vector.broadcast %626 : vector<1x8xf32> to vector<16x8xf32>
    %628 = arith.addf %624, %627 : vector<16x8xf32>
    %c0_386 = arith.constant 0 : index
    %c0_387 = arith.constant 0 : index
    %c0_388 = arith.constant 0 : index
    %629 = vector.load %arg21[%c0_386, %c0_387, %c0_388] : memref<4x32x8xf32, #tpu.memory_space<vmem>>, vector<1x32x8xf32>
    %630 = vector.shape_cast %629 : vector<1x32x8xf32> to vector<32x8xf32>
    %cst_389 = arith.constant dense<0.000000e+00> : vector<16x8xf32>
    %631 = tpu.matmul %317, %630, %cst_389 {dimension_numbers = #tpu.dot_dimension_numbers<[1], [0], [0], [1], [0, 0, 1, 1], [], []>} : vector<16x32xf32>, vector<32x8xf32>, vector<16x8xf32> -> vector<16x8xf32>
    %c0_390 = arith.constant 0 : index
    %c0_391 = arith.constant 0 : index
    %c0_392 = arith.constant 0 : index
    %632 = vector.load %arg22[%c0_390, %c0_391, %c0_392] : memref<4x1x8xf32, #tpu.memory_space<vmem>>, vector<1x1x8xf32>
    %633 = vector.shape_cast %632 : vector<1x1x8xf32> to vector<1x8xf32>
    %634 = vector.broadcast %633 : vector<1x8xf32> to vector<16x8xf32>
    %635 = arith.addf %631, %634 : vector<16x8xf32>
    %636 = vector.extract_strided_slice %621 {offsets = [0, 0], sizes = [8, 8], strides = [1, 1]} : vector<16x8xf32> to vector<8x8xf32>
    %637 = vector.extract_strided_slice %628 {offsets = [0, 0], sizes = [8, 8], strides = [1, 1]} : vector<16x8xf32> to vector<8x8xf32>
    %638 = tpu.transpose %637, [1, 0] : vector<8x8xf32> -> vector<8x8xf32>
    %cst_393 = arith.constant dense<0.000000e+00> : vector<8x8xf32>
    %639 = tpu.matmul %636, %638, %cst_393 {dimension_numbers = #tpu.dot_dimension_numbers<[1], [0], [0], [1], [0, 0, 1, 1], [], []>} : vector<8x8xf32>, vector<8x8xf32>, vector<8x8xf32> -> vector<8x8xf32>
    %cst_394 = arith.constant dense<0xFF800000> : vector<8xf32>
    %640 = vector.multi_reduction <maximumf>, %639, %cst_394 [1] : vector<8x8xf32> to vector<8xf32>
    %641 = vector.shape_cast %640 : vector<8xf32> to vector<8x1xf32>
    %642 = vector.broadcast %641 : vector<8x1xf32> to vector<8x8xf32>
    %643 = arith.subf %639, %642 : vector<8x8xf32>
    %644 = math.exp %643 : vector<8x8xf32>
    %cst_395 = arith.constant dense<0.000000e+00> : vector<8xf32>
    %645 = vector.multi_reduction <add>, %644, %cst_395 [1] : vector<8x8xf32> to vector<8xf32>
    %646 = vector.shape_cast %645 : vector<8xf32> to vector<8x1xf32>
    %647 = tpu.reciprocal %646 {approx = true} : vector<8x1xf32> -> vector<8x1xf32>
    %648 = vector.broadcast %647 : vector<8x1xf32> to vector<8x8xf32>
    %649 = arith.mulf %644, %648 : vector<8x8xf32>
    %650 = vector.extract_strided_slice %635 {offsets = [0, 0], sizes = [8, 8], strides = [1, 1]} : vector<16x8xf32> to vector<8x8xf32>
    %cst_396 = arith.constant dense<0.000000e+00> : vector<8x8xf32>
    %651 = tpu.matmul %649, %650, %cst_396 {dimension_numbers = #tpu.dot_dimension_numbers<[1], [0], [0], [1], [0, 0, 1, 1], [], []>} : vector<8x8xf32>, vector<8x8xf32>, vector<8x8xf32> -> vector<8x8xf32>
    %c0_397 = arith.constant 0 : index
    %c0_398 = arith.constant 0 : index
    %652 = vector.load %arg34[%c0_397, %c0_398] : memref<16x8xf32, #tpu.memory_space<vmem>>, vector<8x8xf32>
    tpu.vector_store %arg34[%c0_397, %c0_398], %651 {strides = array<i32>} : memref<16x8xf32, #tpu.memory_space<vmem>>, vector<8x8xf32>,
    %653 = vector.extract_strided_slice %621 {offsets = [8, 0], sizes = [8, 8], strides = [1, 1]} : vector<16x8xf32> to vector<8x8xf32>
    %654 = vector.extract_strided_slice %628 {offsets = [8, 0], sizes = [8, 8], strides = [1, 1]} : vector<16x8xf32> to vector<8x8xf32>
    %655 = tpu.transpose %654, [1, 0] : vector<8x8xf32> -> vector<8x8xf32>
    %cst_399 = arith.constant dense<0.000000e+00> : vector<8x8xf32>
    %656 = tpu.matmul %653, %655, %cst_399 {dimension_numbers = #tpu.dot_dimension_numbers<[1], [0], [0], [1], [0, 0, 1, 1], [], []>} : vector<8x8xf32>, vector<8x8xf32>, vector<8x8xf32> -> vector<8x8xf32>
    %cst_400 = arith.constant dense<0xFF800000> : vector<8xf32>
    %657 = vector.multi_reduction <maximumf>, %656, %cst_400 [1] : vector<8x8xf32> to vector<8xf32>
    %658 = vector.shape_cast %657 : vector<8xf32> to vector<8x1xf32>
    %659 = vector.broadcast %658 : vector<8x1xf32> to vector<8x8xf32>
    %660 = arith.subf %656, %659 : vector<8x8xf32>
    %661 = math.exp %660 : vector<8x8xf32>
    %cst_401 = arith.constant dense<0.000000e+00> : vector<8xf32>
    %662 = vector.multi_reduction <add>, %661, %cst_401 [1] : vector<8x8xf32> to vector<8xf32>
    %663 = vector.shape_cast %662 : vector<8xf32> to vector<8x1xf32>
    %664 = tpu.reciprocal %663 {approx = true} : vector<8x1xf32> -> vector<8x1xf32>
    %665 = vector.broadcast %664 : vector<8x1xf32> to vector<8x8xf32>
    %666 = arith.mulf %661, %665 : vector<8x8xf32>
    %667 = vector.extract_strided_slice %635 {offsets = [8, 0], sizes = [8, 8], strides = [1, 1]} : vector<16x8xf32> to vector<8x8xf32>
    %cst_402 = arith.constant dense<0.000000e+00> : vector<8x8xf32>
    %668 = tpu.matmul %666, %667, %cst_402 {dimension_numbers = #tpu.dot_dimension_numbers<[1], [0], [0], [1], [0, 0, 1, 1], [], []>} : vector<8x8xf32>, vector<8x8xf32>, vector<8x8xf32> -> vector<8x8xf32>
    %c8_403 = arith.constant 8 : index
    %c0_404 = arith.constant 0 : index
    %669 = vector.load %arg34[%c8_403, %c0_404] : memref<16x8xf32, #tpu.memory_space<vmem>>, vector<8x8xf32>
    tpu.vector_store %arg34[%c8_403, %c0_404], %668 {strides = array<i32>} : memref<16x8xf32, #tpu.memory_space<vmem>>, vector<8x8xf32>,
    %c0_405 = arith.constant 0 : index
    %c0_406 = arith.constant 0 : index
    %670 = vector.load %arg34[%c0_405, %c0_406] : memref<16x8xf32, #tpu.memory_space<vmem>>, vector<16x8xf32>
    %c0_407 = arith.constant 0 : index
    %c0_408 = arith.constant 0 : index
    %c0_409 = arith.constant 0 : index
    %671 = vector.load %arg23[%c0_407, %c0_408, %c0_409] : memref<4x8x32xf32, #tpu.memory_space<vmem>>, vector<1x8x32xf32>
    %672 = vector.shape_cast %671 : vector<1x8x32xf32> to vector<8x32xf32>
    %cst_410 = arith.constant dense<0.000000e+00> : vector<16x32xf32>
    %673 = tpu.matmul %670, %672, %cst_410 {dimension_numbers = #tpu.dot_dimension_numbers<[1], [0], [0], [1], [0, 0, 1, 1], [], []>} : vector<16x8xf32>, vector<8x32xf32>, vector<16x32xf32> -> vector<16x32xf32>
    %674 = arith.addf %612, %673 : vector<16x32xf32>
    %c1_411 = arith.constant 1 : index
    %c0_412 = arith.constant 0 : index
    %c0_413 = arith.constant 0 : index
    %675 = vector.load %arg17[%c1_411, %c0_412, %c0_413] : memref<4x32x8xf32, #tpu.memory_space<vmem>>, vector<1x32x8xf32>
    %676 = vector.shape_cast %675 : vector<1x32x8xf32> to vector<32x8xf32>
    %cst_414 = arith.constant dense<0.000000e+00> : vector<16x8xf32>
    %677 = tpu.matmul %611, %676, %cst_414 {dimension_numbers = #tpu.dot_dimension_numbers<[1], [0], [0], [1], [0, 0, 1, 1], [], []>} : vector<16x32xf32>, vector<32x8xf32>, vector<16x8xf32> -> vector<16x8xf32>
    %c1_415 = arith.constant 1 : index
    %c0_416 = arith.constant 0 : index
    %c0_417 = arith.constant 0 : index
    %678 = vector.load %arg18[%c1_415, %c0_416, %c0_417] : memref<4x1x8xf32, #tpu.memory_space<vmem>>, vector<1x1x8xf32>
    %679 = vector.shape_cast %678 : vector<1x1x8xf32> to vector<1x8xf32>
    %680 = vector.broadcast %679 : vector<1x8xf32> to vector<16x8xf32>
    %681 = arith.addf %677, %680 : vector<16x8xf32>
    %cst_418 = arith.constant 0.353553385 : f32
    %682 = vector.broadcast %cst_418 : f32 to vector<16x8xf32>
    %683 = arith.mulf %681, %682 : vector<16x8xf32>
    %c1_419 = arith.constant 1 : index
    %c0_420 = arith.constant 0 : index
    %c0_421 = arith.constant 0 : index
    %684 = vector.load %arg19[%c1_419, %c0_420, %c0_421] : memref<4x32x8xf32, #tpu.memory_space<vmem>>, vector<1x32x8xf32>
    %685 = vector.shape_cast %684 : vector<1x32x8xf32> to vector<32x8xf32>
    %cst_422 = arith.constant dense<0.000000e+00> : vector<16x8xf32>
    %686 = tpu.matmul %317, %685, %cst_422 {dimension_numbers = #tpu.dot_dimension_numbers<[1], [0], [0], [1], [0, 0, 1, 1], [], []>} : vector<16x32xf32>, vector<32x8xf32>, vector<16x8xf32> -> vector<16x8xf32>
    %c1_423 = arith.constant 1 : index
    %c0_424 = arith.constant 0 : index
    %c0_425 = arith.constant 0 : index
    %687 = vector.load %arg20[%c1_423, %c0_424, %c0_425] : memref<4x1x8xf32, #tpu.memory_space<vmem>>, vector<1x1x8xf32>
    %688 = vector.shape_cast %687 : vector<1x1x8xf32> to vector<1x8xf32>
    %689 = vector.broadcast %688 : vector<1x8xf32> to vector<16x8xf32>
    %690 = arith.addf %686, %689 : vector<16x8xf32>
    %c1_426 = arith.constant 1 : index
    %c0_427 = arith.constant 0 : index
    %c0_428 = arith.constant 0 : index
    %691 = vector.load %arg21[%c1_426, %c0_427, %c0_428] : memref<4x32x8xf32, #tpu.memory_space<vmem>>, vector<1x32x8xf32>
    %692 = vector.shape_cast %691 : vector<1x32x8xf32> to vector<32x8xf32>
    %cst_429 = arith.constant dense<0.000000e+00> : vector<16x8xf32>
    %693 = tpu.matmul %317, %692, %cst_429 {dimension_numbers = #tpu.dot_dimension_numbers<[1], [0], [0], [1], [0, 0, 1, 1], [], []>} : vector<16x32xf32>, vector<32x8xf32>, vector<16x8xf32> -> vector<16x8xf32>
    %c1_430 = arith.constant 1 : index
    %c0_431 = arith.constant 0 : index
    %c0_432 = arith.constant 0 : index
    %694 = vector.load %arg22[%c1_430, %c0_431, %c0_432] : memref<4x1x8xf32, #tpu.memory_space<vmem>>, vector<1x1x8xf32>
    %695 = vector.shape_cast %694 : vector<1x1x8xf32> to vector<1x8xf32>
    %696 = vector.broadcast %695 : vector<1x8xf32> to vector<16x8xf32>
    %697 = arith.addf %693, %696 : vector<16x8xf32>
    %698 = vector.extract_strided_slice %683 {offsets = [0, 0], sizes = [8, 8], strides = [1, 1]} : vector<16x8xf32> to vector<8x8xf32>
    %699 = vector.extract_strided_slice %690 {offsets = [0, 0], sizes = [8, 8], strides = [1, 1]} : vector<16x8xf32> to vector<8x8xf32>
    %700 = tpu.transpose %699, [1, 0] : vector<8x8xf32> -> vector<8x8xf32>
    %cst_433 = arith.constant dense<0.000000e+00> : vector<8x8xf32>
    %701 = tpu.matmul %698, %700, %cst_433 {dimension_numbers = #tpu.dot_dimension_numbers<[1], [0], [0], [1], [0, 0, 1, 1], [], []>} : vector<8x8xf32>, vector<8x8xf32>, vector<8x8xf32> -> vector<8x8xf32>
    %cst_434 = arith.constant dense<0xFF800000> : vector<8xf32>
    %702 = vector.multi_reduction <maximumf>, %701, %cst_434 [1] : vector<8x8xf32> to vector<8xf32>
    %703 = vector.shape_cast %702 : vector<8xf32> to vector<8x1xf32>
    %704 = vector.broadcast %703 : vector<8x1xf32> to vector<8x8xf32>
    %705 = arith.subf %701, %704 : vector<8x8xf32>
    %706 = math.exp %705 : vector<8x8xf32>
    %cst_435 = arith.constant dense<0.000000e+00> : vector<8xf32>
    %707 = vector.multi_reduction <add>, %706, %cst_435 [1] : vector<8x8xf32> to vector<8xf32>
    %708 = vector.shape_cast %707 : vector<8xf32> to vector<8x1xf32>
    %709 = tpu.reciprocal %708 {approx = true} : vector<8x1xf32> -> vector<8x1xf32>
    %710 = vector.broadcast %709 : vector<8x1xf32> to vector<8x8xf32>
    %711 = arith.mulf %706, %710 : vector<8x8xf32>
    %712 = vector.extract_strided_slice %697 {offsets = [0, 0], sizes = [8, 8], strides = [1, 1]} : vector<16x8xf32> to vector<8x8xf32>
    %cst_436 = arith.constant dense<0.000000e+00> : vector<8x8xf32>
    %713 = tpu.matmul %711, %712, %cst_436 {dimension_numbers = #tpu.dot_dimension_numbers<[1], [0], [0], [1], [0, 0, 1, 1], [], []>} : vector<8x8xf32>, vector<8x8xf32>, vector<8x8xf32> -> vector<8x8xf32>
    %c0_437 = arith.constant 0 : index
    %c0_438 = arith.constant 0 : index
    %714 = vector.load %arg34[%c0_437, %c0_438] : memref<16x8xf32, #tpu.memory_space<vmem>>, vector<8x8xf32>
    tpu.vector_store %arg34[%c0_437, %c0_438], %713 {strides = array<i32>} : memref<16x8xf32, #tpu.memory_space<vmem>>, vector<8x8xf32>,
    %715 = vector.extract_strided_slice %683 {offsets = [8, 0], sizes = [8, 8], strides = [1, 1]} : vector<16x8xf32> to vector<8x8xf32>
    %716 = vector.extract_strided_slice %690 {offsets = [8, 0], sizes = [8, 8], strides = [1, 1]} : vector<16x8xf32> to vector<8x8xf32>
    %717 = tpu.transpose %716, [1, 0] : vector<8x8xf32> -> vector<8x8xf32>
    %cst_439 = arith.constant dense<0.000000e+00> : vector<8x8xf32>
    %718 = tpu.matmul %715, %717, %cst_439 {dimension_numbers = #tpu.dot_dimension_numbers<[1], [0], [0], [1], [0, 0, 1, 1], [], []>} : vector<8x8xf32>, vector<8x8xf32>, vector<8x8xf32> -> vector<8x8xf32>
    %cst_440 = arith.constant dense<0xFF800000> : vector<8xf32>
    %719 = vector.multi_reduction <maximumf>, %718, %cst_440 [1] : vector<8x8xf32> to vector<8xf32>
    %720 = vector.shape_cast %719 : vector<8xf32> to vector<8x1xf32>
    %721 = vector.broadcast %720 : vector<8x1xf32> to vector<8x8xf32>
    %722 = arith.subf %718, %721 : vector<8x8xf32>
    %723 = math.exp %722 : vector<8x8xf32>
    %cst_441 = arith.constant dense<0.000000e+00> : vector<8xf32>
    %724 = vector.multi_reduction <add>, %723, %cst_441 [1] : vector<8x8xf32> to vector<8xf32>
    %725 = vector.shape_cast %724 : vector<8xf32> to vector<8x1xf32>
    %726 = tpu.reciprocal %725 {approx = true} : vector<8x1xf32> -> vector<8x1xf32>
    %727 = vector.broadcast %726 : vector<8x1xf32> to vector<8x8xf32>
    %728 = arith.mulf %723, %727 : vector<8x8xf32>
    %729 = vector.extract_strided_slice %697 {offsets = [8, 0], sizes = [8, 8], strides = [1, 1]} : vector<16x8xf32> to vector<8x8xf32>
    %cst_442 = arith.constant dense<0.000000e+00> : vector<8x8xf32>
    %730 = tpu.matmul %728, %729, %cst_442 {dimension_numbers = #tpu.dot_dimension_numbers<[1], [0], [0], [1], [0, 0, 1, 1], [], []>} : vector<8x8xf32>, vector<8x8xf32>, vector<8x8xf32> -> vector<8x8xf32>
    %c8_443 = arith.constant 8 : index
    %c0_444 = arith.constant 0 : index
    %731 = vector.load %arg34[%c8_443, %c0_444] : memref<16x8xf32, #tpu.memory_space<vmem>>, vector<8x8xf32>
    tpu.vector_store %arg34[%c8_443, %c0_444], %730 {strides = array<i32>} : memref<16x8xf32, #tpu.memory_space<vmem>>, vector<8x8xf32>,
    %c0_445 = arith.constant 0 : index
    %c0_446 = arith.constant 0 : index
    %732 = vector.load %arg34[%c0_445, %c0_446] : memref<16x8xf32, #tpu.memory_space<vmem>>, vector<16x8xf32>
    %c1_447 = arith.constant 1 : index
    %c0_448 = arith.constant 0 : index
    %c0_449 = arith.constant 0 : index
    %733 = vector.load %arg23[%c1_447, %c0_448, %c0_449] : memref<4x8x32xf32, #tpu.memory_space<vmem>>, vector<1x8x32xf32>
    %734 = vector.shape_cast %733 : vector<1x8x32xf32> to vector<8x32xf32>
    %cst_450 = arith.constant dense<0.000000e+00> : vector<16x32xf32>
    %735 = tpu.matmul %732, %734, %cst_450 {dimension_numbers = #tpu.dot_dimension_numbers<[1], [0], [0], [1], [0, 0, 1, 1], [], []>} : vector<16x8xf32>, vector<8x32xf32>, vector<16x32xf32> -> vector<16x32xf32>
    %736 = arith.addf %674, %735 : vector<16x32xf32>
    %c2_451 = arith.constant 2 : index
    %c0_452 = arith.constant 0 : index
    %c0_453 = arith.constant 0 : index
    %737 = vector.load %arg17[%c2_451, %c0_452, %c0_453] : memref<4x32x8xf32, #tpu.memory_space<vmem>>, vector<1x32x8xf32>
    %738 = vector.shape_cast %737 : vector<1x32x8xf32> to vector<32x8xf32>
    %cst_454 = arith.constant dense<0.000000e+00> : vector<16x8xf32>
    %739 = tpu.matmul %611, %738, %cst_454 {dimension_numbers = #tpu.dot_dimension_numbers<[1], [0], [0], [1], [0, 0, 1, 1], [], []>} : vector<16x32xf32>, vector<32x8xf32>, vector<16x8xf32> -> vector<16x8xf32>
    %c2_455 = arith.constant 2 : index
    %c0_456 = arith.constant 0 : index
    %c0_457 = arith.constant 0 : index
    %740 = vector.load %arg18[%c2_455, %c0_456, %c0_457] : memref<4x1x8xf32, #tpu.memory_space<vmem>>, vector<1x1x8xf32>
    %741 = vector.shape_cast %740 : vector<1x1x8xf32> to vector<1x8xf32>
    %742 = vector.broadcast %741 : vector<1x8xf32> to vector<16x8xf32>
    %743 = arith.addf %739, %742 : vector<16x8xf32>
    %cst_458 = arith.constant 0.353553385 : f32
    %744 = vector.broadcast %cst_458 : f32 to vector<16x8xf32>
    %745 = arith.mulf %743, %744 : vector<16x8xf32>
    %c2_459 = arith.constant 2 : index
    %c0_460 = arith.constant 0 : index
    %c0_461 = arith.constant 0 : index
    %746 = vector.load %arg19[%c2_459, %c0_460, %c0_461] : memref<4x32x8xf32, #tpu.memory_space<vmem>>, vector<1x32x8xf32>
    %747 = vector.shape_cast %746 : vector<1x32x8xf32> to vector<32x8xf32>
    %cst_462 = arith.constant dense<0.000000e+00> : vector<16x8xf32>
    %748 = tpu.matmul %317, %747, %cst_462 {dimension_numbers = #tpu.dot_dimension_numbers<[1], [0], [0], [1], [0, 0, 1, 1], [], []>} : vector<16x32xf32>, vector<32x8xf32>, vector<16x8xf32> -> vector<16x8xf32>
    %c2_463 = arith.constant 2 : index
    %c0_464 = arith.constant 0 : index
    %c0_465 = arith.constant 0 : index
    %749 = vector.load %arg20[%c2_463, %c0_464, %c0_465] : memref<4x1x8xf32, #tpu.memory_space<vmem>>, vector<1x1x8xf32>
    %750 = vector.shape_cast %749 : vector<1x1x8xf32> to vector<1x8xf32>
    %751 = vector.broadcast %750 : vector<1x8xf32> to vector<16x8xf32>
    %752 = arith.addf %748, %751 : vector<16x8xf32>
    %c2_466 = arith.constant 2 : index
    %c0_467 = arith.constant 0 : index
    %c0_468 = arith.constant 0 : index
    %753 = vector.load %arg21[%c2_466, %c0_467, %c0_468] : memref<4x32x8xf32, #tpu.memory_space<vmem>>, vector<1x32x8xf32>
    %754 = vector.shape_cast %753 : vector<1x32x8xf32> to vector<32x8xf32>
    %cst_469 = arith.constant dense<0.000000e+00> : vector<16x8xf32>
    %755 = tpu.matmul %317, %754, %cst_469 {dimension_numbers = #tpu.dot_dimension_numbers<[1], [0], [0], [1], [0, 0, 1, 1], [], []>} : vector<16x32xf32>, vector<32x8xf32>, vector<16x8xf32> -> vector<16x8xf32>
    %c2_470 = arith.constant 2 : index
    %c0_471 = arith.constant 0 : index
    %c0_472 = arith.constant 0 : index
    %756 = vector.load %arg22[%c2_470, %c0_471, %c0_472] : memref<4x1x8xf32, #tpu.memory_space<vmem>>, vector<1x1x8xf32>
    %757 = vector.shape_cast %756 : vector<1x1x8xf32> to vector<1x8xf32>
    %758 = vector.broadcast %757 : vector<1x8xf32> to vector<16x8xf32>
    %759 = arith.addf %755, %758 : vector<16x8xf32>
    %760 = vector.extract_strided_slice %745 {offsets = [0, 0], sizes = [8, 8], strides = [1, 1]} : vector<16x8xf32> to vector<8x8xf32>
    %761 = vector.extract_strided_slice %752 {offsets = [0, 0], sizes = [8, 8], strides = [1, 1]} : vector<16x8xf32> to vector<8x8xf32>
    %762 = tpu.transpose %761, [1, 0] : vector<8x8xf32> -> vector<8x8xf32>
    %cst_473 = arith.constant dense<0.000000e+00> : vector<8x8xf32>
    %763 = tpu.matmul %760, %762, %cst_473 {dimension_numbers = #tpu.dot_dimension_numbers<[1], [0], [0], [1], [0, 0, 1, 1], [], []>} : vector<8x8xf32>, vector<8x8xf32>, vector<8x8xf32> -> vector<8x8xf32>
    %cst_474 = arith.constant dense<0xFF800000> : vector<8xf32>
    %764 = vector.multi_reduction <maximumf>, %763, %cst_474 [1] : vector<8x8xf32> to vector<8xf32>
    %765 = vector.shape_cast %764 : vector<8xf32> to vector<8x1xf32>
    %766 = vector.broadcast %765 : vector<8x1xf32> to vector<8x8xf32>
    %767 = arith.subf %763, %766 : vector<8x8xf32>
    %768 = math.exp %767 : vector<8x8xf32>
    %cst_475 = arith.constant dense<0.000000e+00> : vector<8xf32>
    %769 = vector.multi_reduction <add>, %768, %cst_475 [1] : vector<8x8xf32> to vector<8xf32>
    %770 = vector.shape_cast %769 : vector<8xf32> to vector<8x1xf32>
    %771 = tpu.reciprocal %770 {approx = true} : vector<8x1xf32> -> vector<8x1xf32>
    %772 = vector.broadcast %771 : vector<8x1xf32> to vector<8x8xf32>
    %773 = arith.mulf %768, %772 : vector<8x8xf32>
    %774 = vector.extract_strided_slice %759 {offsets = [0, 0], sizes = [8, 8], strides = [1, 1]} : vector<16x8xf32> to vector<8x8xf32>
    %cst_476 = arith.constant dense<0.000000e+00> : vector<8x8xf32>
    %775 = tpu.matmul %773, %774, %cst_476 {dimension_numbers = #tpu.dot_dimension_numbers<[1], [0], [0], [1], [0, 0, 1, 1], [], []>} : vector<8x8xf32>, vector<8x8xf32>, vector<8x8xf32> -> vector<8x8xf32>
    %c0_477 = arith.constant 0 : index
    %c0_478 = arith.constant 0 : index
    %776 = vector.load %arg34[%c0_477, %c0_478] : memref<16x8xf32, #tpu.memory_space<vmem>>, vector<8x8xf32>
    tpu.vector_store %arg34[%c0_477, %c0_478], %775 {strides = array<i32>} : memref<16x8xf32, #tpu.memory_space<vmem>>, vector<8x8xf32>,
    %777 = vector.extract_strided_slice %745 {offsets = [8, 0], sizes = [8, 8], strides = [1, 1]} : vector<16x8xf32> to vector<8x8xf32>
    %778 = vector.extract_strided_slice %752 {offsets = [8, 0], sizes = [8, 8], strides = [1, 1]} : vector<16x8xf32> to vector<8x8xf32>
    %779 = tpu.transpose %778, [1, 0] : vector<8x8xf32> -> vector<8x8xf32>
    %cst_479 = arith.constant dense<0.000000e+00> : vector<8x8xf32>
    %780 = tpu.matmul %777, %779, %cst_479 {dimension_numbers = #tpu.dot_dimension_numbers<[1], [0], [0], [1], [0, 0, 1, 1], [], []>} : vector<8x8xf32>, vector<8x8xf32>, vector<8x8xf32> -> vector<8x8xf32>
    %cst_480 = arith.constant dense<0xFF800000> : vector<8xf32>
    %781 = vector.multi_reduction <maximumf>, %780, %cst_480 [1] : vector<8x8xf32> to vector<8xf32>
    %782 = vector.shape_cast %781 : vector<8xf32> to vector<8x1xf32>
    %783 = vector.broadcast %782 : vector<8x1xf32> to vector<8x8xf32>
    %784 = arith.subf %780, %783 : vector<8x8xf32>
    %785 = math.exp %784 : vector<8x8xf32>
    %cst_481 = arith.constant dense<0.000000e+00> : vector<8xf32>
    %786 = vector.multi_reduction <add>, %785, %cst_481 [1] : vector<8x8xf32> to vector<8xf32>
    %787 = vector.shape_cast %786 : vector<8xf32> to vector<8x1xf32>
    %788 = tpu.reciprocal %787 {approx = true} : vector<8x1xf32> -> vector<8x1xf32>
    %789 = vector.broadcast %788 : vector<8x1xf32> to vector<8x8xf32>
    %790 = arith.mulf %785, %789 : vector<8x8xf32>
    %791 = vector.extract_strided_slice %759 {offsets = [8, 0], sizes = [8, 8], strides = [1, 1]} : vector<16x8xf32> to vector<8x8xf32>
    %cst_482 = arith.constant dense<0.000000e+00> : vector<8x8xf32>
    %792 = tpu.matmul %790, %791, %cst_482 {dimension_numbers = #tpu.dot_dimension_numbers<[1], [0], [0], [1], [0, 0, 1, 1], [], []>} : vector<8x8xf32>, vector<8x8xf32>, vector<8x8xf32> -> vector<8x8xf32>
    %c8_483 = arith.constant 8 : index
    %c0_484 = arith.constant 0 : index
    %793 = vector.load %arg34[%c8_483, %c0_484] : memref<16x8xf32, #tpu.memory_space<vmem>>, vector<8x8xf32>
    tpu.vector_store %arg34[%c8_483, %c0_484], %792 {strides = array<i32>} : memref<16x8xf32, #tpu.memory_space<vmem>>, vector<8x8xf32>,
    %c0_485 = arith.constant 0 : index
    %c0_486 = arith.constant 0 : index
    %794 = vector.load %arg34[%c0_485, %c0_486] : memref<16x8xf32, #tpu.memory_space<vmem>>, vector<16x8xf32>
    %c2_487 = arith.constant 2 : index
    %c0_488 = arith.constant 0 : index
    %c0_489 = arith.constant 0 : index
    %795 = vector.load %arg23[%c2_487, %c0_488, %c0_489] : memref<4x8x32xf32, #tpu.memory_space<vmem>>, vector<1x8x32xf32>
    %796 = vector.shape_cast %795 : vector<1x8x32xf32> to vector<8x32xf32>
    %cst_490 = arith.constant dense<0.000000e+00> : vector<16x32xf32>
    %797 = tpu.matmul %794, %796, %cst_490 {dimension_numbers = #tpu.dot_dimension_numbers<[1], [0], [0], [1], [0, 0, 1, 1], [], []>} : vector<16x8xf32>, vector<8x32xf32>, vector<16x32xf32> -> vector<16x32xf32>
    %798 = arith.addf %736, %797 : vector<16x32xf32>
    %c3_491 = arith.constant 3 : index
    %c0_492 = arith.constant 0 : index
    %c0_493 = arith.constant 0 : index
    %799 = vector.load %arg17[%c3_491, %c0_492, %c0_493] : memref<4x32x8xf32, #tpu.memory_space<vmem>>, vector<1x32x8xf32>
    %800 = vector.shape_cast %799 : vector<1x32x8xf32> to vector<32x8xf32>
    %cst_494 = arith.constant dense<0.000000e+00> : vector<16x8xf32>
    %801 = tpu.matmul %611, %800, %cst_494 {dimension_numbers = #tpu.dot_dimension_numbers<[1], [0], [0], [1], [0, 0, 1, 1], [], []>} : vector<16x32xf32>, vector<32x8xf32>, vector<16x8xf32> -> vector<16x8xf32>
    %c3_495 = arith.constant 3 : index
    %c0_496 = arith.constant 0 : index
    %c0_497 = arith.constant 0 : index
    %802 = vector.load %arg18[%c3_495, %c0_496, %c0_497] : memref<4x1x8xf32, #tpu.memory_space<vmem>>, vector<1x1x8xf32>
    %803 = vector.shape_cast %802 : vector<1x1x8xf32> to vector<1x8xf32>
    %804 = vector.broadcast %803 : vector<1x8xf32> to vector<16x8xf32>
    %805 = arith.addf %801, %804 : vector<16x8xf32>
    %cst_498 = arith.constant 0.353553385 : f32
    %806 = vector.broadcast %cst_498 : f32 to vector<16x8xf32>
    %807 = arith.mulf %805, %806 : vector<16x8xf32>
    %c3_499 = arith.constant 3 : index
    %c0_500 = arith.constant 0 : index
    %c0_501 = arith.constant 0 : index
    %808 = vector.load %arg19[%c3_499, %c0_500, %c0_501] : memref<4x32x8xf32, #tpu.memory_space<vmem>>, vector<1x32x8xf32>
    %809 = vector.shape_cast %808 : vector<1x32x8xf32> to vector<32x8xf32>
    %cst_502 = arith.constant dense<0.000000e+00> : vector<16x8xf32>
    %810 = tpu.matmul %317, %809, %cst_502 {dimension_numbers = #tpu.dot_dimension_numbers<[1], [0], [0], [1], [0, 0, 1, 1], [], []>} : vector<16x32xf32>, vector<32x8xf32>, vector<16x8xf32> -> vector<16x8xf32>
    %c3_503 = arith.constant 3 : index
    %c0_504 = arith.constant 0 : index
    %c0_505 = arith.constant 0 : index
    %811 = vector.load %arg20[%c3_503, %c0_504, %c0_505] : memref<4x1x8xf32, #tpu.memory_space<vmem>>, vector<1x1x8xf32>
    %812 = vector.shape_cast %811 : vector<1x1x8xf32> to vector<1x8xf32>
    %813 = vector.broadcast %812 : vector<1x8xf32> to vector<16x8xf32>
    %814 = arith.addf %810, %813 : vector<16x8xf32>
    %c3_506 = arith.constant 3 : index
    %c0_507 = arith.constant 0 : index
    %c0_508 = arith.constant 0 : index
    %815 = vector.load %arg21[%c3_506, %c0_507, %c0_508] : memref<4x32x8xf32, #tpu.memory_space<vmem>>, vector<1x32x8xf32>
    %816 = vector.shape_cast %815 : vector<1x32x8xf32> to vector<32x8xf32>
    %cst_509 = arith.constant dense<0.000000e+00> : vector<16x8xf32>
    %817 = tpu.matmul %317, %816, %cst_509 {dimension_numbers = #tpu.dot_dimension_numbers<[1], [0], [0], [1], [0, 0, 1, 1], [], []>} : vector<16x32xf32>, vector<32x8xf32>, vector<16x8xf32> -> vector<16x8xf32>
    %c3_510 = arith.constant 3 : index
    %c0_511 = arith.constant 0 : index
    %c0_512 = arith.constant 0 : index
    %818 = vector.load %arg22[%c3_510, %c0_511, %c0_512] : memref<4x1x8xf32, #tpu.memory_space<vmem>>, vector<1x1x8xf32>
    %819 = vector.shape_cast %818 : vector<1x1x8xf32> to vector<1x8xf32>
    %820 = vector.broadcast %819 : vector<1x8xf32> to vector<16x8xf32>
    %821 = arith.addf %817, %820 : vector<16x8xf32>
    %822 = vector.extract_strided_slice %807 {offsets = [0, 0], sizes = [8, 8], strides = [1, 1]} : vector<16x8xf32> to vector<8x8xf32>
    %823 = vector.extract_strided_slice %814 {offsets = [0, 0], sizes = [8, 8], strides = [1, 1]} : vector<16x8xf32> to vector<8x8xf32>
    %824 = tpu.transpose %823, [1, 0] : vector<8x8xf32> -> vector<8x8xf32>
    %cst_513 = arith.constant dense<0.000000e+00> : vector<8x8xf32>
    %825 = tpu.matmul %822, %824, %cst_513 {dimension_numbers = #tpu.dot_dimension_numbers<[1], [0], [0], [1], [0, 0, 1, 1], [], []>} : vector<8x8xf32>, vector<8x8xf32>, vector<8x8xf32> -> vector<8x8xf32>
    %cst_514 = arith.constant dense<0xFF800000> : vector<8xf32>
    %826 = vector.multi_reduction <maximumf>, %825, %cst_514 [1] : vector<8x8xf32> to vector<8xf32>
    %827 = vector.shape_cast %826 : vector<8xf32> to vector<8x1xf32>
    %828 = vector.broadcast %827 : vector<8x1xf32> to vector<8x8xf32>
    %829 = arith.subf %825, %828 : vector<8x8xf32>
    %830 = math.exp %829 : vector<8x8xf32>
    %cst_515 = arith.constant dense<0.000000e+00> : vector<8xf32>
    %831 = vector.multi_reduction <add>, %830, %cst_515 [1] : vector<8x8xf32> to vector<8xf32>
    %832 = vector.shape_cast %831 : vector<8xf32> to vector<8x1xf32>
    %833 = tpu.reciprocal %832 {approx = true} : vector<8x1xf32> -> vector<8x1xf32>
    %834 = vector.broadcast %833 : vector<8x1xf32> to vector<8x8xf32>
    %835 = arith.mulf %830, %834 : vector<8x8xf32>
    %836 = vector.extract_strided_slice %821 {offsets = [0, 0], sizes = [8, 8], strides = [1, 1]} : vector<16x8xf32> to vector<8x8xf32>
    %cst_516 = arith.constant dense<0.000000e+00> : vector<8x8xf32>
    %837 = tpu.matmul %835, %836, %cst_516 {dimension_numbers = #tpu.dot_dimension_numbers<[1], [0], [0], [1], [0, 0, 1, 1], [], []>} : vector<8x8xf32>, vector<8x8xf32>, vector<8x8xf32> -> vector<8x8xf32>
    %c0_517 = arith.constant 0 : index
    %c0_518 = arith.constant 0 : index
    %838 = vector.load %arg34[%c0_517, %c0_518] : memref<16x8xf32, #tpu.memory_space<vmem>>, vector<8x8xf32>
    tpu.vector_store %arg34[%c0_517, %c0_518], %837 {strides = array<i32>} : memref<16x8xf32, #tpu.memory_space<vmem>>, vector<8x8xf32>,
    %839 = vector.extract_strided_slice %807 {offsets = [8, 0], sizes = [8, 8], strides = [1, 1]} : vector<16x8xf32> to vector<8x8xf32>
    %840 = vector.extract_strided_slice %814 {offsets = [8, 0], sizes = [8, 8], strides = [1, 1]} : vector<16x8xf32> to vector<8x8xf32>
    %841 = tpu.transpose %840, [1, 0] : vector<8x8xf32> -> vector<8x8xf32>
    %cst_519 = arith.constant dense<0.000000e+00> : vector<8x8xf32>
    %842 = tpu.matmul %839, %841, %cst_519 {dimension_numbers = #tpu.dot_dimension_numbers<[1], [0], [0], [1], [0, 0, 1, 1], [], []>} : vector<8x8xf32>, vector<8x8xf32>, vector<8x8xf32> -> vector<8x8xf32>
    %cst_520 = arith.constant dense<0xFF800000> : vector<8xf32>
    %843 = vector.multi_reduction <maximumf>, %842, %cst_520 [1] : vector<8x8xf32> to vector<8xf32>
    %844 = vector.shape_cast %843 : vector<8xf32> to vector<8x1xf32>
    %845 = vector.broadcast %844 : vector<8x1xf32> to vector<8x8xf32>
    %846 = arith.subf %842, %845 : vector<8x8xf32>
    %847 = math.exp %846 : vector<8x8xf32>
    %cst_521 = arith.constant dense<0.000000e+00> : vector<8xf32>
    %848 = vector.multi_reduction <add>, %847, %cst_521 [1] : vector<8x8xf32> to vector<8xf32>
    %849 = vector.shape_cast %848 : vector<8xf32> to vector<8x1xf32>
    %850 = tpu.reciprocal %849 {approx = true} : vector<8x1xf32> -> vector<8x1xf32>
    %851 = vector.broadcast %850 : vector<8x1xf32> to vector<8x8xf32>
    %852 = arith.mulf %847, %851 : vector<8x8xf32>
    %853 = vector.extract_strided_slice %821 {offsets = [8, 0], sizes = [8, 8], strides = [1, 1]} : vector<16x8xf32> to vector<8x8xf32>
    %cst_522 = arith.constant dense<0.000000e+00> : vector<8x8xf32>
    %854 = tpu.matmul %852, %853, %cst_522 {dimension_numbers = #tpu.dot_dimension_numbers<[1], [0], [0], [1], [0, 0, 1, 1], [], []>} : vector<8x8xf32>, vector<8x8xf32>, vector<8x8xf32> -> vector<8x8xf32>
    %c8_523 = arith.constant 8 : index
    %c0_524 = arith.constant 0 : index
    %855 = vector.load %arg34[%c8_523, %c0_524] : memref<16x8xf32, #tpu.memory_space<vmem>>, vector<8x8xf32>
    tpu.vector_store %arg34[%c8_523, %c0_524], %854 {strides = array<i32>} : memref<16x8xf32, #tpu.memory_space<vmem>>, vector<8x8xf32>,
    %c0_525 = arith.constant 0 : index
    %c0_526 = arith.constant 0 : index
    %856 = vector.load %arg34[%c0_525, %c0_526] : memref<16x8xf32, #tpu.memory_space<vmem>>, vector<16x8xf32>
    %c3_527 = arith.constant 3 : index
    %c0_528 = arith.constant 0 : index
    %c0_529 = arith.constant 0 : index
    %857 = vector.load %arg23[%c3_527, %c0_528, %c0_529] : memref<4x8x32xf32, #tpu.memory_space<vmem>>, vector<1x8x32xf32>
    %858 = vector.shape_cast %857 : vector<1x8x32xf32> to vector<8x32xf32>
    %cst_530 = arith.constant dense<0.000000e+00> : vector<16x32xf32>
    %859 = tpu.matmul %856, %858, %cst_530 {dimension_numbers = #tpu.dot_dimension_numbers<[1], [0], [0], [1], [0, 0, 1, 1], [], []>} : vector<16x8xf32>, vector<8x32xf32>, vector<16x32xf32> -> vector<16x32xf32>
    %860 = arith.addf %798, %859 : vector<16x32xf32>
    %c0_531 = arith.constant 0 : index
    %c0_532 = arith.constant 0 : index
    %861 = vector.load %arg24[%c0_531, %c0_532] : memref<1x32xf32, #tpu.memory_space<vmem>>, vector<1x32xf32>
    %862 = vector.broadcast %861 : vector<1x32xf32> to vector<16x32xf32>
    %863 = arith.addf %860, %862 : vector<16x32xf32>
    %864 = arith.addf %863, %611 : vector<16x32xf32>
    %cst_533 = arith.constant dense<0.000000e+00> : vector<16xf32>
    %865 = vector.multi_reduction <add>, %864, %cst_533 [1] : vector<16x32xf32> to vector<16xf32>
    %866 = vector.shape_cast %865 : vector<16xf32> to vector<16x1xf32>
    %cst_534 = arith.constant 3.200000e+01 : f32
    %867 = vector.broadcast %cst_534 : f32 to vector<16x1xf32>
    %868 = arith.divf %866, %867 : vector<16x1xf32>
    %869 = vector.broadcast %868 : vector<16x1xf32> to vector<16x32xf32>
    %870 = arith.subf %864, %869 : vector<16x32xf32>
    %871 = arith.mulf %870, %870 : vector<16x32xf32>
    %cst_535 = arith.constant dense<0.000000e+00> : vector<16xf32>
    %872 = vector.multi_reduction <add>, %871, %cst_535 [1] : vector<16x32xf32> to vector<16xf32>
    %873 = vector.shape_cast %872 : vector<16xf32> to vector<16x1xf32>
    %cst_536 = arith.constant 3.200000e+01 : f32
    %874 = vector.broadcast %cst_536 : f32 to vector<16x1xf32>
    %875 = arith.divf %873, %874 : vector<16x1xf32>
    %876 = vector.broadcast %868 : vector<16x1xf32> to vector<16x32xf32>
    %877 = arith.subf %864, %876 : vector<16x32xf32>
    %cst_537 = arith.constant 9.99999974E-6 : f32
    %878 = vector.broadcast %cst_537 : f32 to vector<16x1xf32>
    %879 = arith.addf %875, %878 : vector<16x1xf32>
    %880 = math.rsqrt %879 : vector<16x1xf32>
    %881 = vector.broadcast %880 : vector<16x1xf32> to vector<16x32xf32>
    %882 = arith.mulf %877, %881 : vector<16x32xf32>
    %c0_538 = arith.constant 0 : index
    %c0_539 = arith.constant 0 : index
    %883 = vector.load %arg29[%c0_538, %c0_539] : memref<1x32xf32, #tpu.memory_space<vmem>>, vector<1x32xf32>
    %884 = vector.broadcast %883 : vector<1x32xf32> to vector<16x32xf32>
    %885 = arith.mulf %882, %884 : vector<16x32xf32>
    %c0_540 = arith.constant 0 : index
    %c0_541 = arith.constant 0 : index
    %886 = vector.load %arg30[%c0_540, %c0_541] : memref<1x32xf32, #tpu.memory_space<vmem>>, vector<1x32xf32>
    %887 = vector.broadcast %886 : vector<1x32xf32> to vector<16x32xf32>
    %888 = arith.addf %885, %887 : vector<16x32xf32>
    %c0_542 = arith.constant 0 : index
    %c0_543 = arith.constant 0 : index
    %889 = vector.load %arg25[%c0_542, %c0_543] : memref<32x16xf32, #tpu.memory_space<vmem>>, vector<32x16xf32>
    %cst_544 = arith.constant dense<0.000000e+00> : vector<16x16xf32>
    %890 = tpu.matmul %863, %889, %cst_544 {dimension_numbers = #tpu.dot_dimension_numbers<[1], [0], [0], [1], [0, 0, 1, 1], [], []>} : vector<16x32xf32>, vector<32x16xf32>, vector<16x16xf32> -> vector<16x16xf32>
    %c0_545 = arith.constant 0 : index
    %c0_546 = arith.constant 0 : index
    %891 = vector.load %arg26[%c0_545, %c0_546] : memref<1x16xf32, #tpu.memory_space<vmem>>, vector<1x16xf32>
    %892 = vector.broadcast %891 : vector<1x16xf32> to vector<16x16xf32>
    %893 = arith.addf %890, %892 : vector<16x16xf32>
    %cst_547 = arith.constant 0.000000e+00 : f32
    %894 = vector.broadcast %cst_547 : f32 to vector<16x16xf32>
    %895 = arith.maximumf %893, %894 : vector<16x16xf32>
    %c0_548 = arith.constant 0 : index
    %c0_549 = arith.constant 0 : index
    %896 = vector.load %arg27[%c0_548, %c0_549] : memref<16x32xf32, #tpu.memory_space<vmem>>, vector<16x32xf32>
    %cst_550 = arith.constant dense<0.000000e+00> : vector<16x32xf32>
    %897 = tpu.matmul %895, %896, %cst_550 {dimension_numbers = #tpu.dot_dimension_numbers<[1], [0], [0], [1], [0, 0, 1, 1], [], []>} : vector<16x16xf32>, vector<16x32xf32>, vector<16x32xf32> -> vector<16x32xf32>
    %c0_551 = arith.constant 0 : index
    %c0_552 = arith.constant 0 : index
    %898 = vector.load %arg28[%c0_551, %c0_552] : memref<1x32xf32, #tpu.memory_space<vmem>>, vector<1x32xf32>
    %899 = vector.broadcast %898 : vector<1x32xf32> to vector<16x32xf32>
    %900 = arith.addf %897, %899 : vector<16x32xf32>
    %901 = arith.addf %900, %888 : vector<16x32xf32>
    %cst_553 = arith.constant dense<0.000000e+00> : vector<16xf32>
    %902 = vector.multi_reduction <add>, %901, %cst_553 [1] : vector<16x32xf32> to vector<16xf32>
    %903 = vector.shape_cast %902 : vector<16xf32> to vector<16x1xf32>
    %cst_554 = arith.constant 3.200000e+01 : f32
    %904 = vector.broadcast %cst_554 : f32 to vector<16x1xf32>
    %905 = arith.divf %903, %904 : vector<16x1xf32>
    %906 = vector.broadcast %905 : vector<16x1xf32> to vector<16x32xf32>
    %907 = arith.subf %901, %906 : vector<16x32xf32>
    %908 = arith.mulf %907, %907 : vector<16x32xf32>
    %cst_555 = arith.constant dense<0.000000e+00> : vector<16xf32>
    %909 = vector.multi_reduction <add>, %908, %cst_555 [1] : vector<16x32xf32> to vector<16xf32>
    %910 = vector.shape_cast %909 : vector<16xf32> to vector<16x1xf32>
    %cst_556 = arith.constant 3.200000e+01 : f32
    %911 = vector.broadcast %cst_556 : f32 to vector<16x1xf32>
    %912 = arith.divf %910, %911 : vector<16x1xf32>
    %913 = vector.broadcast %905 : vector<16x1xf32> to vector<16x32xf32>
    %914 = arith.subf %901, %913 : vector<16x32xf32>
    %cst_557 = arith.constant 9.99999974E-6 : f32
    %915 = vector.broadcast %cst_557 : f32 to vector<16x1xf32>
    %916 = arith.addf %912, %915 : vector<16x1xf32>
    %917 = math.rsqrt %916 : vector<16x1xf32>
    %918 = vector.broadcast %917 : vector<16x1xf32> to vector<16x32xf32>
    %919 = arith.mulf %914, %918 : vector<16x32xf32>
    %c0_558 = arith.constant 0 : index
    %c0_559 = arith.constant 0 : index
    %920 = vector.load %arg29[%c0_558, %c0_559] : memref<1x32xf32, #tpu.memory_space<vmem>>, vector<1x32xf32>
    %921 = vector.broadcast %920 : vector<1x32xf32> to vector<16x32xf32>
    %922 = arith.mulf %919, %921 : vector<16x32xf32>
    %c0_560 = arith.constant 0 : index
    %c0_561 = arith.constant 0 : index
    %923 = vector.load %arg30[%c0_560, %c0_561] : memref<1x32xf32, #tpu.memory_space<vmem>>, vector<1x32xf32>
    %924 = vector.broadcast %923 : vector<1x32xf32> to vector<16x32xf32>
    %925 = arith.addf %922, %924 : vector<16x32xf32>
    %c0_562 = arith.constant 0 : index
    %c0_563 = arith.constant 0 : index
    %926 = vector.load %arg31[%c0_562, %c0_563] : memref<32x16xf32, #tpu.memory_space<vmem>>, vector<32x16xf32>
    %cst_564 = arith.constant dense<0.000000e+00> : vector<16x16xf32>
    %927 = tpu.matmul %925, %926, %cst_564 {dimension_numbers = #tpu.dot_dimension_numbers<[1], [0], [0], [1], [0, 0, 1, 1], [], []>} : vector<16x32xf32>, vector<32x16xf32>, vector<16x16xf32> -> vector<16x16xf32>
    %c0_565 = arith.constant 0 : index
    %c0_566 = arith.constant 0 : index
    %928 = vector.load %arg32[%c0_565, %c0_566] : memref<1x16xf32, #tpu.memory_space<vmem>>, vector<1x16xf32>
    %929 = vector.broadcast %928 : vector<1x16xf32> to vector<16x16xf32>
    %930 = arith.addf %927, %929 : vector<16x16xf32>
    %c0_567 = arith.constant 0 : index
    %c0_568 = arith.constant 0 : index
    %931 = vector.load %arg33[%c0_567, %c0_568] : memref<16x16xf32, #tpu.memory_space<vmem>>, vector<16x16xf32>
    tpu.vector_store %arg33[%c0_567, %c0_568], %930 {strides = array<i32>} : memref<16x16xf32, #tpu.memory_space<vmem>>, vector<16x16xf32>,
    return
  }
  func.func @transform_0(%arg0: i32) -> (i32, i32) {
    %c0_i32 = arith.constant 0 : i32
    %c0_i32_0 = arith.constant 0 : i32
    %c0_i32_1 = arith.constant 0 : i32
    return %c0_i32, %c0_i32_0 : i32, i32
  }
  func.func @transform_1(%arg0: i32) -> (i32, i32) {
    %c0_i32 = arith.constant 0 : i32
    %c0_i32_0 = arith.constant 0 : i32
    %c0_i32_1 = arith.constant 0 : i32
    return %c0_i32, %c0_i32_0 : i32, i32
  }
  func.func @transform_2(%arg0: i32) -> (i32, i32, i32) {
    %c0_i32 = arith.constant 0 : i32
    %c0_i32_0 = arith.constant 0 : i32
    %c0_i32_1 = arith.constant 0 : i32
    %c0_i32_2 = arith.constant 0 : i32
    return %c0_i32, %c0_i32_0, %c0_i32_1 : i32, i32, i32
  }
  func.func @transform_3(%arg0: i32) -> (i32, i32, i32) {
    %c0_i32 = arith.constant 0 : i32
    %c0_i32_0 = arith.constant 0 : i32
    %c0_i32_1 = arith.constant 0 : i32
    %c0_i32_2 = arith.constant 0 : i32
    return %c0_i32, %c0_i32_0, %c0_i32_1 : i32, i32, i32
  }
  func.func @transform_4(%arg0: i32) -> (i32, i32, i32) {
    %c0_i32 = arith.constant 0 : i32
    %c0_i32_0 = arith.constant 0 : i32
    %c0_i32_1 = arith.constant 0 : i32
    %c0_i32_2 = arith.constant 0 : i32
    return %c0_i32, %c0_i32_0, %c0_i32_1 : i32, i32, i32
  }
  func.func @transform_5(%arg0: i32) -> (i32, i32, i32) {
    %c0_i32 = arith.constant 0 : i32
    %c0_i32_0 = arith.constant 0 : i32
    %c0_i32_1 = arith.constant 0 : i32
    %c0_i32_2 = arith.constant 0 : i32
    return %c0_i32, %c0_i32_0, %c0_i32_1 : i32, i32, i32
  }
  func.func @transform_6(%arg0: i32) -> (i32, i32, i32) {
    %c0_i32 = arith.constant 0 : i32
    %c0_i32_0 = arith.constant 0 : i32
    %c0_i32_1 = arith.constant 0 : i32
    %c0_i32_2 = arith.constant 0 : i32
    return %c0_i32, %c0_i32_0, %c0_i32_1 : i32, i32, i32
  }
  func.func @transform_7(%arg0: i32) -> (i32, i32, i32) {
    %c0_i32 = arith.constant 0 : i32
    %c0_i32_0 = arith.constant 0 : i32
    %c0_i32_1 = arith.constant 0 : i32
    %c0_i32_2 = arith.constant 0 : i32
    return %c0_i32, %c0_i32_0, %c0_i32_1 : i32, i32, i32
  }
  func.func @transform_8(%arg0: i32) -> (i32, i32, i32) {
    %c0_i32 = arith.constant 0 : i32
    %c0_i32_0 = arith.constant 0 : i32
    %c0_i32_1 = arith.constant 0 : i32
    %c0_i32_2 = arith.constant 0 : i32
    return %c0_i32, %c0_i32_0, %c0_i32_1 : i32, i32, i32
  }
  func.func @transform_9(%arg0: i32) -> (i32, i32) {
    %c0_i32 = arith.constant 0 : i32
    %c0_i32_0 = arith.constant 0 : i32
    %c0_i32_1 = arith.constant 0 : i32
    return %c0_i32, %c0_i32_0 : i32, i32
  }
  func.func @transform_10(%arg0: i32) -> (i32, i32) {
    %c0_i32 = arith.constant 0 : i32
    %c0_i32_0 = arith.constant 0 : i32
    %c0_i32_1 = arith.constant 0 : i32
    return %c0_i32, %c0_i32_0 : i32, i32
  }
  func.func @transform_11(%arg0: i32) -> (i32, i32) {
    %c0_i32 = arith.constant 0 : i32
    %c0_i32_0 = arith.constant 0 : i32
    %c0_i32_1 = arith.constant 0 : i32
    return %c0_i32, %c0_i32_0 : i32, i32
  }
  func.func @transform_12(%arg0: i32) -> (i32, i32) {
    %c0_i32 = arith.constant 0 : i32
    %c0_i32_0 = arith.constant 0 : i32
    %c0_i32_1 = arith.constant 0 : i32
    return %c0_i32, %c0_i32_0 : i32, i32
  }
  func.func @transform_13(%arg0: i32) -> (i32, i32) {
    %c0_i32 = arith.constant 0 : i32
    %c0_i32_0 = arith.constant 0 : i32
    %c0_i32_1 = arith.constant 0 : i32
    return %c0_i32, %c0_i32_0 : i32, i32
  }
  func.func @transform_14(%arg0: i32) -> (i32, i32) {
    %c0_i32 = arith.constant 0 : i32
    %c0_i32_0 = arith.constant 0 : i32
    %c0_i32_1 = arith.constant 0 : i32
    return %c0_i32, %c0_i32_0 : i32, i32
  }
  func.func @transform_15(%arg0: i32) -> (i32, i32) {
    %c0_i32 = arith.constant 0 : i32
    %c0_i32_0 = arith.constant 0 : i32
    %c0_i32_1 = arith.constant 0 : i32
    return %c0_i32, %c0_i32_0 : i32, i32
  }
  func.func @transform_16(%arg0: i32) -> (i32, i32, i32) {
    %c0_i32 = arith.constant 0 : i32
    %c0_i32_0 = arith.constant 0 : i32
    %c0_i32_1 = arith.constant 0 : i32
    %c0_i32_2 = arith.constant 0 : i32
    return %c0_i32, %c0_i32_0, %c0_i32_1 : i32, i32, i32
  }
  func.func @transform_17(%arg0: i32) -> (i32, i32, i32) {
    %c0_i32 = arith.constant 0 : i32
    %c0_i32_0 = arith.constant 0 : i32
    %c0_i32_1 = arith.constant 0 : i32
    %c0_i32_2 = arith.constant 0 : i32
    return %c0_i32, %c0_i32_0, %c0_i32_1 : i32, i32, i32
  }
  func.func @transform_18(%arg0: i32) -> (i32, i32, i32) {
    %c0_i32 = arith.constant 0 : i32
    %c0_i32_0 = arith.constant 0 : i32
    %c0_i32_1 = arith.constant 0 : i32
    %c0_i32_2 = arith.constant 0 : i32
    return %c0_i32, %c0_i32_0, %c0_i32_1 : i32, i32, i32
  }
  func.func @transform_19(%arg0: i32) -> (i32, i32, i32) {
    %c0_i32 = arith.constant 0 : i32
    %c0_i32_0 = arith.constant 0 : i32
    %c0_i32_1 = arith.constant 0 : i32
    %c0_i32_2 = arith.constant 0 : i32
    return %c0_i32, %c0_i32_0, %c0_i32_1 : i32, i32, i32
  }
  func.func @transform_20(%arg0: i32) -> (i32, i32, i32) {
    %c0_i32 = arith.constant 0 : i32
    %c0_i32_0 = arith.constant 0 : i32
    %c0_i32_1 = arith.constant 0 : i32
    %c0_i32_2 = arith.constant 0 : i32
    return %c0_i32, %c0_i32_0, %c0_i32_1 : i32, i32, i32
  }
  func.func @transform_21(%arg0: i32) -> (i32, i32, i32) {
    %c0_i32 = arith.constant 0 : i32
    %c0_i32_0 = arith.constant 0 : i32
    %c0_i32_1 = arith.constant 0 : i32
    %c0_i32_2 = arith.constant 0 : i32
    return %c0_i32, %c0_i32_0, %c0_i32_1 : i32, i32, i32
  }
  func.func @transform_22(%arg0: i32) -> (i32, i32, i32) {
    %c0_i32 = arith.constant 0 : i32
    %c0_i32_0 = arith.constant 0 : i32
    %c0_i32_1 = arith.constant 0 : i32
    %c0_i32_2 = arith.constant 0 : i32
    return %c0_i32, %c0_i32_0, %c0_i32_1 : i32, i32, i32
  }
  func.func @transform_23(%arg0: i32) -> (i32, i32) {
    %c0_i32 = arith.constant 0 : i32
    %c0_i32_0 = arith.constant 0 : i32
    %c0_i32_1 = arith.constant 0 : i32
    return %c0_i32, %c0_i32_0 : i32, i32
  }
  func.func @transform_24(%arg0: i32) -> (i32, i32) {
    %c0_i32 = arith.constant 0 : i32
    %c0_i32_0 = arith.constant 0 : i32
    %c0_i32_1 = arith.constant 0 : i32
    return %c0_i32, %c0_i32_0 : i32, i32
  }
  func.func @transform_25(%arg0: i32) -> (i32, i32) {
    %c0_i32 = arith.constant 0 : i32
    %c0_i32_0 = arith.constant 0 : i32
    %c0_i32_1 = arith.constant 0 : i32
    return %c0_i32, %c0_i32_0 : i32, i32
  }
  func.func @transform_26(%arg0: i32) -> (i32, i32) {
    %c0_i32 = arith.constant 0 : i32
    %c0_i32_0 = arith.constant 0 : i32
    %c0_i32_1 = arith.constant 0 : i32
    return %c0_i32, %c0_i32_0 : i32, i32
  }
  func.func @transform_27(%arg0: i32) -> (i32, i32) {
    %c0_i32 = arith.constant 0 : i32
    %c0_i32_0 = arith.constant 0 : i32
    %c0_i32_1 = arith.constant 0 : i32
    return %c0_i32, %c0_i32_0 : i32, i32
  }
  func.func @transform_28(%arg0: i32) -> (i32, i32) {
    %c0_i32 = arith.constant 0 : i32
    %c0_i32_0 = arith.constant 0 : i32
    %c0_i32_1 = arith.constant 0 : i32
    return %c0_i32, %c0_i32_0 : i32, i32
  }
  func.func @transform_29(%arg0: i32) -> (i32, i32) {
    %c0_i32 = arith.constant 0 : i32
    %c0_i32_0 = arith.constant 0 : i32
    %c0_i32_1 = arith.constant 0 : i32
    return %c0_i32, %c0_i32_0 : i32, i32
  }
  func.func @transform_30(%arg0: i32) -> (i32, i32) {
    %c0_i32 = arith.constant 0 : i32
    %c0_i32_0 = arith.constant 0 : i32
    %c0_i32_1 = arith.constant 0 : i32
    return %c0_i32, %c0_i32_0 : i32, i32
  }
  func.func @transform_31(%arg0: i32) -> (i32, i32) {
    %c0_i32 = arith.constant 0 : i32
    %c0_i32_0 = arith.constant 0 : i32
    %c0_i32_1 = arith.constant 0 : i32
    return %c0_i32, %c0_i32_0 : i32, i32
  }
  func.func @transform_32(%arg0: i32) -> (i32, i32) {
    %c0_i32 = arith.constant 0 : i32
    %c0_i32_0 = arith.constant 0 : i32
    %c0_i32_1 = arith.constant 0 : i32
    return %c0_i32, %c0_i32_0 : i32, i32
  }
}

</mosaic_0001>

<bundles_post_ra>
// kernel: transformer_forward.1
= control target key start
LH: loop header
LB: loop body
LE: loop exit
PB: predicated region body
PF: predicated region fallthrough
CT: control target
= control target key end

     0   :  { %s4311_s6 = smov 1   ;;  %s4312_s10 = smov 2   ;;  %s5390_s0 = inlined_call_operand.smem [shape: u32[33], index: -1, kind: input, shape index: {}] }
   0x1   :  { %s4355_s5 = sld [smem:[%s5390_s0]]   ;;  %s4313_s14 = smov 3  }
   0x2   :  { %s4360_s9 = sld [smem:[%s5390_s0 + %s4311_s6]]   ;;  %s4314_s18 = smov 4  }
   0x3   :  { %s4365_s13 = sld [smem:[%s5390_s0 + %s4312_s10]]   ;;  %s4315_s22 = smov 5  }
   0x4   :  { %s4370_s17 = sld [smem:[%s5390_s0 + %s4313_s14]]   ;;  %s4316_s26 = smov 6  }
   0x5   :  { %s4375_s21 = sld [smem:[%s5390_s0 + %s4314_s18]]   ;;  %s4317_s30 = smov 7  }
   0x6   :  { %s4380_s25 = sld [smem:[%s5390_s0 + %s4315_s22]]   ;;  %s4318_s4 = smov 8  }
   0x7   :  { %s4385_s29 = sld [smem:[%s5390_s0 + %s4316_s26]]   ;;  %s4319_s10 = smov 9  }
   0x8   :  { %s4390_s3 = sld [smem:[%s5390_s0 + %s4317_s30]]   ;;  %s4320_s15 = smov 10  }
   0x9   :  { %s4395_s8 = sld [smem:[%s5390_s0 + %s4318_s4]]   ;;  %s4321_s20 = smov 11  }
   0xa   :  { %s4400_s14 = sld [smem:[%s5390_s0 + %s4319_s10]]   ;;  %s4322_s26 = smov 12  }
   0xb   :  { %s4405_s19 = sld [smem:[%s5390_s0 + %s4320_s15]]   ;;  %s4323_s1 = smov 13  }
   0xc   :  { %s4410_s24 = sld [smem:[%s5390_s0 + %s4321_s20]]   ;;  %s4324_s7 = smov 14  }
   0xd   :  { %s4415_s30 = sld [smem:[%s5390_s0 + %s4322_s26]]   ;;  %s4325_s15 = smov 15  }
   0xe   :  { %s4420_s6 = sld [smem:[%s5390_s0 + %s4323_s1]]   ;;  %s4326_s22 = smov 16  }
   0xf   :  { %s4425_s12 = sld [smem:[%s5390_s0 + %s4324_s7]]   ;;  %s4327_s28 = smov 17  }
  0x10   :  { %s4430_s20 = sld [smem:[%s5390_s0 + %s4325_s15]]   ;;  %s4328_s7 = smov 18  }
  0x11   :  { %s4435_s27 = sld [smem:[%s5390_s0 + %s4326_s22]]   ;;  %s4329_s15 = smov 19  }
  0x12   :  { %5402 = sst [smem:[#allocation6_spill]] %s4410_s24  ;;  %s4330_s22 = smov 20  }
  0x13   :  { %5403 = sst [smem:[#allocation7_spill]] %s4415_s30 }
  0x14   :  { %5404 = sst [smem:[#allocation8_spill]] %s4420_s6 }
  0x15   :  { %5405 = sst [smem:[#allocation9_spill]] %s4425_s12 }
  0x16   :  { %5406 = sst [smem:[#allocation10_spill]] %s4430_s20 }
  0x17   :  { %s4440_s4 = sld [smem:[%s5390_s0 + %s4327_s28]]   ;;  %s4331_s28 = smov 21  }
  0x18   :  { %s4445_s6 = sld [smem:[%s5390_s0 + %s4328_s7]]   ;;  %s4332_s7 = smov 22  }
  0x19   :  { %s4450_s24 = sld [smem:[%s5390_s0 + %s4329_s15]]   ;;  %s4333_s15 = smov 23  }
  0x1a   :  { %s4455_s30 = sld [smem:[%s5390_s0 + %s4330_s22]]   ;;  %s4334_s22 = smov 24  }
  0x1b   :  { %s4465_s20 = sld [smem:[%s5390_s0 + %s4332_s7]]   ;;  %s4336_s7 = smov 26  }
  0x1c   :  { %s4475_s12 = sld [smem:[%s5390_s0 + %s4334_s22]]   ;;  %s4338_s22 = smov 28  }
  0x1d   :  { %5407 = sst [smem:[#allocation11_spill]] %s4440_s4 }
  0x1e   :  { %s4460_s4 = sld [smem:[%s5390_s0 + %s4331_s28]]   ;;  %s4335_s28 = smov 25  }
  0x1f   :  { %5408 = sst [smem:[#allocation12_spill]] %s4450_s24 }
  0x20   :  { %s4470_s24 = sld [smem:[%s5390_s0 + %s4333_s15]]   ;;  %s4337_s15 = smov 27  }
  0x21   :  { %5410 = sst [smem:[#allocation14_spill]] %s4465_s20 }
  0x22   :  { %5412 = sst [smem:[#allocation16_spill]] %s4475_s12 }
  0x23   :  { %s4485_s20 = sld [smem:[%s5390_s0 + %s4336_s7]]   ;;  %s4340_s7 = smov 30  }
  0x24   :  { %5409 = sst [smem:[#allocation13_spill]] %s4460_s4 }
  0x25   :  { %s4480_s4 = sld [smem:[%s5390_s0 + %s4335_s28]]   ;;  %s4339_s28 = smov 29  }
  0x26   :  { %5411 = sst [smem:[#allocation15_spill]] %s4470_s24 }
  0x27   :  { %s4490_s24 = sld [smem:[%s5390_s0 + %s4337_s15]]   ;;  %s4341_s15 = smov 31  }
  0x28   :  { %s4495_s12 = sld [smem:[%s5390_s0 + %s4338_s22]]   ;;  %s4342_s22 = smov 32  }
  0x29   :  { %5414 = sst [smem:[#allocation18_spill]] %s4485_s20 }
  0x2a   :  { %s4505_s20 = sld [smem:[%s5390_s0 + %s4340_s7]]  }
  0x2b   :  { %5413 = sst [smem:[#allocation17_spill]] %s4480_s4 }
  0x2c   :  { %s4500_s4 = sld [smem:[%s5390_s0 + %s4339_s28]]  }
  0x2d   :  { %5415 = sst [smem:[#allocation19_spill]] %s4490_s24 }
  0x2e   :  { %5416 = sst [smem:[#allocation20_spill]] %s4495_s12 }
  0x2f   :  { %s4510_s24 = sld [smem:[%s5390_s0 + %s4341_s15]]  }
  0x30   :  { %s4515_s12 = sld [smem:[%s5390_s0 + %s4342_s22]]  }
  0x31   :  { %v185_v0 = vld [vmem:[%s4375_s21 + $0x18] sm:$0xff]  ;;  %v184_v2 = vld [vmem:[%s4375_s21 + $0x10] sm:$0xff]  ;;  %v183_v4 = vld [vmem:[%s4375_s21 + $0x8] sm:$0xff]  ;;  %vm150_vm0 = vcmask 261120  }
  0x32   :  { %v145_v1 = vld [vmem:[%s4365_s13 + $0x18] sm:$0xff]  ;;  %202 = vmatpush.msra.mxu1 %v185_v0  ;;  %v144_v3 = vld [vmem:[%s4365_s13 + $0x10] sm:$0xff]  ;;  %v143_v5 = vld [vmem:[%s4365_s13 + $0x8] sm:$0xff] }
  0x33   :  { %169 = vmatpush.msra.mxu0 %v145_v1  ;;  %v182_v6 = vld [vmem:[%s4375_s21] sm:$0xff] }
  0x34   :  { %v142_v7 = vld [vmem:[%s4365_s13] sm:$0xff]  ;;  %203 = vmatpush.msra.mxu1 %v184_v2 }
  0x35   :  { %170 = vmatpush.msra.mxu0 %v144_v3  ;;  %v4526_v8 = vld [vmem:[%s4355_s5] sm:$0xff] }
  0x36   :  { %204 = vmatpush.msra.mxu1 %v183_v4 }
  0x37   :  { %171 = vmatpush.msra.mxu0 %v143_v5 }
  0x38   :  { %205 = vmatpush.msra.mxu1 %v182_v6 }
  0x39   :  { %172 = vmatpush.msra.mxu0 %v142_v7  ;;  %3759 = vmatmul.msk.f32.vlgmr.msra.gmra.mxu1 %vm150_vm0, %v4526_v8 }
  0x3a   :  { %3757 = vmatmul.msk.f32.vlgmr.msra.gmra.mxu0 %vm150_vm0, %v4526_v8 }
  0x3b   :  { %70 = vsyncpa [#allocation4], 0  ;;  %v4533_v9 = vld [vmem:[%s4370_s17] ss:$0 sm:$0xff]  ;;  %vm244_vm1 = vcmask 64512   ;;  %v216_v16 = vld [vmem:[%s4385_s29 + $0x18] sm:$0xff] }
  0x3c   :  { %v4116_v10 = vld [vmem:[%s4380_s25] ss:$0 sm:$0xff]  ;;  %v215_v17 = vld [vmem:[%s4385_s29 + $0x10] sm:$0xff]  ;;  %233 = vmatpush.msra.mxu2 %v216_v16  ;;  %v214_v18 = vld [vmem:[%s4385_s29 + $0x8] sm:$0xff]  ;;  %s5417_s0 = sld [smem:[#allocation9_spill]]  ;;  %vm1287_vm9 = vcmask 130048  }
  0x3d   :  { %v213_v21 = vld [vmem:[%s4385_s29] sm:$0xff]  ;;  %v4547_v22 = vld [vmem:[%s4355_s5 + $0x8] sm:$0xff]  ;;  %v3779_v23 = vld [vmem:[%s4375_s21 + $0x38] sm:$0xff]  ;;  %s5418_s5 = sld [smem:[#allocation10_spill]]  ;;  %s3713_s28 = sshll.u32 %s4515_s12, 4  ;;  %s3714_s28 = int_to_ptr.hbm [resolvable:$true] %s3713_s28 }
  0x3e   :  { %234 = vmatpush.msra.mxu2 %v215_v17  ;;  %v3772_v24 = vld [vmem:[%s4365_s13 + $0x38] sm:$0xff]  ;;  %v3778_v25 = vld [vmem:[%s4375_s21 + $0x30] sm:$0xff]  ;;  %v3770_v27 = vld [vmem:[%s4365_s13 + $0x28] sm:$0xff]  ;;  %s4297_s1 = sshra.s32 %s3714_s28, 4  ;;  %s4298_s1 = int_to_ptr.hbm [resolvable:$true] %s4297_s1 }
  0x3f   :  { %392 = vmatpush.msrb.mxu1 %v3772_v24  ;;  %v3771_v26 = vld [vmem:[%s4365_s13 + $0x30] sm:$0xff]  ;;  %v3777_v28 = vld [vmem:[%s4375_s21 + $0x28] sm:$0xff]  ;;  %v3769_v29 = vld [vmem:[%s4365_s13 + $0x20] sm:$0xff]  ;;  %s4299_s2 = scalar_lea.hbm %s4298_s1, 16  ;;  %p4302_p1 = scmp.lt.s32.totalorder %s4298_s1, %s4515_s12 }
  0x40   :  { %235 = vmatpush.msra.mxu2 %v214_v18  ;;  %v3776_v30 = vld [vmem:[%s4375_s21 + $0x20] sm:$0xff]  ;;  %v3786_v0 = vld [vmem:[%s4385_s29 + $0x38] sm:$0xff]  ;;  %v3785_v1 = vld [vmem:[%s4385_s29 + $0x30] sm:$0xff]  ;;  %p4300_p0 = scmp.ne.s32.totalorder %s4298_s1, %s4299_s2 }
  0x41   :  { %3760 = vmatmul.msk.f32.gmra.mxu1 %vm150_vm0, %v4547_v22  ;;  %v4117_v36 = vld [vmem:[%s4390_s3] ss:$0 sm:$0xff]  ;;  %v4577_v44 = vld [vmem:[%s4370_s17 + $0x1] ss:$0 sm:$0xff]  ;;  %v3784_v2 = vld [vmem:[%s4385_s29 + $0x28] sm:$0xff] }
  0x42   :  { %236 = vmatpush.msra.mxu2 %v213_v21  ;;  %3758 = vmatmul.msk.f32.gmra.mxu0 %vm150_vm0, %v4547_v22  ;;  %v4118_v46 = vld [vmem:[%s4380_s25 + $0x1] ss:$0 sm:$0xff] }
  0x43   :  { %3761 = vmatmul.msk.f32.vlgmr.msra.gmra.mxu2 %vm150_vm0, %v4526_v8  ;;  %393 = vmatpush.msrb.mxu1 %v3771_v26  ;;  %v3783_v3 = vld [vmem:[%s4385_s29 + $0x20] sm:$0xff] }
  0x44   :  { %427 = vmatpush.msrb.mxu2 %v3779_v23  ;;  %v4120_v17 = vld [vmem:[%s4390_s3 + $0x1] ss:$0 sm:$0xff] }
  0x45   :  { %394 = vmatpush.msrb.mxu1 %v3770_v27 }
  0x46   :  { %428 = vmatpush.msrb.mxu2 %v3778_v25 }
  0x47   :  { %395 = vmatpush.msrb.mxu1 %v3769_v29  ;;  %v3811_v29 = vld [vmem:[%s4375_s21 + $0x58] sm:$0xff] }
  0x48   :  { %429 = vmatpush.msrb.mxu2 %v3777_v28 }
  0x49   :  { %3774 = vmatmul.msk.f32.vlgmr.msrb.gmra.mxu1 %vm150_vm0, %v4526_v8 }
  0x4a   :  { %430 = vmatpush.msrb.mxu2 %v3776_v30  ;;  %v3810_v30 = vld [vmem:[%s4375_s21 + $0x50] sm:$0xff] }
  0x4b   :  { %3762 = vmatmul.msk.f32.gmra.mxu2 %vm150_vm0, %v4547_v22 }
  0x51   :  { %3775 = vmatmul.msk.f32.gmra.mxu1 %vm150_vm0, %v4547_v22 }
  0x53   :  { %3781 = vmatmul.msk.f32.vlgmr.msrb.gmra.mxu2 %vm150_vm0, %v4526_v8 }
  0x5b   :  { %3782 = vmatmul.msk.f32.gmra.mxu2 %vm150_vm0, %v4547_v22 }
  0xb6   :  { %v207_v11 = vpop.f32.mrf.mxu1 }
  0xb7   :  { %v174_v12 = vpop.f32.mrf.mxu0  ;;  %v208_v14 = vadd.f32 %v4116_v10, %v207_v11 }
  0xb8   :  { %v175_v13 = vadd.f32 %v4533_v9, %v174_v12 }
  0xb9   :  { %3763 = vmatpush.xpose.msk.msra.mxu3 %vm244_vm1, %v208_v14 }
  0xba   :  { %v180_v15 = vmul.f32 0.35355338, %v175_v13 }
  0xbc   :  { %3764 = vmatmul.msk.f32.vlgmr.msra.gmra.mxu3 %vm244_vm1, %v180_v15 }
  0xbe   :  { %v210_v39 = vpop.f32.mrf.mxu1 }
  0xbf   :  { %v211_v40 = vadd.f32 %v4116_v10, %v210_v39  ;;  %v177_v53 = vpop.f32.mrf.mxu0 }
  0xc0   :  { %v178_v55 = vadd.f32 %v4533_v9, %v177_v53 }
  0xc2   :  { %v181_v56 = vmul.f32 0.35355338, %v178_v55 }
  0xc6   :  { %v238_v37 = vpop.f32.mrf.mxu2  ;;  %v4574_v42 = vpop.f32.mrf.mxu1 }
  0xc7   :  { %v239_v38 = vadd.f32 %v4117_v36, %v238_v37  ;;  %v398_v27 = vadd.f32 %v4577_v44, %v4574_v42 }
  0xc9   :  { %300 = vmatpush.msrb.mxu3 %v239_v38  ;;  %v403_v28 = vmul.f32 0.35355338, %v398_v27  ;;  %v3838_v27 = vld [vmem:[%s4375_s21 + $0x60] sm:$0xff] }
  0xcb   :  { %3766 = vmatpush.xpose.msk.msra.mxu3 %vm244_vm1, %v211_v40 }
  0xce   :  { %v241_v41 = vpop.f32.mrf.mxu2  ;;  %v400_v45 = vpop.f32.mrf.mxu1 }
  0xcf   :  { %v401_v48 = vadd.f32 %v4577_v44, %v400_v45  ;;  %v242_v58 = vadd.f32 %v4117_v36, %v241_v41  ;;  %v3801_v36 = vld [vmem:[%s4365_s13 + $0x40] sm:$0xff] }
  0xd0   :  { %v4122_v44 = vld [vmem:[%s4370_s17 + $0x2] ss:$0 sm:$0xff] }
  0xd1   :  { %v404_v51 = vmul.f32 0.35355338, %v401_v48  ;;  %361 = vmatpush.msrb.mxu0 %v242_v58  ;;  %v4121_v45 = vld [vmem:[%s4380_s25 + $0x2] ss:$0 sm:$0xff] }
  0xd6   :  { %v432_v43 = vpop.f32.mrf.mxu2 }
  0xd7   :  { %v433_v57 = vadd.f32 %v4118_v46, %v432_v43 }
  0xd9   :  { %3790 = vmatpush.xpose.msk.msra.mxu0 %vm244_vm1, %v433_v57 }
  0xde   :  { %v435_v49 = vpop.f32.mrf.mxu2 }
  0xdf   :  { %v436_v50 = vadd.f32 %v4118_v46, %v435_v49 }
  0xe1   :  { %3793 = vmatpush.xpose.msk.msra.mxu1 %vm244_vm1, %v436_v50 }
  0xe4   :  { %3794 = vmatmul.msk.f32.vlgmr.msra.gmra.mxu1 %vm244_vm1, %v404_v51 }
 0x13f   :  { %v268_v19 = vpop.f32.mrf.mxu3 }
 0x140   :  { %v271_v20 = vsel %vm244_vm1, %v268_v19, -inf }
 0x141   :  { %272 = vmax.xlane.f32.xlu0 %v271_v20 }
 0x161   :  { %v555_v59 = vpop.f32.mrf.mxu1 }
 0x162   :  { %v558_v60 = vsel %vm244_vm1, %v555_v59, -inf }
 0x163   :  { %559 = vmax.xlane.f32.xlu2 %v558_v60 }
 0x1b4   :  { %v273_v31 = vpop.xlane.xlu0 %272 }
 0x1b5   :  { %v274_v32 = vsub.f32 %v268_v19, %v273_v31  ;;  %v3809_v31 = vld [vmem:[%s4375_s21 + $0x48] sm:$0xff] }
 0x1b7   :  { %v275_v33 = vmul.f32 1.442695, %v274_v32  ;;  %v3804_v32 = vld [vmem:[%s4365_s13 + $0x58] sm:$0xff] }
 0x1b8   :  { %677 = vmatpush.msrb.mxu1 %v3804_v32 }
 0x1b9   :  { %4165 = vpow2.f32 %v275_v33  ;;  %v3803_v33 = vld [vmem:[%s4365_s13 + $0x50] sm:$0xff] }
 0x1ba   :  { %678 = vmatpush.msrb.mxu1 %v3803_v33 }
 0x1bf   :  { %v4166_v34 = vpop.eup %4165 }
 0x1c0   :  { %v277_v35 = vsel %vm244_vm1, %v4166_v34, 0.0 }
 0x1c1   :  { %278 = vadd.xlane.f32.xlu0 %v277_v35  ;;  %v3802_v35 = vld [vmem:[%s4365_s13 + $0x48] sm:$0xff] }
 0x1c2   :  { %679 = vmatpush.msrb.mxu1 %v3802_v35 }
 0x1c4   :  { %680 = vmatpush.msrb.mxu1 %v3801_v36 }
 0x1c5   :  { %3806 = vmatmul.msk.f32.vlgmr.msrb.gmra.mxu1 %vm150_vm0, %v4526_v8 }
 0x1cd   :  { %3807 = vmatmul.msk.f32.gmra.mxu1 %vm150_vm0, %v4547_v22 }
 0x1d6   :  { %v560_v4 = vpop.xlane.xlu2 %559 }
 0x1d7   :  { %v561_v5 = vsub.f32 %v555_v59, %v560_v4  ;;  %v3817_v4 = vld [vmem:[%s4385_s29 + $0x50] sm:$0xff] }
 0x1d9   :  { %v562_v6 = vmul.f32 1.442695, %v561_v5  ;;  %v3816_v5 = vld [vmem:[%s4385_s29 + $0x48] sm:$0xff] }
 0x234   :  { %v279_v47 = vpop.xlane.xlu0 %278 }
 0x235   :  { %4167 = vrcp.f32 %v279_v47 }
 0x236   :  { %4169 = vpow2.f32 %v562_v6  ;;  %v3815_v6 = vld [vmem:[%s4385_s29 + $0x40] sm:$0xff] }
 0x23b   :  { %v4168_v52 = vpop.eup %4167 }
 0x23c   :  { %v281_v54 = vmul.f32 %v4168_v52, %v4166_v34  ;;  %v4170_v7 = vpop.eup %4169  ;;  %v3808_v34 = vld [vmem:[%s4375_s21 + $0x40] sm:$0xff] }
 0x23d   :  { %v564_v9 = vsel %vm244_vm1, %v4170_v7, 0.0 }
 0x23e   :  { %3765 = vmatmul.msk.f32.vlgmr.msrb.gmra.mxu3 %vm244_vm1, %v281_v54  ;;  %565 = vadd.xlane.f32.xlu2 %v564_v9 }
 0x23f   :  { %460 = vmatpush.msrb.mxu3 %v3786_v0 }
 0x241   :  { %461 = vmatpush.msrb.mxu3 %v3785_v1 }
 0x242   :  { %v682_v42 = vpop.f32.mrf.mxu1 }
 0x243   :  { %462 = vmatpush.msrb.mxu3 %v3784_v2  ;;  %v683_v0 = vadd.f32 %v4122_v44, %v682_v42  ;;  %v3796_v2 = vld [vmem:[%s4395_s8 + $0x8] sm:$0xff] }
 0x245   :  { %463 = vmatpush.msrb.mxu3 %v3783_v3  ;;  %v688_v1 = vmul.f32 0.35355338, %v683_v0  ;;  %v3818_v3 = vld [vmem:[%s4385_s29 + $0x58] sm:$0xff] }
 0x246   :  { %3767 = vmatmul.msk.f32.vlgmr.msra.gmra.mxu3 %vm244_vm1, %v181_v56  ;;  %v369_v56 = vld [vmem:[%s4395_s8] sm:$0xff] }
 0x247   :  { %618 = vmatpush.msra.mxu3 %v3796_v2  ;;  %v3848_v2 = vld [vmem:[%s4385_s29 + $0x78] sm:$0xff] }
 0x24a   :  { %v685_v46 = vpop.f32.mrf.mxu1 }
 0x24b   :  { %v686_v47 = vadd.f32 %v4122_v44, %v685_v46  ;;  %v4124_v46 = vld [vmem:[%s4380_s25 + $0x3] ss:$0 sm:$0xff]  ;;  %s5423_s25 = sld [smem:[#allocation13_spill]] }
 0x24d   :  { %v689_v51 = vmul.f32 0.35355338, %v686_v47  ;;  %v4125_v47 = vld [vmem:[%s4370_s17 + $0x3] ss:$0 sm:$0xff]  ;;  %s5421_s17 = sld [smem:[#allocation6_spill]] }
 0x24e   :  { %3788 = vmatmul.msk.f32.vlgmr.msrb.gmra.mxu3 %vm150_vm0, %v4526_v8 }
 0x24f   :  { %745 = vmatpush.msrb.mxu3 %v3818_v3  ;;  %v3847_v3 = vld [vmem:[%s4385_s29 + $0x70] sm:$0xff] }
 0x251   :  { %746 = vmatpush.msrb.mxu3 %v3817_v4  ;;  %v3846_v4 = vld [vmem:[%s4385_s29 + $0x68] sm:$0xff] }
 0x253   :  { %747 = vmatpush.msrb.mxu3 %v3816_v5  ;;  %v3845_v5 = vld [vmem:[%s4385_s29 + $0x60] sm:$0xff]  ;;  %s5426_s29 = sld [smem:[#allocation14_spill]] }
 0x255   :  { %748 = vmatpush.msrb.mxu3 %v3815_v6 }
 0x256   :  { %3789 = vmatmul.msk.f32.gmra.mxu3 %vm150_vm0, %v4547_v22 }
 0x2b1   :  { %v566_v16 = vpop.xlane.xlu2 %565 }
 0x2c1   :  { %v302_v61 = vpop.f32.mrf.mxu3 }
 0x2c2   :  { %305 = vst.msk [vmem:[#allocation2] sm:$0xff] %vm244_vm1, %v302_v61 }
 0x2c9   :  { %v329_v62 = vpop.f32.mrf.mxu3 }
 0x2ca   :  { %v332_v63 = vsel %vm244_vm1, %v329_v62, -inf }
 0x2cb   :  { %333 = vmax.xlane.f32.xlu1 %v332_v63  ;;  %v367_v63 = vld [vmem:[#allocation2] sm:$0xff] }
 0x2d1   :  { %v465_v15 = vpop.f32.mrf.mxu3 }
 0x2d2   :  { %v466_v25 = vadd.f32 %v4120_v17, %v465_v15 }
 0x2d9   :  { %v468_v20 = vpop.f32.mrf.mxu3 }
 0x2da   :  { %v469_v21 = vadd.f32 %v4120_v17, %v468_v20  ;;  %v3841_v20 = vld [vmem:[%s4375_s21 + $0x78] sm:$0xff] }
 0x2dc   :  { %587 = vmatpush.msra.mxu2 %v469_v21  ;;  %v3834_v21 = vld [vmem:[%s4365_s13 + $0x78] sm:$0xff] }
 0x2de   :  { %712 = vmatpush.msrb.mxu2 %v3811_v29 }
 0x2e0   :  { %713 = vmatpush.msrb.mxu2 %v3810_v30 }
 0x2e2   :  { %714 = vmatpush.msrb.mxu2 %v3809_v31 }
 0x2e4   :  { %715 = vmatpush.msrb.mxu2 %v3808_v34 }
 0x33e   :  { %v334_v10 = vpop.xlane.xlu1 %333 }
 0x33f   :  { %v335_v11 = vsub.f32 %v329_v62, %v334_v10 }
 0x341   :  { %v336_v12 = vmul.f32 1.442695, %v335_v11 }
 0x343   :  { %4171 = vpow2.f32 %v336_v12 }
 0x344   :  { %4173 = vrcp.f32 %v566_v16 }
 0x349   :  { %v4172_v13 = vpop.eup %4171 }
 0x34a   :  { %v338_v14 = vsel %vm244_vm1, %v4172_v13, 0.0  ;;  %v4174_v18 = vpop.eup %4173 }
 0x34b   :  { %339 = vadd.xlane.f32.xlu1 %v338_v14  ;;  %v568_v19 = vmul.f32 %v4174_v18, %v4170_v7 }
 0x34d   :  { %3795 = vmatmul.msk.f32.vlgmr.msra.gmra.mxu2 %vm244_vm1, %v568_v19 }
 0x355   :  { %3813 = vmatmul.msk.f32.vlgmr.msrb.gmra.mxu2 %vm150_vm0, %v4526_v8 }
 0x35d   :  { %3814 = vmatmul.msk.f32.gmra.mxu2 %vm150_vm0, %v4547_v22 }
 0x3be   :  { %v340_v23 = vpop.xlane.xlu1 %339 }
 0x3bf   :  { %4175 = vrcp.f32 %v340_v23  ;;  %v3840_v23 = vld [vmem:[%s4375_s21 + $0x70] sm:$0xff] }
 0x3c5   :  { %v4176_v24 = vpop.eup %4175 }
 0x3c6   :  { %v342_v26 = vmul.f32 %v4176_v24, %v4172_v13  ;;  %v3833_v24 = vld [vmem:[%s4365_s13 + $0x70] sm:$0xff] }
 0x3c8   :  { %3768 = vmatmul.msk.f32.vlgmr.msrb.gmra.mxu0 %vm244_vm1, %v342_v26  ;;  %v3832_v26 = vld [vmem:[%s4365_s13 + $0x68] sm:$0xff] }
 0x3c9   :  { %526 = vmatpush.msrb.mxu0 %v466_v25  ;;  %v3839_v25 = vld [vmem:[%s4375_s21 + $0x68] sm:$0xff]  ;;  %s5422_s21 = sld [smem:[#allocation11_spill]] }
 0x3d0   :  { %3791 = vmatmul.msk.f32.vlgmr.msra.gmra.mxu0 %vm244_vm1, %v403_v28  ;;  %v589_v38 = vpop.f32.mrf.mxu2  ;;  %v3831_v28 = vld [vmem:[%s4365_s13 + $0x60] sm:$0xff]  ;;  %s5420_s13 = sld [smem:[#allocation12_spill]] }
 0x3d1   :  { %647 = vmatpush.msra.mxu0 %v369_v56 }
 0x3d8   :  { %v717_v43 = vpop.f32.mrf.mxu2 }
 0x3d9   :  { %v718_v59 = vadd.f32 %v4121_v45, %v717_v43 }
 0x3e0   :  { %v720_v48 = vpop.f32.mrf.mxu2 }
 0x3e1   :  { %v721_v49 = vadd.f32 %v4121_v45, %v720_v48 }
 0x3e3   :  { %3825 = vmatpush.xpose.msk.msra.mxu2 %vm244_vm1, %v721_v49 }
 0x3e6   :  { %3826 = vmatmul.msk.f32.vlgmr.msra.gmra.mxu2 %vm244_vm1, %v689_v51 }
 0x3e7   :  { %935 = vmatpush.msrb.mxu2 %v3834_v21 }
 0x3e9   :  { %936 = vmatpush.msrb.mxu2 %v3833_v24 }
 0x3eb   :  { %937 = vmatpush.msrb.mxu2 %v3832_v26 }
 0x3ed   :  { %938 = vmatpush.msrb.mxu2 %v3831_v28 }
 0x3ee   :  { %3836 = vmatmul.msk.f32.vlgmr.msrb.gmra.mxu2 %vm150_vm0, %v4526_v8 }
 0x3f6   :  { %3837 = vmatmul.msk.f32.gmra.mxu2 %vm150_vm0, %v4547_v22 }
 0x445   :  { %v363_v37 = vpop.f32.mrf.mxu0 }
 0x446   :  { %366 = vst.msk [vmem:[#allocation2 + $0x8] sm:$0xff] %vm244_vm1, %v363_v37  ;;  %v4123_v37 = vld [vmem:[%s4390_s3 + $0x2] ss:$0 sm:$0xff] }
 0x44d   :  { %v494_v39 = vpop.f32.mrf.mxu0  ;;  %v368_v40 = vld [vmem:[#allocation2 + $0x8] sm:$0xff] }
 0x44e   :  { %v497_v41 = vsel %vm244_vm1, %v494_v39, -inf  ;;  %592 = vst.msk [vmem:[#allocation2 + $0x8] sm:$0xff] %vm244_vm1, %v589_v38 }
 0x44f   :  { %498 = vmax.xlane.f32.xlu0 %v497_v41 }
 0x455   :  { %v594_v14 = vld [vmem:[#allocation2 + $0x8] sm:$0xff] }
 0x469   :  { %v840_v60 = vpop.f32.mrf.mxu2 }
 0x46a   :  { %v843_v62 = vsel %vm244_vm1, %v840_v60, -inf }
 0x46b   :  { %844 = vmax.xlane.f32.xlu0 %v843_v62 }
 0x471   :  { %v940_v45 = vpop.f32.mrf.mxu2 }
 0x472   :  { %v941_v0 = vadd.f32 %v4125_v47, %v940_v45 }
 0x4c2   :  { %v499_v50 = vpop.xlane.xlu0 %498 }
 0x4c3   :  { %v500_v52 = vsub.f32 %v494_v39, %v499_v50  ;;  %v943_v50 = vpop.f32.mrf.mxu2 }
 0x4c4   :  { %v944_v51 = vadd.f32 %v4125_v47, %v943_v50 }
 0x4c5   :  { %v501_v53 = vmul.f32 1.442695, %v500_v52 }
 0x4c7   :  { %4177 = vpow2.f32 %v501_v53  ;;  %v947_v53 = vmul.f32 0.35355338, %v944_v51 }
 0x4cd   :  { %v4178_v54 = vpop.eup %4177 }
 0x4ce   :  { %v503_v55 = vsel %vm244_vm1, %v4178_v54, 0.0 }
 0x4cf   :  { %504 = vadd.xlane.f32.xlu1 %v503_v55 }
 0x4de   :  { %v845_v11 = vpop.xlane.xlu0 %844 }
 0x4df   :  { %v846_v12 = vsub.f32 %v840_v60, %v845_v11 }
 0x4e1   :  { %v847_v15 = vmul.f32 1.442695, %v846_v12 }
 0x542   :  { %v505_v57 = vpop.xlane.xlu1 %504 }
 0x543   :  { %4179 = vrcp.f32 %v505_v57 }
 0x544   :  { %4181 = vpow2.f32 %v847_v15 }
 0x549   :  { %v4180_v58 = vpop.eup %4179 }
 0x54a   :  { %v507_v61 = vmul.f32 %v4180_v58, %v4178_v54  ;;  %v4182_v18 = vpop.eup %4181  ;;  %v3828_v58 = vld [vmem:[%s4395_s8 + $0x10] sm:$0xff] }
 0x54b   :  { %v849_v19 = vsel %vm244_vm1, %v4182_v18, 0.0 }
 0x54c   :  { %3792 = vmatmul.msk.f32.vlgmr.msrb.gmra.mxu0 %vm244_vm1, %v507_v61 }
 0x54d   :  { %3822 = vmatpush.xpose.msk.msrb.mxu0 %vm244_vm1, %v718_v59 }
 0x554   :  { %3799 = vmatmul.msk.f32.vlgmr.msra.gmra.mxu0 %vm244_vm1, %v367_v63 }
 0x55c   :  { %3800 = vmatmul.msk.f32.gmra.mxu0 %vm244_vm1, %v368_v40 }
 0x564   :  { %3823 = vmatmul.msk.f32.vlgmr.msrb.gmra.mxu0 %vm244_vm1, %v688_v1  ;;  %v946_v1 = vmul.f32 0.35355338, %v941_v0 }
 0x5c9   :  { %v528_v7 = vpop.f32.mrf.mxu0 }
 0x5ca   :  { %531 = vst.msk [vmem:[#allocation2] sm:$0xff] %vm244_vm1, %v528_v7 }
 0x5d1   :  { %v4643_v9 = vpop.f32.mrf.mxu0  ;;  %v593_v10 = vld [vmem:[#allocation2] sm:$0xff] }
 0x5d2   :  { %3797 = vmatmul.msk.f32.vlgmr.msra.gmra.mxu3 %vm244_vm1, %v593_v10 }
 0x5d3   :  { %970 = vmatpush.msra.mxu3 %v3841_v20 }
 0x5d5   :  { %971 = vmatpush.msra.mxu3 %v3840_v23 }
 0x5d7   :  { %972 = vmatpush.msra.mxu3 %v3839_v25 }
 0x5d9   :  { %v4646_v13 = vpop.f32.mrf.mxu0  ;;  %973 = vmatpush.msra.mxu3 %v3838_v27 }
 0x5da   :  { %3798 = vmatmul.msk.f32.gmra.mxu3 %vm244_vm1, %v594_v14 }
 0x5e1   :  { %v779_v16 = vpop.f32.mrf.mxu0 }
 0x5e2   :  { %3820 = vmatmul.msk.f32.vlgmr.msrb.gmra.mxu3 %vm150_vm0, %v4526_v8  ;;  %v782_v17 = vsel %vm244_vm1, %v779_v16, -inf }
 0x5e3   :  { %783 = vmax.xlane.f32.xlu2 %v782_v17 }
 0x5ea   :  { %3821 = vmatmul.msk.f32.gmra.mxu3 %vm150_vm0, %v4547_v22 }
 0x5eb   :  { %850 = vadd.xlane.f32.xlu2 %v849_v19 }
 0x5f2   :  { %3843 = vmatmul.msk.f32.vlgmr.msra.gmra.mxu3 %vm150_vm0, %v4526_v8 }
 0x5fa   :  { %3844 = vmatmul.msk.f32.gmra.mxu3 %vm150_vm0, %v4547_v22 }
 0x655   :  { %v4671_v29 = vpop.f32.mrf.mxu3 }
 0x656   :  { %v784_v30 = vpop.xlane.xlu2 %783 }
 0x657   :  { %v785_v31 = vsub.f32 %v779_v16, %v784_v30 }
 0x659   :  { %v786_v32 = vmul.f32 1.442695, %v785_v31 }
 0x65b   :  { %4183 = vpow2.f32 %v786_v32 }
 0x65d   :  { %v4673_v33 = vpop.f32.mrf.mxu3 }
 0x65e   :  { %v851_v36 = vpop.xlane.xlu2 %850 }
 0x65f   :  { %4185 = vrcp.f32 %v851_v36 }
 0x661   :  { %v4184_v34 = vpop.eup %4183 }
 0x662   :  { %v788_v35 = vsel %vm244_vm1, %v4184_v34, 0.0 }
 0x663   :  { %789 = vadd.xlane.f32.xlu1 %v788_v35 }
 0x665   :  { %v750_v38 = vpop.f32.mrf.mxu3  ;;  %v4186_v40 = vpop.eup %4185 }
 0x666   :  { %v751_v39 = vadd.f32 %v4123_v37, %v750_v38  ;;  %v853_v43 = vmul.f32 %v4186_v40, %v4182_v18  ;;  %v4126_v18 = vld [vmem:[%s4390_s3 + $0x3] ss:$0 sm:$0xff]  ;;  %v3858_v38 = vld [vmem:[%s4395_s8 + $0x18] sm:$0xff]  ;;  %s5427_s3 = sld [smem:[#allocation8_spill]] }
 0x667   :  { %s5428_s8 = sld [smem:[#allocation15_spill]] }
 0x668   :  { %811 = vmatpush.msra.mxu1 %v751_v39 }
 0x66a   :  { %903 = vmatpush.msrb.mxu1 %v3828_v58 }
 0x66d   :  { %v753_v41 = vpop.f32.mrf.mxu3 }
 0x66e   :  { %v754_v42 = vadd.f32 %v4123_v37, %v753_v41 }
 0x670   :  { %872 = vmatpush.msra.mxu0 %v754_v42  ;;  %v650_v42 = vadd.f32 %v4643_v9, %v4671_v29  ;;  %v4343_v29 = vmov 32.0  }
 0x671   :  { %3827 = vmatmul.msk.f32.vlgmr.msra.gmra.mxu0 %vm244_vm1, %v853_v43 }
 0x672   :  { %1003 = vmatpush.msrb.mxu0 %v3848_v2 }
 0x674   :  { %1004 = vmatpush.msrb.mxu0 %v3847_v3 }
 0x675   :  { %v975_v44 = vpop.f32.mrf.mxu3 }
 0x676   :  { %v976_v57 = vadd.f32 %v4124_v46, %v975_v44  ;;  %1005 = vmatpush.msrb.mxu0 %v3846_v4  ;;  %v4127_v44 = vld [vmem:[%s4400_s14] ss:$0 sm:$0xff]  ;;  %v1245_v4 = vld [vmem:[%s4405_s19 + $0x18] sm:$0xff]  ;;  %s5429_s14 = sld [smem:[#allocation20_spill]] }
 0x678   :  { %1006 = vmatpush.msrb.mxu0 %v3845_v5  ;;  %v1244_v5 = vld [vmem:[%s4405_s19 + $0x10] sm:$0xff] }
 0x679   :  { %3850 = vmatmul.msk.f32.vlgmr.msrb.gmra.mxu0 %vm150_vm0, %v4526_v8 }
 0x67d   :  { %v978_v48 = vpop.f32.mrf.mxu3 }
 0x67e   :  { %v979_v49 = vadd.f32 %v4124_v46, %v978_v48  ;;  %v653_v48 = vadd.f32 %v4646_v13, %v4673_v33 }
 0x680   :  { %3855 = vmatpush.xpose.msk.msrb.mxu3 %vm244_vm1, %v979_v49 }
 0x681   :  { %3851 = vmatmul.msk.f32.gmra.mxu0 %vm150_vm0, %v4547_v22 }
 0x683   :  { %3856 = vmatmul.msk.f32.vlgmr.msrb.gmra.mxu3 %vm244_vm1, %v947_v53 }
 0x6d6   :  { %v790_v52 = vpop.xlane.xlu1 %789 }
 0x6d7   :  { %4187 = vrcp.f32 %v790_v52 }
 0x6dd   :  { %v4188_v54 = vpop.eup %4187 }
 0x6de   :  { %v792_v55 = vmul.f32 %v4188_v54, %v4184_v34 }
 0x6e0   :  { %3824 = vmatmul.msk.f32.vlgmr.msra.gmra.mxu1 %vm244_vm1, %v792_v55 }
 0x6e1   :  { %3852 = vmatpush.xpose.msk.msra.mxu1 %vm244_vm1, %v976_v57 }
 0x6ee   :  { %v874_v56 = vpop.f32.mrf.mxu0 }
 0x6ef   :  { %877 = vst.msk [vmem:[#allocation2 + $0x8] sm:$0xff] %vm244_vm1, %v874_v56 }
 0x6f6   :  { %v879_v63 = vld [vmem:[#allocation2 + $0x8] sm:$0xff]  ;;  %v1008_v19 = vpop.f32.mrf.mxu0 }
 0x6f7   :  { %v1009_v20 = vadd.f32 %v4126_v18, %v1008_v19  ;;  %v4756_v19 = vld [vmem:[%s4435_s27 + $0x8] sm:$0xff] }
 0x6f9   :  { %1069 = vmatpush.msra.mxu2 %v1009_v20  ;;  %v4759_v20 = vld [vmem:[%s4455_s30 + $0x18] sm:$0xff] }
 0x6fb   :  { %1268 = vmatpush.msrb.mxu2 %v1245_v4  ;;  %v4135_v4 = vld [vmem:[%s5422_s21 + $0x1] ss:$0 sm:$0xff] }
 0x6fd   :  { %1269 = vmatpush.msrb.mxu2 %v1244_v5 }
 0x6fe   :  { %v1011_v21 = vpop.f32.mrf.mxu0 }
 0x6ff   :  { %v1012_v23 = vadd.f32 %v4126_v18, %v1011_v21  ;;  %v4753_v18 = vld [vmem:[%s4445_s6 + $0x8] sm:$0xff] }
 0x701   :  { %1130 = vmatpush.msra.mxu0 %v1012_v23  ;;  %v4764_v23 = vld [vmem:[%s4455_s30 + $0x10] sm:$0xff] }
 0x706   :  { %v1098_v59 = vpop.f32.mrf.mxu3 }
 0x707   :  { %v1101_v60 = vsel %vm244_vm1, %v1098_v59, -inf }
 0x708   :  { %1102 = vmax.xlane.f32.xlu1 %v1101_v60 }
 0x75d   :  { %v813_v61 = vpop.f32.mrf.mxu1 }
 0x75e   :  { %816 = vst.msk [vmem:[#allocation2] sm:$0xff] %vm244_vm1, %v813_v61 }
 0x765   :  { %v878_v62 = vld [vmem:[#allocation2] sm:$0xff] }
 0x766   :  { %3829 = vmatmul.msk.f32.vlgmr.msrb.gmra.mxu1 %vm244_vm1, %v878_v62 }
 0x767   :  { %1161 = vmatpush.msrb.mxu1 %v3858_v38  ;;  %v4795_v38 = vld [vmem:[%s4360_s9 + $0x8] sm:$0xff] }
 0x76e   :  { %3830 = vmatmul.msk.f32.gmra.mxu1 %vm244_vm1, %v879_v63 }
 0x776   :  { %3853 = vmatmul.msk.f32.vlgmr.msra.gmra.mxu1 %vm244_vm1, %v946_v1 }
 0x77b   :  { %v1103_v7 = vpop.xlane.xlu1 %1102 }
 0x77c   :  { %v1104_v10 = vsub.f32 %v1098_v59, %v1103_v7  ;;  %v1242_v7 = vld [vmem:[%s4405_s19] sm:$0xff] }
 0x77e   :  { %v1105_v12 = vmul.f32 1.442695, %v1104_v10 }
 0x780   :  { %4189 = vpow2.f32 %v1105_v12 }
 0x786   :  { %v4190_v16 = vpop.eup %4189 }
 0x787   :  { %v1107_v17 = vsel %vm244_vm1, %v4190_v16, 0.0 }
 0x7e3   :  { %v905_v6 = vpop.f32.mrf.mxu1 }
 0x7e4   :  { %v911_v43 = vadd.f32 %v905_v6, %v650_v42  ;;  %v1243_v6 = vld [vmem:[%s4405_s19 + $0x8] sm:$0xff]  ;;  %v4798_v42 = vld [vmem:[%s5417_s0] ss:$0 sm:$0xff]  ;;  %s5430_s19 = sld [smem:[#allocation16_spill]] }
 0x7e5   :  { %1270 = vmatpush.msrb.mxu2 %v1243_v6 }
 0x7e7   :  { %1271 = vmatpush.msrb.mxu2 %v1242_v7 }
 0x7eb   :  { %v908_v11 = vpop.f32.mrf.mxu1 }
 0x7ec   :  { %v912_v50 = vadd.f32 %v908_v11, %v653_v48 }
 0x7f3   :  { %v1037_v14 = vpop.f32.mrf.mxu1 }
 0x7f4   :  { %v1040_v15 = vsel %vm244_vm1, %v1037_v14, -inf }
 0x7f5   :  { %1041 = vmax.xlane.f32.xlu0 %v1040_v15  ;;  %v4742_v15 = vld [vmem:[%s4435_s27 + $0x18] sm:$0xff] }
 0x7f6   :  { %1395 = vmatpush.msrb.mxu0 %v4742_v15 }
 0x7fd   :  { %1108 = vadd.xlane.f32.xlu0 %v1107_v17  ;;  %v4750_v17 = vld [vmem:[%s4435_s27 + $0x10] sm:$0xff] }
 0x7fe   :  { %1396 = vmatpush.msrb.mxu0 %v4750_v17 }
 0x800   :  { %1397 = vmatpush.msrb.mxu0 %v4756_v19 }
 0x868   :  { %v1042_v24 = vpop.xlane.xlu0 %1041 }
 0x869   :  { %v1043_v25 = vsub.f32 %v1037_v14, %v1042_v24  ;;  %v4739_v14 = vld [vmem:[%s4445_s6 + $0x18] sm:$0xff] }
 0x86a   :  { %1428 = vmatpush.msra.mxu1 %v4739_v14 }
 0x86b   :  { %v1044_v26 = vmul.f32 1.442695, %v1043_v25  ;;  %v4769_v25 = vld [vmem:[%s4445_s6] sm:$0xff] }
 0x86d   :  { %4191 = vpow2.f32 %v1044_v26  ;;  %v4772_v26 = vld [vmem:[%s4435_s27] sm:$0xff] }
 0x86e   :  { %1398 = vmatpush.msrb.mxu0 %v4772_v26 }
 0x870   :  { %v1109_v27 = vpop.xlane.xlu0 %1108 }
 0x871   :  { %4193 = vrcp.f32 %v1109_v27  ;;  %v4777_v27 = vld [vmem:[%s4360_s9] sm:$0xff]  ;;  %s5419_s9 = sld [smem:[#allocation7_spill]] }
 0x873   :  { %v4192_v28 = vpop.eup %4191 }
 0x874   :  { %v1046_v30 = vsel %vm244_vm1, %v4192_v28, 0.0 }
 0x875   :  { %1047 = vadd.xlane.f32.xlu2 %v1046_v30 }
 0x877   :  { %v4194_v31 = vpop.eup %4193 }
 0x878   :  { %v1111_v32 = vmul.f32 %v4194_v31, %v4190_v16  ;;  %v4745_v16 = vld [vmem:[%s4445_s6 + $0x10] sm:$0xff]  ;;  %v4781_v31 = vld [vmem:[%s4455_s30 + $0x8] sm:$0xff] }
 0x879   :  { %1429 = vmatpush.msra.mxu1 %v4745_v16 }
 0x87a   :  { %3857 = vmatmul.msk.f32.vlgmr.msra.gmra.mxu0 %vm244_vm1, %v1111_v32 }
 0x87b   :  { %1430 = vmatpush.msra.mxu1 %v4753_v18 }
 0x87d   :  { %1431 = vmatpush.msra.mxu1 %v4769_v25 }
 0x882   :  { %3865 = vmatmul.msk.f32.vlgmr.msrb.gmra.mxu0 %vm150_vm0, %v4777_v27 }
 0x88a   :  { %3866 = vmatmul.msk.f32.gmra.mxu0 %vm150_vm0, %v4795_v38 }
 0x8e8   :  { %v1048_v34 = vpop.xlane.xlu2 %1047 }
 0x8e9   :  { %4195 = vrcp.f32 %v1048_v34  ;;  %v4790_v34 = vld [vmem:[%s4455_s30] sm:$0xff] }
 0x8ea   :  { %4197 = vrcp.f32 %v4343_v29 }
 0x8ef   :  { %v4196_v35 = vpop.eup %4195 }
 0x8f0   :  { %v1050_v36 = vmul.f32 %v4196_v35, %v4192_v28  ;;  %v4198_v56 = vpop.eup %4197 }
 0x8f1   :  { %v1186_v57 = vmul.f32 32.0, %v4198_v56  ;;  %vm1190_vm2 = vweird.f32 %v4198_v56 }
 0x8f2   :  { %3854 = vmatmul.msk.f32.vlgmr.msra.gmra.mxu2 %vm244_vm1, %v1050_v36 }
 0x8f3   :  { %v1187_v58 = vsub.f32 1.0, %v1186_v57  ;;  %1459 = vmatpush.msra.mxu2 %v4759_v20  ;;  %v3885_v57 = vld [vmem:[%s4445_s6 + $0x28] sm:$0xff] }
 0x8f5   :  { %v1188_v13 = vmul.f32 %v4198_v56, %v1187_v58  ;;  %1460 = vmatpush.msra.mxu2 %v4764_v23  ;;  %v3877_v58 = vld [vmem:[%s4435_s27 + $0x20] sm:$0xff] }
 0x8f7   :  { %v1132_v37 = vpop.f32.mrf.mxu0  ;;  %1461 = vmatpush.msra.mxu2 %v4781_v31 }
 0x8f8   :  { %1135 = vst.msk [vmem:[#allocation2 + $0x8] sm:$0xff] %vm244_vm1, %v1132_v37 }
 0x8f9   :  { %1462 = vmatpush.msra.mxu2 %v4790_v34 }
 0x8ff   :  { %v1137_v41 = vld [vmem:[#allocation2 + $0x8] sm:$0xff] }
 0x975   :  { %v1071_v39 = vpop.f32.mrf.mxu2 }
 0x976   :  { %1074 = vst.msk [vmem:[#allocation2] sm:$0xff] %vm244_vm1, %v1071_v39 }
 0x97d   :  { %v1136_v40 = vld [vmem:[#allocation2] sm:$0xff] }
 0x97e   :  { %3859 = vmatmul.msk.f32.vlgmr.msrb.gmra.mxu1 %vm244_vm1, %v1136_v40 }
 0x986   :  { %3860 = vmatmul.msk.f32.gmra.mxu1 %vm244_vm1, %v1137_v41 }
 0x98e   :  { %3867 = vmatmul.msk.f32.vlgmr.msra.gmra.mxu1 %vm150_vm0, %v4777_v27 }
 0x996   :  { %3868 = vmatmul.msk.f32.gmra.mxu1 %vm150_vm0, %v4795_v38 }
 0x9fb   :  { %v1163_v45 = vpop.f32.mrf.mxu1 }
 0x9fc   :  { %v1169_v46 = vadd.f32 %v1163_v45, %v911_v43  ;;  %v3880_v45 = vld [vmem:[%s4435_s27 + $0x38] sm:$0xff] }
 0x9fd   :  { %1619 = vmatpush.msrb.mxu1 %v3880_v45  ;;  %v4134_v45 = vld [vmem:[%s5420_s13 + $0x1] ss:$0 sm:$0xff] }
 0x9fe   :  { %v1175_v47 = vadd.f32 %v4127_v44, %v1169_v46 }
 0xa00   :  { %v1177_v49 = vadd.f32 %v1175_v47, %v4526_v8  ;;  %v1189_v8 = vadd.f32 %v4198_v56, %v1188_v13  ;;  %v4807_v47 = vld [vmem:[%s5418_s5] ss:$0 sm:$0xff] }
 0xa02   :  { %v1179_v51 = vsel %vm150_vm0, %v1177_v49, 0.0  ;;  %v4719_v33 = vsel %vm1190_vm2, %v4198_v56, %v1189_v8  ;;  %v3884_v8 = vld [vmem:[%s4445_s6 + $0x20] sm:$0xff] }
 0xa03   :  { %1180 = vadd.xlane.f32.xlu1 %v1179_v51  ;;  %v1166_v52 = vpop.f32.mrf.mxu1 }
 0xa04   :  { %v1170_v53 = vadd.f32 %v1166_v52, %v912_v50  ;;  %v3887_v52 = vld [vmem:[%s4445_s6 + $0x38] sm:$0xff] }
 0xa06   :  { %v1176_v54 = vadd.f32 %v4127_v44, %v1170_v53 }
 0xa08   :  { %v1178_v55 = vadd.f32 %v1176_v54, %v4547_v22  ;;  %v3886_v54 = vld [vmem:[%s4445_s6 + $0x30] sm:$0xff] }
 0xa0a   :  { %v1182_v9 = vsel %vm150_vm0, %v1178_v55, 0.0 }
 0xa0b   :  { %1183 = vadd.xlane.f32.xlu2 %v1182_v9  ;;  %v3878_v9 = vld [vmem:[%s4435_s27 + $0x28] sm:$0xff] }
 0xa76   :  { %v1181_v59 = vpop.xlane.xlu1 %1180 }
 0xa77   :  { %v1192_v60 = vmul.f32 %v4719_v33, %v1181_v59 }
 0xa79   :  { %v4722_v22 = vsub.f32 %v1177_v49, %v1192_v60  ;;  %v1282_v60 = vld [vmem:[%s5419_s9 + $0x8] sm:$0xff] }
 0xa7a   :  { %1308 = vmatpush.msra.mxu3 %v1282_v60 }
 0xa7b   :  { %v1196_v61 = vmul.f32 %v4722_v22, %v4722_v22 }
 0xa7d   :  { %v1198_v62 = vsel %vm150_vm0, %v1196_v61, 0.0  ;;  %v4131_v61 = vld [vmem:[%s5420_s13] ss:$0 sm:$0xff] }
 0xa7e   :  { %1199 = vadd.xlane.f32.xlu0 %v1198_v62  ;;  %v1184_v63 = vpop.xlane.xlu2 %1183  ;;  %v1433_v62 = vpop.f32.mrf.mxu1 }
 0xa7f   :  { %v1193_v0 = vmul.f32 %v4719_v33, %v1184_v63  ;;  %v1434_v63 = vadd.f32 %v4131_v61, %v1433_v62 }
 0xa81   :  { %v4728_v1 = vsub.f32 %v1178_v55, %v1193_v0  ;;  %v3879_v55 = vld [vmem:[%s4435_s27 + $0x30] sm:$0xff] }
 0xa82   :  { %1620 = vmatpush.msrb.mxu1 %v3879_v55 }
 0xa83   :  { %v1197_v2 = vmul.f32 %v4728_v1, %v4728_v1 }
 0xa84   :  { %1621 = vmatpush.msrb.mxu1 %v3878_v9  ;;  %v135_v9 = vlaneseq }
 0xa85   :  { %v1201_v3 = vsel %vm150_vm0, %v1197_v2, 0.0 }
 0xa86   :  { %1202 = vadd.xlane.f32.xlu1 %v1201_v3  ;;  %1622 = vmatpush.msrb.mxu1 %v3877_v58  ;;  %v1436_v0 = vpop.f32.mrf.mxu1 }
 0xa87   :  { %3882 = vmatmul.msk.f32.vlgmr.msrb.gmra.mxu1 %vm150_vm0, %v4777_v27  ;;  %v1437_v5 = vadd.f32 %v4131_v61, %v1436_v0 }
 0xa8f   :  { %3883 = vmatmul.msk.f32.gmra.mxu1 %vm150_vm0, %v4795_v38 }
 0xaf1   :  { %v1200_v10 = vpop.xlane.xlu0 %1199 }
 0xaf2   :  { %v1204_v11 = vmul.f32 %v1200_v10, %v4719_v33 }
 0xaf4   :  { %v1206_v12 = vadd.f32 1e-05, %v1204_v11 }
 0xaf6   :  { %4199 = vrsqrt.f32 %v1206_v12  ;;  %vm1214_vm4 = vweird.f32 %v1206_v12 }
 0xaf9   :  { %v1203_v21 = vpop.xlane.xlu1 %1202 }
 0xafa   :  { %v1205_v24 = vmul.f32 %v1203_v21, %v4719_v33 }
 0xafc   :  { %v4200_v28 = vpop.eup %4199  ;;  %v1207_v30 = vadd.f32 1e-05, %v1205_v24  ;;  %v4132_v24 = vld [vmem:[%s5422_s21] ss:$0 sm:$0xff] }
 0xafd   :  { %v1209_v32 = vmul.f32 %v4200_v28, %v1206_v12  ;;  %vm1215_vm3 = vweird.f32 %v4200_v28  ;;  %v1400_v12 = vpop.f32.mrf.mxu0 }
 0xafe   :  { %4201 = vrsqrt.f32 %v1207_v30  ;;  %vm1216_vm5 = vmor %vm1214_vm4, %vm1215_vm3  ;;  %vm1224_vm7 = vweird.f32 %v1207_v30 }
 0xaff   :  { %v1210_v35 = vmul.f32 %v4200_v28, %v1209_v32  ;;  %v4133_v32 = vld [vmem:[%s5423_s25] ss:$0 sm:$0xff] }
 0xb01   :  { %v1211_v36 = vmul.f32 0.5, %v1210_v35 }
 0xb03   :  { %v1212_v37 = vsub.f32 1.5, %v1211_v36 }
 0xb04   :  { %v4202_v39 = vpop.eup %4201  ;;  %v1624_v6 = vpop.f32.mrf.mxu1 }
 0xb05   :  { %v1213_v40 = vmul.f32 %v4200_v28, %v1212_v37  ;;  %v1219_v41 = vmul.f32 %v4202_v39, %v1207_v30  ;;  %vm1225_vm6 = vweird.f32 %v4202_v39  ;;  %v4847_v10 = vadd.f32 %v4135_v4, %v1624_v6 }
 0xb06   :  { %vm1226_vm8 = vmor %vm1224_vm7, %vm1225_vm6  ;;  %v1401_v30 = vadd.f32 %v4132_v24, %v1400_v12 }
 0xb07   :  { %v1217_v43 = vsel %vm1216_vm5, %v4200_v28, %v1213_v40  ;;  %v1220_v44 = vmul.f32 %v4202_v39, %v1219_v41 }
 0xb08   :  { %v1228_v46 = vmul.f32 %v1217_v43, %v4722_v22  ;;  %v1281_v22 = vld [vmem:[%s5419_s9] sm:$0xff]  ;;  %v1406_v36 = vmul.f32 0.35355338, %v1401_v30 }
 0xb09   :  { %v1221_v48 = vmul.f32 0.5, %v1220_v44  ;;  %1309 = vmatpush.msra.mxu3 %v1281_v22 }
 0xb0a   :  { %v1234_v49 = vmul.f32 %v4798_v42, %v1228_v46 }
 0xb0b   :  { %v1222_v50 = vsub.f32 1.5, %v1221_v48  ;;  %3871 = vmatpush.xpose.msk.msrb.mxu3 %vm244_vm1, %v1434_v63 }
 0xb0c   :  { %v4811_v51 = vadd.f32 %v4807_v47, %v1234_v49  ;;  %v1627_v49 = vpop.f32.mrf.mxu1 }
 0xb0d   :  { %v1223_v53 = vmul.f32 %v4202_v39, %v1222_v50  ;;  %v1628_v50 = vadd.f32 %v4135_v4, %v1627_v49  ;;  %v4886_v4 = vld [vmem:[%s4455_s30 + $0x28] sm:$0xff] }
 0xb0e   :  { %3861 = vmatmul.msk.f32.vlgmr.msrb.gmra.mxu2 %vm150_vm0, %v4811_v51 }
 0xb0f   :  { %v1227_v29 = vsel %vm1226_vm8, %v4202_v39, %v1223_v53  ;;  %1654 = vmatpush.msrb.mxu2 %v3887_v52  ;;  %v1403_v39 = vpop.f32.mrf.mxu0 }
 0xb10   :  { %v1229_v56 = vmul.f32 %v1227_v29, %v4728_v1  ;;  %v4130_v1 = vld [vmem:[%s5421_s17] ss:$0 sm:$0xff]  ;;  %v1404_v40 = vadd.f32 %v4132_v24, %v1403_v39 }
 0xb11   :  { %1655 = vmatpush.msrb.mxu2 %v3886_v54  ;;  %v1631_v54 = vmul.f32 0.35355338, %v1628_v50 }
 0xb12   :  { %v1235_v13 = vmul.f32 %v4798_v42, %v1229_v56  ;;  %v1407_v43 = vmul.f32 0.35355338, %v1404_v40  ;;  %v136_v56 = vshrl.u32 %v135_v9, 7 }
 0xb13   :  { %1656 = vmatpush.msrb.mxu2 %v3885_v57  ;;  %v138_v57 = vand.u32 127, %v135_v9 }
 0xb14   :  { %v4825_v59 = vadd.f32 %v4807_v47, %v1235_v13 }
 0xb15   :  { %1657 = vmatpush.msrb.mxu2 %v3884_v8  ;;  %vm4865_vm10 = vcmp.gt.s32.totalorder %v138_v57, %v136_v56 }
 0xb16   :  { %3862 = vmatmul.msk.f32.gmra.mxu2 %vm150_vm0, %v4825_v59 }
 0xb1e   :  { %3869 = vmatmul.msk.f32.vlgmr.msra.gmra.mxu2 %vm150_vm0, %v4777_v27 }
 0xb26   :  { %3870 = vmatmul.msk.f32.gmra.mxu2 %vm150_vm0, %v4795_v38 }
 0xb2e   :  { %3889 = vmatmul.msk.f32.vlgmr.msrb.gmra.mxu2 %vm150_vm0, %v4777_v27 }
 0xb36   :  { %3890 = vmatmul.msk.f32.gmra.mxu2 %vm150_vm0, %v4795_v38 }
 0xb91   :  { %v1273_v2 = vpop.f32.mrf.mxu2 }
 0xb92   :  { %v1274_v3 = vadd.f32 %v4130_v1, %v1273_v2  ;;  %v4879_v2 = vld [vmem:[%s4455_s30 + $0x38] sm:$0xff] }
 0xb94   :  { %v1279_v7 = vmax.f32 %v1274_v3, 0.0  ;;  %v4882_v3 = vld [vmem:[%s4455_s30 + $0x30] sm:$0xff] }
 0xb96   :  { %3863 = vmatmul.msk.f32.vlgmr.msra.gmra.mxu3 %vm1287_vm9, %v1279_v7 }
 0xb97   :  { %3874 = vmatpush.xpose.msk.msra.mxu3 %vm244_vm1, %v1437_v5  ;;  %v4891_v5 = vld [vmem:[%s4455_s30 + $0x20] sm:$0xff] }
 0xb99   :  { %v1276_v11 = vpop.f32.mrf.mxu2 }
 0xb9a   :  { %v1277_v21 = vadd.f32 %v4130_v1, %v1276_v11 }
 0xb9c   :  { %v1280_v28 = vmax.f32 %v1277_v21, 0.0 }
 0xb9e   :  { %3864 = vmatmul.msk.f32.gmra.mxu3 %vm1287_vm9, %v1280_v28 }
 0xba1   :  { %v1464_v35 = vpop.f32.mrf.mxu2 }
 0xba2   :  { %v1465_v37 = vadd.f32 %v4133_v32, %v1464_v35 }
 0xba4   :  { %1526 = vmatpush.msra.mxu0 %v1465_v37 }
 0xba6   :  { %3872 = vmatmul.msk.f32.vlgmr.msrb.gmra.mxu3 %vm244_vm1, %v1406_v36 }
 0xba7   :  { %1687 = vmatpush.msrb.mxu3 %v4879_v2 }
 0xba9   :  { %v1467_v41 = vpop.f32.mrf.mxu2  ;;  %1688 = vmatpush.msrb.mxu3 %v4882_v3 }
 0xbaa   :  { %v1468_v44 = vadd.f32 %v4133_v32, %v1467_v41 }
 0xbab   :  { %1689 = vmatpush.msrb.mxu3 %v4886_v4 }
 0xbac   :  { %1588 = vmatpush.msrb.mxu0 %v1468_v44  ;;  %v4137_v44 = vld [vmem:[%s5423_s25 + $0x1] ss:$0 sm:$0xff] }
 0xbad   :  { %1690 = vmatpush.msrb.mxu3 %v4891_v5 }
 0xbae   :  { %3875 = vmatmul.msk.f32.vlgmr.msra.gmra.mxu3 %vm244_vm1, %v1407_v43 }
 0xbb1   :  { %v1659_v46 = vpop.f32.mrf.mxu2 }
 0xbb2   :  { %v4857_v48 = vadd.f32 %v4134_v45, %v1659_v46 }
 0xbb6   :  { %3896 = vmatmul.msk.f32.vlgmr.msrb.gmra.mxu3 %vm150_vm0, %v4777_v27 }
 0xbb9   :  { %v1662_v52 = vpop.f32.mrf.mxu2 }
 0xbba   :  { %v1663_v53 = vadd.f32 %v4134_v45, %v1662_v52 }
 0xbbc   :  { %3901 = vmatpush.xpose.msk.msra.mxu1 %vm244_vm1, %v1663_v53 }
 0xbbe   :  { %3897 = vmatmul.msk.f32.gmra.mxu3 %vm150_vm0, %v4795_v38 }
 0xbbf   :  { %3902 = vmatmul.msk.f32.vlgmr.msra.gmra.mxu1 %vm244_vm1, %v1631_v54 }
 0xc19   :  { %v4861_v55 = vpop.f32.mrf.mxu3 }
 0xc21   :  { %v4863_v29 = vpop.f32.mrf.mxu3 }
 0xc29   :  { %v1493_v13 = vpop.f32.mrf.mxu3 }
 0xc2a   :  { %v1496_v8 = vsel %vm4865_vm10, -1e+09, %v1493_v13  ;;  %v1630_v13 = vmul.f32 0.35355338, %v4847_v10  ;;  %v4921_v10 = vld [vmem:[%s4435_s27 + $0x48] sm:$0xff] }
 0xc2b   :  { %v1497_v60 = vsel %vm244_vm1, %v1496_v8, -inf }
 0xc2c   :  { %1498 = vmax.xlane.f32.xlu2 %v1497_v60  ;;  %v3919_v60 = vld [vmem:[%s4445_s6 + $0x58] sm:$0xff] }
 0xc31   :  { %v1555_v22 = vpop.f32.mrf.mxu3 }
 0xc32   :  { %v1558_v61 = vsel %vm4865_vm10, -1e+09, %v1555_v22  ;;  %v3918_v22 = vld [vmem:[%s4445_s6 + $0x50] sm:$0xff] }
 0xc33   :  { %v1559_v62 = vsel %vm244_vm1, %v1558_v61, -inf }
 0xc34   :  { %1560 = vmax.xlane.f32.xlu0 %v1559_v62  ;;  %v4913_v62 = vld [vmem:[%s4435_s27 + $0x58] sm:$0xff] }
 0xc35   :  { %1906 = vmatpush.msrb.mxu1 %v4913_v62 }
 0xc39   :  { %v1692_v43 = vpop.f32.mrf.mxu3 }
 0xc3a   :  { %v1693_v9 = vadd.f32 %v4137_v44, %v1692_v43 }
 0xc3c   :  { %v1783_v63 = vpop.f32.mrf.mxu1 }
 0xc3d   :  { %v1786_v0 = vsel %vm4865_vm10, -1e+09, %v1783_v63  ;;  %v4916_v63 = vld [vmem:[%s4435_s27 + $0x50] sm:$0xff] }
 0xc3e   :  { %v1787_v1 = vsel %vm244_vm1, %v1786_v0, -inf  ;;  %1907 = vmatpush.msrb.mxu1 %v4916_v63 }
 0xc3f   :  { %1788 = vmax.xlane.f32.xlu0 %v1787_v1  ;;  %v4925_v1 = vld [vmem:[%s4435_s27 + $0x40] sm:$0xff] }
 0xc40   :  { %1908 = vmatpush.msrb.mxu1 %v4921_v10 }
 0xc41   :  { %v1695_v46 = vpop.f32.mrf.mxu3 }
 0xc42   :  { %v1696_v49 = vadd.f32 %v4137_v44, %v1695_v46  ;;  %1909 = vmatpush.msrb.mxu1 %v4925_v1 }
 0xc43   :  { %3914 = vmatmul.msk.f32.vlgmr.msrb.gmra.mxu1 %vm150_vm0, %v4777_v27 }
 0xc44   :  { %1816 = vmatpush.msra.mxu2 %v1696_v49 }
 0xc46   :  { %1941 = vmatpush.msrb.mxu2 %v3919_v60 }
 0xc48   :  { %1942 = vmatpush.msrb.mxu2 %v3918_v22 }
 0xc4b   :  { %3915 = vmatmul.msk.f32.gmra.mxu1 %vm150_vm0, %v4795_v38 }
 0xc9f   :  { %v1499_v6 = vpop.xlane.xlu2 %1498 }
 0xca0   :  { %v1500_v7 = vsub.f32 %v1496_v8, %v1499_v6 }
 0xca2   :  { %v1501_v11 = vmul.f32 1.442695, %v1500_v7 }
 0xca4   :  { %4203 = vpow2.f32 %v1501_v11 }
 0xca7   :  { %v1561_v12 = vpop.xlane.xlu0 %1560 }
 0xca8   :  { %v1562_v21 = vsub.f32 %v1558_v61, %v1561_v12  ;;  %v3917_v61 = vld [vmem:[%s4445_s6 + $0x48] sm:$0xff] }
 0xca9   :  { %1943 = vmatpush.msrb.mxu2 %v3917_v61  ;;  %v4961_v61 = vld [vmem:[%s5426_s29 + $0x8] sm:$0xff] }
 0xcaa   :  { %v4204_v24 = vpop.eup %4203  ;;  %v1563_v28 = vmul.f32 1.442695, %v1562_v21  ;;  %1847 = vmatpush.msra.mxu3 %v4961_v61 }
 0xcab   :  { %v1503_v30 = vsel %vm244_vm1, %v4204_v24, 0.0 }
 0xcac   :  { %4205 = vpow2.f32 %v1563_v28  ;;  %1504 = vadd.xlane.f32.xlu1 %v1503_v30  ;;  %v4139_v30 = vld [vmem:[%s5422_s21 + $0x2] ss:$0 sm:$0xff] }
 0xcb2   :  { %v4206_v32 = vpop.eup %4205  ;;  %v1789_v35 = vpop.xlane.xlu0 %1788 }
 0xcb3   :  { %v1565_v36 = vsel %vm244_vm1, %v4206_v32, 0.0  ;;  %v1790_v37 = vsub.f32 %v1786_v0, %v1789_v35  ;;  %v3916_v0 = vld [vmem:[%s4445_s6 + $0x40] sm:$0xff] }
 0xcb4   :  { %1566 = vadd.xlane.f32.xlu2 %v1565_v36  ;;  %1944 = vmatpush.msrb.mxu2 %v3916_v0  ;;  %v4138_v36 = vld [vmem:[%s5420_s13 + $0x2] ss:$0 sm:$0xff]  ;;  %v4965_v0 = vld [vmem:[%s4455_s30 + $0x58] sm:$0xff] }
 0xcb5   :  { %v1791_v39 = vmul.f32 1.442695, %v1790_v37  ;;  %1974 = vmatpush.msrb.mxu3 %v4965_v0 }
 0xcb7   :  { %4207 = vpow2.f32 %v1791_v39 }
 0xcbd   :  { %v4208_v40 = vpop.eup %4207 }
 0xcbe   :  { %v1793_v41 = vsel %vm244_vm1, %v4208_v40, 0.0 }
 0xcbf   :  { %1794 = vadd.xlane.f32.xlu1 %v1793_v41 }
 0xd1f   :  { %v1505_v45 = vpop.xlane.xlu1 %1504 }
 0xd20   :  { %4209 = vrcp.f32 %v1505_v45 }
 0xd26   :  { %v4210_v50 = vpop.eup %4209 }
 0xd27   :  { %v1507_v52 = vmul.f32 %v4210_v50, %v4204_v24  ;;  %v1567_v53 = vpop.xlane.xlu2 %1566 }
 0xd28   :  { %4211 = vrcp.f32 %v1567_v53 }
 0xd29   :  { %3873 = vmatmul.msk.f32.vlgmr.msra.gmra.mxu0 %vm244_vm1, %v1507_v52 }
 0xd2a   :  { %3898 = vmatpush.xpose.msk.msra.mxu0 %vm244_vm1, %v4857_v48 }
 0xd2e   :  { %v4212_v54 = vpop.eup %4211 }
 0xd2f   :  { %v1569_v56 = vmul.f32 %v4212_v54, %v4206_v32  ;;  %v1911_v32 = vpop.f32.mrf.mxu1  ;;  %v4949_v54 = vld [vmem:[%s5426_s29] sm:$0xff] }
 0xd30   :  { %v1912_v35 = vadd.f32 %v4139_v30, %v1911_v32 }
 0xd31   :  { %3876 = vmatmul.msk.f32.vlgmr.msrb.gmra.mxu0 %vm244_vm1, %v1569_v56 }
 0xd32   :  { %v1795_v57 = vpop.xlane.xlu1 %1794  ;;  %1754 = vmatpush.msrb.mxu0 %v1693_v9  ;;  %v1917_v22 = vmul.f32 0.35355338, %v1912_v35 }
 0xd33   :  { %4213 = vrcp.f32 %v1795_v57 }
 0xd39   :  { %v4214_v8 = vpop.eup %4213  ;;  %3899 = vmatmul.msk.f32.vlgmr.msra.gmra.mxu0 %vm244_vm1, %v1630_v13 }
 0xd3a   :  { %v1797_v48 = vmul.f32 %v4214_v8, %v4208_v40  ;;  %v1914_v40 = vpop.f32.mrf.mxu1  ;;  %1876 = vmatpush.msra.mxu0 %v4949_v54 }
 0xd3b   :  { %v1915_v41 = vadd.f32 %v4139_v30, %v1914_v40 }
 0xd3c   :  { %3903 = vmatmul.msk.f32.vlgmr.msra.gmra.mxu2 %vm244_vm1, %v1797_v48 }
 0xd3d   :  { %v1918_v46 = vmul.f32 0.35355338, %v1915_v41 }
 0xd44   :  { %3921 = vmatmul.msk.f32.vlgmr.msrb.gmra.mxu2 %vm150_vm0, %v4777_v27 }
 0xd4c   :  { %3922 = vmatmul.msk.f32.gmra.mxu2 %vm150_vm0, %v4795_v38 }
 0xda6   :  { %v1528_v6 = vpop.f32.mrf.mxu0 }
 0xda7   :  { %1531 = vst.msk [vmem:[#allocation2] sm:$0xff] %vm244_vm1, %v1528_v6  ;;  %v4968_v6 = vld [vmem:[%s4455_s30 + $0x50] sm:$0xff] }
 0xda8   :  { %1975 = vmatpush.msrb.mxu3 %v4968_v6 }
 0xdae   :  { %v1590_v7 = vpop.f32.mrf.mxu0  ;;  %v1594_v60 = vld [vmem:[#allocation2] sm:$0xff] }
 0xdaf   :  { %1593 = vst.msk [vmem:[#allocation2 + $0x8] sm:$0xff] %vm244_vm1, %v1590_v7  ;;  %v4972_v7 = vld [vmem:[%s4455_s30 + $0x48] sm:$0xff] }
 0xdb0   :  { %1976 = vmatpush.msrb.mxu3 %v4972_v7 }
 0xdb6   :  { %v1721_v11 = vpop.f32.mrf.mxu0  ;;  %v1595_v28 = vld [vmem:[#allocation2 + $0x8] sm:$0xff] }
 0xdb7   :  { %v1724_v12 = vsel %vm4865_vm10, -1e+09, %v1721_v11  ;;  %v4976_v11 = vld [vmem:[%s4455_s30 + $0x40] sm:$0xff] }
 0xdb8   :  { %v1725_v21 = vsel %vm244_vm1, %v1724_v12, -inf  ;;  %1977 = vmatpush.msrb.mxu3 %v4976_v11 }
 0xdb9   :  { %1726 = vmax.xlane.f32.xlu2 %v1725_v21 }
 0xdbf   :  { %v1818_v24 = vpop.f32.mrf.mxu2 }
 0xdc0   :  { %1821 = vst.msk [vmem:[#allocation2 + $0x8] sm:$0xff] %vm244_vm1, %v1818_v24 }
 0xdc7   :  { %v1946_v37 = vpop.f32.mrf.mxu2  ;;  %v1823_v35 = vld [vmem:[#allocation2 + $0x8] sm:$0xff] }
 0xdc8   :  { %v1947_v39 = vadd.f32 %v4138_v36, %v1946_v37 }
 0xdcf   :  { %v1949_v43 = vpop.f32.mrf.mxu2 }
 0xdd0   :  { %v1950_v44 = vadd.f32 %v4138_v36, %v1949_v43 }
 0xdd2   :  { %3933 = vmatpush.xpose.msk.msra.mxu2 %vm244_vm1, %v1950_v44 }
 0xdd5   :  { %3934 = vmatmul.msk.f32.vlgmr.msra.gmra.mxu2 %vm244_vm1, %v1918_v46 }
 0xe2c   :  { %v1727_v45 = vpop.xlane.xlu2 %1726 }
 0xe2d   :  { %v1728_v49 = vsub.f32 %v1724_v12, %v1727_v45 }
 0xe2f   :  { %v1729_v50 = vmul.f32 1.442695, %v1728_v49 }
 0xe31   :  { %4215 = vpow2.f32 %v1729_v50 }
 0xe37   :  { %v4216_v52 = vpop.eup %4215 }
 0xe38   :  { %v1731_v53 = vsel %vm244_vm1, %v4216_v52, 0.0 }
 0xe39   :  { %1732 = vadd.xlane.f32.xlu0 %v1731_v53 }
 0xe58   :  { %v2070_v57 = vpop.f32.mrf.mxu2 }
 0xe59   :  { %v2073_v8 = vsel %vm4865_vm10, -1e+09, %v2070_v57 }
 0xe5a   :  { %v2074_v48 = vsel %vm244_vm1, %v2073_v8, -inf }
 0xe5b   :  { %2075 = vmax.xlane.f32.xlu2 %v2074_v48 }
 0xeac   :  { %v1733_v9 = vpop.xlane.xlu0 %1732 }
 0xead   :  { %4217 = vrcp.f32 %v1733_v9 }
 0xeb3   :  { %v4218_v56 = vpop.eup %4217 }
 0xeb4   :  { %v1735_v13 = vmul.f32 %v4218_v56, %v4216_v52  ;;  %v4140_v56 = vld [vmem:[%s5423_s25 + $0x2] ss:$0 sm:$0xff] }
 0xeb6   :  { %3900 = vmatmul.msk.f32.vlgmr.msrb.gmra.mxu0 %vm244_vm1, %v1735_v13 }
 0xeb7   :  { %3930 = vmatpush.xpose.msk.msrb.mxu0 %vm244_vm1, %v1947_v39 }
 0xebe   :  { %3907 = vmatmul.msk.f32.vlgmr.msra.gmra.mxu0 %vm244_vm1, %v1594_v60 }
 0xec6   :  { %3908 = vmatmul.msk.f32.gmra.mxu0 %vm244_vm1, %v1595_v28 }
 0xece   :  { %3931 = vmatmul.msk.f32.vlgmr.msrb.gmra.mxu0 %vm244_vm1, %v1917_v22  ;;  %v2076_v28 = vpop.xlane.xlu2 %2075 }
 0xecf   :  { %v2077_v30 = vsub.f32 %v2073_v8, %v2076_v28  ;;  %v5009_v28 = vld [vmem:[%s4445_s6 + $0x70] sm:$0xff] }
 0xed1   :  { %v2078_v36 = vmul.f32 1.442695, %v2077_v30  ;;  %v5014_v30 = vld [vmem:[%s4435_s27 + $0x70] sm:$0xff] }
 0xed3   :  { %4219 = vpow2.f32 %v2078_v36  ;;  %v5020_v36 = vld [vmem:[%s4435_s27 + $0x68] sm:$0xff] }
 0xed9   :  { %v4220_v41 = vpop.eup %4219 }
 0xeda   :  { %v2080_v43 = vsel %vm244_vm1, %v4220_v41, 0.0 }
 0xf33   :  { %v1756_v12 = vpop.f32.mrf.mxu0 }
 0xf34   :  { %1759 = vst.msk [vmem:[#allocation2] sm:$0xff] %vm244_vm1, %v1756_v12  ;;  %v5003_v12 = vld [vmem:[%s4445_s6 + $0x78] sm:$0xff] }
 0xf3b   :  { %v4981_v21 = vpop.f32.mrf.mxu0  ;;  %v1822_v24 = vld [vmem:[#allocation2] sm:$0xff] }
 0xf3c   :  { %3905 = vmatmul.msk.f32.vlgmr.msra.gmra.mxu3 %vm244_vm1, %v1822_v24  ;;  %v5006_v24 = vld [vmem:[%s4435_s27 + $0x78] sm:$0xff] }
 0xf3d   :  { %2201 = vmatpush.msra.mxu3 %v5003_v12  ;;  %2166 = vmatpush.msrb.mxu2 %v5006_v24 }
 0xf3f   :  { %2202 = vmatpush.msra.mxu3 %v5009_v28  ;;  %2167 = vmatpush.msrb.mxu2 %v5014_v30 }
 0xf41   :  { %2168 = vmatpush.msrb.mxu2 %v5020_v36 }
 0xf43   :  { %v4984_v32 = vpop.f32.mrf.mxu0 }
 0xf44   :  { %3906 = vmatmul.msk.f32.gmra.mxu3 %vm244_vm1, %v1823_v35  ;;  %v5017_v35 = vld [vmem:[%s4445_s6 + $0x68] sm:$0xff] }
 0xf45   :  { %2203 = vmatpush.msra.mxu3 %v5017_v35 }
 0xf4b   :  { %v2008_v37 = vpop.f32.mrf.mxu0 }
 0xf4c   :  { %v2011_v39 = vsel %vm4865_vm10, -1e+09, %v2008_v37  ;;  %3928 = vmatmul.msk.f32.vlgmr.msrb.gmra.mxu3 %vm150_vm0, %v4777_v27  ;;  %v5025_v37 = vld [vmem:[%s4445_s6 + $0x60] sm:$0xff] }
 0xf4d   :  { %v2012_v40 = vsel %vm244_vm1, %v2011_v39, -inf  ;;  %2204 = vmatpush.msra.mxu3 %v5025_v37 }
 0xf4e   :  { %2013 = vmax.xlane.f32.xlu1 %v2012_v40 }
 0xf54   :  { %3929 = vmatmul.msk.f32.gmra.mxu3 %vm150_vm0, %v4795_v38 }
 0xf56   :  { %2081 = vadd.xlane.f32.xlu1 %v2080_v43 }
 0xf5c   :  { %3951 = vmatmul.msk.f32.vlgmr.msra.gmra.mxu3 %vm150_vm0, %v4777_v27 }
 0xf64   :  { %3952 = vmatmul.msk.f32.gmra.mxu3 %vm150_vm0, %v4795_v38 }
 0xfbf   :  { %v4995_v44 = vpop.f32.mrf.mxu3 }
 0xfc1   :  { %v2014_v45 = vpop.xlane.xlu1 %2013 }
 0xfc2   :  { %v2015_v46 = vsub.f32 %v2011_v39, %v2014_v45  ;;  %v5033_v39 = vld [vmem:[%s4435_s27 + $0x60] sm:$0xff] }
 0xfc3   :  { %2169 = vmatpush.msrb.mxu2 %v5033_v39 }
 0xfc4   :  { %v2016_v49 = vmul.f32 1.442695, %v2015_v46  ;;  %3944 = vmatmul.msk.f32.vlgmr.msrb.gmra.mxu2 %vm150_vm0, %v4777_v27  ;;  %v5045_v46 = vld [vmem:[%s5426_s29 + $0x10] sm:$0xff] }
 0xfc6   :  { %4221 = vpow2.f32 %v2016_v49  ;;  %v4141_v49 = vld [vmem:[%s5420_s13 + $0x3] ss:$0 sm:$0xff] }
 0xfc7   :  { %v4997_v50 = vpop.f32.mrf.mxu3 }
 0xfc9   :  { %v2082_v53 = vpop.xlane.xlu1 %2081 }
 0xfca   :  { %4223 = vrcp.f32 %v2082_v53 }
 0xfcc   :  { %v4222_v52 = vpop.eup %4221  ;;  %3945 = vmatmul.msk.f32.gmra.mxu2 %vm150_vm0, %v4795_v38 }
 0xfcd   :  { %v2018_v9 = vsel %vm244_vm1, %v4222_v52, 0.0 }
 0xfce   :  { %2019 = vadd.xlane.f32.xlu0 %v2018_v9 }
 0xfcf   :  { %v1979_v57 = vpop.f32.mrf.mxu3 }
 0xfd0   :  { %v1980_v13 = vadd.f32 %v4140_v56, %v1979_v57  ;;  %v4224_v8 = vpop.eup %4223 }
 0xfd1   :  { %v2084_v22 = vmul.f32 %v4224_v8, %v4220_v41  ;;  %v4142_v8 = vld [vmem:[%s5422_s21 + $0x3] ss:$0 sm:$0xff] }
 0xfd2   :  { %2041 = vmatpush.msra.mxu1 %v1980_v13 }
 0xfd4   :  { %2134 = vmatpush.msrb.mxu1 %v5045_v46 }
 0xfd7   :  { %v1982_v48 = vpop.f32.mrf.mxu3 }
 0xfd8   :  { %v1983_v60 = vadd.f32 %v4140_v56, %v1982_v48 }
 0xfda   :  { %2103 = vmatpush.msra.mxu0 %v1983_v60 }
 0xfdb   :  { %3935 = vmatmul.msk.f32.vlgmr.msra.gmra.mxu0 %vm244_vm1, %v2084_v22 }
 0xfdf   :  { %v2206_v53 = vpop.f32.mrf.mxu3 }
 0xfe0   :  { %v2207_v9 = vadd.f32 %v4141_v49, %v2206_v53 }
 0xfe7   :  { %v2209_v57 = vpop.f32.mrf.mxu3 }
 0xfe8   :  { %v2210_v13 = vadd.f32 %v4141_v49, %v2209_v57 }
 0xfea   :  { %3963 = vmatpush.xpose.msk.msrb.mxu3 %vm244_vm1, %v2210_v13 }
 0xfee   :  { %2533 = vmatpush.msra.mxu3 %v4739_v14 }
 0xff0   :  { %2534 = vmatpush.msra.mxu3 %v4745_v16  ;;  %v5062_v16 = vld [vmem:[%s4455_s30 + $0x78] sm:$0xff] }
 0xff1   :  { %2234 = vmatpush.msrb.mxu0 %v5062_v16 }
 0xff2   :  { %2535 = vmatpush.msra.mxu3 %v4753_v18  ;;  %v1879_v18 = vadd.f32 %v4981_v21, %v4995_v44 }
 0xff4   :  { %2536 = vmatpush.msra.mxu3 %v4769_v25 }
0x1041   :  { %v2020_v40 = vpop.xlane.xlu0 %2019 }
0x1042   :  { %4225 = vrcp.f32 %v2020_v40 }
0x1047   :  { %v2171_v56 = vpop.f32.mrf.mxu2 }
0x1048   :  { %v4226_v41 = vpop.eup %4225  ;;  %v2172_v14 = vadd.f32 %v4142_v8, %v2171_v56  ;;  %v1882_v56 = vadd.f32 %v4984_v32, %v4997_v50 }
0x1049   :  { %v2022_v43 = vmul.f32 %v4226_v41, %v4222_v52 }
0x104b   :  { %3932 = vmatmul.msk.f32.vlgmr.msra.gmra.mxu1 %vm244_vm1, %v2022_v43  ;;  %v2177_v43 = vmul.f32 0.35355338, %v2172_v14 }
0x104c   :  { %3960 = vmatpush.xpose.msk.msra.mxu1 %vm244_vm1, %v2207_v9 }
0x104f   :  { %v2174_v52 = vpop.f32.mrf.mxu2 }
0x1050   :  { %v2175_v48 = vadd.f32 %v4142_v8, %v2174_v52  ;;  %v5080_v52 = vld [vmem:[%s4455_s30 + $0x70] sm:$0xff] }
0x1051   :  { %2235 = vmatpush.msrb.mxu0 %v5080_v52 }
0x1052   :  { %v2178_v22 = vmul.f32 0.35355338, %v2175_v48  ;;  %v5084_v48 = vld [vmem:[%s4455_s30 + $0x68] sm:$0xff] }
0x1053   :  { %2236 = vmatpush.msrb.mxu0 %v5084_v48 }
0x1054   :  { %3964 = vmatmul.msk.f32.vlgmr.msrb.gmra.mxu3 %vm244_vm1, %v2178_v22 }
0x1058   :  { %v2105_v45 = vpop.f32.mrf.mxu0 }
0x1059   :  { %2108 = vst.msk [vmem:[#allocation2 + $0x8] sm:$0xff] %vm244_vm1, %v2105_v45 }
0x1060   :  { %v2110_v41 = vld [vmem:[#allocation2 + $0x8] sm:$0xff] }
0x10c8   :  { %v2043_v60 = vpop.f32.mrf.mxu1 }
0x10c9   :  { %2046 = vst.msk [vmem:[#allocation2] sm:$0xff] %vm244_vm1, %v2043_v60  ;;  %v5087_v60 = vld [vmem:[%s4455_s30 + $0x60] sm:$0xff]  ;;  %s5431_s30 = sld [smem:[#allocation18_spill]] }
0x10ca   :  { %2237 = vmatpush.msrb.mxu0 %v5087_v60 }
0x10cb   :  { %3958 = vmatmul.msk.f32.vlgmr.msrb.gmra.mxu0 %vm150_vm0, %v4777_v27 }
0x10d0   :  { %v2109_v40 = vld [vmem:[#allocation2] sm:$0xff] }
0x10d1   :  { %3937 = vmatmul.msk.f32.vlgmr.msrb.gmra.mxu1 %vm244_vm1, %v2109_v40 }
0x10d3   :  { %3959 = vmatmul.msk.f32.gmra.mxu0 %vm150_vm0, %v4795_v38 }
0x10d7   :  { %v2330_v25 = vpop.f32.mrf.mxu3 }
0x10d8   :  { %v2333_v49 = vsel %vm4865_vm10, -1e+09, %v2330_v25 }
0x10d9   :  { %3938 = vmatmul.msk.f32.gmra.mxu1 %vm244_vm1, %v2110_v41  ;;  %v2334_v9 = vsel %vm244_vm1, %v2333_v49, -inf }
0x10da   :  { %2335 = vmax.xlane.f32.xlu1 %v2334_v9 }
0x10e1   :  { %3961 = vmatmul.msk.f32.vlgmr.msra.gmra.mxu1 %vm244_vm1, %v2177_v43 }
0x114d   :  { %v2336_v58 = vpop.xlane.xlu1 %2335 }
0x114e   :  { %v2136_v45 = vpop.f32.mrf.mxu1  ;;  %v2337_v32 = vsub.f32 %v2333_v49, %v2336_v58 }
0x114f   :  { %v5069_v53 = vadd.f32 %v2136_v45, %v1879_v18  ;;  %v5097_v18 = vld [vmem:[%s5427_s3] ss:$0 sm:$0xff] }
0x1150   :  { %v2338_v50 = vmul.f32 1.442695, %v2337_v32  ;;  %v1312_v45 = vadd.f32 %v5097_v18, %v4861_v55 }
0x1152   :  { %4227 = vpow2.f32 %v2338_v50  ;;  %v1317_v9 = vadd.f32 %v1312_v45, %v4811_v51 }
0x1156   :  { %v2139_v57 = vpop.f32.mrf.mxu1 }
0x1157   :  { %v5074_v13 = vadd.f32 %v2139_v57, %v1882_v56  ;;  %v1319_v56 = vsel %vm150_vm0, %v1317_v9, 0.0  ;;  %v4143_v57 = vld [vmem:[%s5423_s25 + $0x3] ss:$0 sm:$0xff] }
0x1158   :  { %v4228_v22 = vpop.eup %4227 }
0x1159   :  { %v2340_v40 = vsel %vm244_vm1, %v4228_v22, 0.0 }
0x115e   :  { %v2268_v8 = vpop.f32.mrf.mxu1 }
0x115f   :  { %v2271_v21 = vsel %vm4865_vm10, -1e+09, %v2268_v8  ;;  %v2239_v8 = vpop.f32.mrf.mxu0 }
0x1160   :  { %v2272_v44 = vsel %vm244_vm1, %v2271_v21, -inf }
0x1161   :  { %2273 = vmax.xlane.f32.xlu2 %v2272_v44  ;;  %v2240_v44 = vadd.f32 %v4143_v57, %v2239_v8 }
0x1163   :  { %2301 = vmatpush.msra.mxu2 %v2240_v44 }
0x1165   :  { %2494 = vmatpush.msrb.mxu2 %v4742_v15 }
0x1167   :  { %2495 = vmatpush.msrb.mxu2 %v4750_v17  ;;  %v2242_v55 = vpop.f32.mrf.mxu0 }
0x1168   :  { %v2243_v58 = vadd.f32 %v4143_v57, %v2242_v55 }
0x1169   :  { %2341 = vadd.xlane.f32.xlu2 %v2340_v40  ;;  %2496 = vmatpush.msrb.mxu2 %v4756_v19 }
0x116a   :  { %2363 = vmatpush.msra.mxu0 %v2243_v58 }
0x116b   :  { %2497 = vmatpush.msrb.mxu2 %v4772_v26 }
0x116c   :  { %2564 = vmatpush.msrb.mxu0 %v4759_v20 }
0x116e   :  { %2565 = vmatpush.msrb.mxu0 %v4764_v23 }
0x1170   :  { %2566 = vmatpush.msrb.mxu0 %v4781_v31 }
0x1172   :  { %2567 = vmatpush.msrb.mxu0 %v4790_v34 }
0x11d4   :  { %v2274_v41 = vpop.xlane.xlu2 %2273 }
0x11d5   :  { %v2275_v14 = vsub.f32 %v2271_v21, %v2274_v41 }
0x11d7   :  { %v2276_v43 = vmul.f32 1.442695, %v2275_v14 }
0x11d9   :  { %4229 = vpow2.f32 %v2276_v43 }
0x11dc   :  { %v2342_v21 = vpop.xlane.xlu2 %2341 }
0x11dd   :  { %4231 = vrcp.f32 %v2342_v21 }
0x11df   :  { %v4230_v25 = vpop.eup %4229 }
0x11e0   :  { %v2278_v49 = vsel %vm244_vm1, %v4230_v25, 0.0 }
0x11e1   :  { %2279 = vadd.xlane.f32.xlu0 %v2278_v49 }
0x11e3   :  { %v4232_v51 = vpop.eup %4231 }
0x11e4   :  { %v2344_v32 = vmul.f32 %v4232_v51, %v4228_v22  ;;  %v5118_v22 = vld [vmem:[%s5426_s29 + $0x18] sm:$0xff] }
0x11e5   :  { %2394 = vmatpush.msrb.mxu1 %v5118_v22 }
0x11e6   :  { %3965 = vmatmul.msk.f32.vlgmr.msra.gmra.mxu0 %vm244_vm1, %v2344_v32  ;;  %v4144_v32 = vld [vmem:[%s5428_s8] ss:$0 sm:$0xff] }
0x11e9   :  { %1320 = vadd.xlane.f32.xlu0 %v1319_v56 }
0x1254   :  { %v2280_v15 = vpop.xlane.xlu0 %2279 }
0x1255   :  { %4233 = vrcp.f32 %v2280_v15 }
0x125b   :  { %v4234_v17 = vpop.eup %4233 }
0x125c   :  { %v2282_v19 = vmul.f32 %v4234_v17, %v4230_v25  ;;  %v1321_v50 = vpop.xlane.xlu0 %1320 }
0x125d   :  { %v1325_v26 = vmul.f32 %v1321_v50, %v4719_v33 }
0x125e   :  { %3962 = vmatmul.msk.f32.vlgmr.msra.gmra.mxu2 %vm244_vm1, %v2282_v19 }
0x125f   :  { %v1327_v20 = vsub.f32 %v1317_v9, %v1325_v26  ;;  %v5141_v26 = vld [vmem:[%s5423_s25] ss:$0 sm:$0xff] }
0x1261   :  { %v1329_v40 = vmul.f32 %v1327_v20, %v1327_v20 }
0x1263   :  { %v1331_v23 = vsel %vm150_vm0, %v1329_v40, 0.0  ;;  %v2365_v31 = vpop.f32.mrf.mxu0 }
0x1264   :  { %1332 = vadd.xlane.f32.xlu2 %v1331_v23  ;;  %2368 = vst.msk [vmem:[#allocation2 + $0x8] sm:$0xff] %vm244_vm1, %v2365_v31 }
0x126b   :  { %v2370_v55 = vld [vmem:[#allocation2 + $0x8] sm:$0xff] }
0x12d7   :  { %v1333_v34 = vpop.xlane.xlu2 %1332 }
0x12d8   :  { %v1337_v41 = vmul.f32 %v1333_v34, %v4719_v33 }
0x12da   :  { %v1339_v14 = vadd.f32 1e-05, %v1337_v41  ;;  %v5147_v41 = vld [vmem:[%s5420_s13] ss:$0 sm:$0xff] }
0x12dc   :  { %4235 = vrsqrt.f32 %v1339_v14  ;;  %vm1347_vm12 = vweird.f32 %v1339_v14 }
0x12e1   :  { %v2303_v43 = vpop.f32.mrf.mxu2 }
0x12e2   :  { %v4236_v25 = vpop.eup %4235  ;;  %2306 = vst.msk [vmem:[#allocation2] sm:$0xff] %vm244_vm1, %v2303_v43 }
0x12e3   :  { %v1342_v45 = vmul.f32 %v4236_v25, %v1339_v14  ;;  %vm1348_vm11 = vweird.f32 %v4236_v25 }
0x12e4   :  { %vm1349_vm13 = vmor %vm1347_vm12, %vm1348_vm11 }
0x12e5   :  { %v1343_v49 = vmul.f32 %v4236_v25, %v1342_v45 }
0x12e7   :  { %v1344_v9 = vmul.f32 0.5, %v1343_v49 }
0x12e9   :  { %v1345_v56 = vsub.f32 1.5, %v1344_v9  ;;  %v2369_v57 = vld [vmem:[#allocation2] sm:$0xff] }
0x12ea   :  { %3967 = vmatmul.msk.f32.vlgmr.msrb.gmra.mxu1 %vm244_vm1, %v2369_v57 }
0x12eb   :  { %v1346_v8 = vmul.f32 %v4236_v25, %v1345_v56 }
0x12ed   :  { %v1350_v44 = vsel %vm1349_vm13, %v4236_v25, %v1346_v8 }
0x12ee   :  { %v1361_v21 = vmul.f32 %v1350_v44, %v1327_v20 }
0x12f0   :  { %v1363_v58 = vmul.f32 %v4798_v42, %v1361_v21  ;;  %v1315_v42 = vadd.f32 %v5097_v18, %v4863_v29 }
0x12f2   :  { %v5127_v51 = vadd.f32 %v4807_v47, %v1363_v58  ;;  %3968 = vmatmul.msk.f32.gmra.mxu1 %vm244_vm1, %v2370_v55 }
0x12f4   :  { %3971 = vmatmul.msk.f32.vlgmr.msra.gmra.mxu3 %vm150_vm0, %v5127_v51  ;;  %3973 = vmatmul.msk.f32.vlgmr.msrb.gmra.mxu0 %vm150_vm0, %v5127_v51 }
0x1367   :  { %v2396_v15 = vpop.f32.mrf.mxu1 }
0x1368   :  { %v2402_v17 = vadd.f32 %v2396_v15, %v5069_v53  ;;  %v1318_v53 = vadd.f32 %v1315_v42, %v4825_v59 }
0x136a   :  { %v2408_v19 = vadd.f32 %v4144_v32, %v2402_v17  ;;  %v1322_v29 = vsel %vm150_vm0, %v1318_v53, 0.0 }
0x136c   :  { %v2410_v50 = vadd.f32 %v2408_v19, %v4777_v27 }
0x136e   :  { %v2412_v47 = vsel %vm150_vm0, %v2410_v50, 0.0 }
0x136f   :  { %2413 = vadd.xlane.f32.xlu1 %v2412_v47  ;;  %v2399_v20 = vpop.f32.mrf.mxu1 }
0x1370   :  { %v2403_v40 = vadd.f32 %v2399_v20, %v5074_v13 }
0x1371   :  { %v2569_v23 = vpop.f32.mrf.mxu0 }
0x1372   :  { %v2409_v31 = vadd.f32 %v4144_v32, %v2403_v40  ;;  %v2570_v34 = vadd.f32 %v5141_v26, %v2569_v23 }
0x1374   :  { %2630 = vmatpush.msra.mxu2 %v2570_v34  ;;  %v2411_v27 = vadd.f32 %v2409_v31, %v4795_v38 }
0x1376   :  { %v2415_v18 = vsel %vm150_vm0, %v2411_v27, 0.0 }
0x1377   :  { %1323 = vadd.xlane.f32.xlu1 %v1322_v29  ;;  %v2538_v14 = vpop.f32.mrf.mxu3  ;;  %2416 = vadd.xlane.f32.xlu2 %v2415_v18 }
0x1378   :  { %v2539_v13 = vadd.f32 %v5147_v41, %v2538_v14 }
0x137a   :  { %3975 = vmatpush.xpose.msk.msra.mxu1 %vm244_vm1, %v2539_v13 }
0x13e2   :  { %v2414_v43 = vpop.xlane.xlu1 %2413 }
0x13e3   :  { %v2418_v25 = vmul.f32 %v2414_v43, %v4719_v33 }
0x13e5   :  { %v2420_v59 = vsub.f32 %v2410_v50, %v2418_v25  ;;  %v4147_v25 = vld [vmem:[%s5429_s14] ss:$0 sm:$0xff] }
0x13e7   :  { %v2422_v45 = vmul.f32 %v2420_v59, %v2420_v59 }
0x13e9   :  { %v2424_v49 = vsel %vm150_vm0, %v2422_v45, 0.0 }
0x13ea   :  { %2425 = vadd.xlane.f32.xlu0 %v2424_v49  ;;  %v1324_v38 = vpop.xlane.xlu1 %1323  ;;  %v2417_v9 = vpop.xlane.xlu2 %2416 }
0x13eb   :  { %v1326_v56 = vmul.f32 %v1324_v38, %v4719_v33  ;;  %v2419_v57 = vmul.f32 %v2417_v9, %v4719_v33  ;;  %v4148_v9 = vld [vmem:[%s4500_s4] ss:$0 sm:$0xff] }
0x13ed   :  { %v1328_v8 = vsub.f32 %v1318_v53, %v1326_v56  ;;  %v2421_v44 = vsub.f32 %v2411_v27, %v2419_v57 }
0x13ef   :  { %v1330_v21 = vmul.f32 %v1328_v8, %v1328_v8  ;;  %v2423_v55 = vmul.f32 %v2421_v44, %v2421_v44 }
0x13f1   :  { %v1334_v58 = vsel %vm150_vm0, %v1330_v21, 0.0  ;;  %v2427_v32 = vsel %vm150_vm0, %v2423_v55, 0.0 }
0x13f2   :  { %1335 = vadd.xlane.f32.xlu0 %v1334_v58  ;;  %2428 = vadd.xlane.f32.xlu1 %v2427_v32 }
0x145d   :  { %v2426_v15 = vpop.xlane.xlu0 %2425 }
0x145e   :  { %v2430_v17 = vmul.f32 %v2426_v15, %v4719_v33 }
0x1460   :  { %v2432_v19 = vadd.f32 1e-05, %v2430_v17 }
0x1462   :  { %4237 = vrsqrt.f32 %v2432_v19  ;;  %vm2440_vm15 = vweird.f32 %v2432_v19 }
0x1465   :  { %v1336_v50 = vpop.xlane.xlu0 %1335  ;;  %v2429_v42 = vpop.xlane.xlu1 %2428 }
0x1466   :  { %v1338_v47 = vmul.f32 %v1336_v50, %v4719_v33  ;;  %v2431_v20 = vmul.f32 %v2429_v42, %v4719_v33 }
0x1468   :  { %v4238_v40 = vpop.eup %4237  ;;  %v1340_v23 = vadd.f32 1e-05, %v1338_v47  ;;  %v2433_v31 = vadd.f32 1e-05, %v2431_v20 }
0x1469   :  { %v2435_v34 = vmul.f32 %v4238_v40, %v2432_v19  ;;  %vm2441_vm14 = vweird.f32 %v4238_v40 }
0x146a   :  { %4239 = vrsqrt.f32 %v1340_v23  ;;  %vm2442_vm2 = vmor %vm2440_vm15, %vm2441_vm14  ;;  %vm1357_vm5 = vweird.f32 %v1340_v23  ;;  %vm2450_vm7 = vweird.f32 %v2433_v31 }
0x146b   :  { %v2436_v53 = vmul.f32 %v4238_v40, %v2435_v34  ;;  %4241 = vrsqrt.f32 %v2433_v31 }
0x146d   :  { %v2437_v27 = vmul.f32 0.5, %v2436_v53 }
0x146f   :  { %v2438_v29 = vsub.f32 1.5, %v2437_v27 }
0x1470   :  { %v4240_v18 = vpop.eup %4239 }
0x1471   :  { %v4242_v14 = vpop.eup %4241  ;;  %v2439_v13 = vmul.f32 %v4238_v40, %v2438_v29  ;;  %v1352_v43 = vmul.f32 %v4240_v18, %v1340_v23  ;;  %vm1358_vm3 = vweird.f32 %v4240_v18  ;;  %v4284_v23 = vld [vmem:[%s5418_s5] ss:$0 sm:$0xff]  ;;  %v3982_v29 = vld [vmem:[%s4435_s27 + $0x28] sm:$0xff] }
0x1472   :  { %v2445_v45 = vmul.f32 %v4242_v14, %v2433_v31  ;;  %vm2451_vm4 = vweird.f32 %v4242_v14  ;;  %vm1359_vm6 = vmor %vm1357_vm5, %vm1358_vm3 }
0x1473   :  { %v2443_v49 = vsel %vm2442_vm2, %v4238_v40, %v2439_v13  ;;  %v1353_v38 = vmul.f32 %v4240_v18, %v1352_v43  ;;  %vm2452_vm8 = vmor %vm2450_vm7, %vm2451_vm4  ;;  %v4283_v40 = vld [vmem:[%s5417_s0] ss:$0 sm:$0xff] }
0x1474   :  { %v2454_v56 = vmul.f32 %v2443_v49, %v2420_v59  ;;  %v2446_v57 = vmul.f32 %v4242_v14, %v2445_v45 }
0x1475   :  { %v1354_v21 = vmul.f32 0.5, %v1353_v38 }
0x1476   :  { %v2460_v55 = vmul.f32 %v4147_v25, %v2454_v56  ;;  %v2447_v58 = vmul.f32 0.5, %v2446_v57 }
0x1477   :  { %v1355_v32 = vsub.f32 1.5, %v1354_v21 }
0x1478   :  { %v5165_v15 = vadd.f32 %v4148_v9, %v2460_v55  ;;  %v2448_v17 = vsub.f32 1.5, %v2447_v58 }
0x1479   :  { %v1356_v19 = vmul.f32 %v4240_v18, %v1355_v32 }
0x147a   :  { %v2449_v50 = vmul.f32 %v4242_v14, %v2448_v17  ;;  %3969 = vmatmul.msk.f32.vlgmr.msrb.gmra.mxu2 %vm150_vm0, %v5165_v15 }
0x147b   :  { %v1360_v59 = vsel %vm1359_vm6, %v4240_v18, %v1356_v19  ;;  %v3981_v18 = vld [vmem:[%s4435_s27 + $0x20] sm:$0xff] }
0x147c   :  { %v1362_v42 = vmul.f32 %v1360_v59, %v1328_v8  ;;  %v2453_v47 = vsel %vm2452_vm8, %v4242_v14, %v2449_v50  ;;  %v3984_v8 = vld [vmem:[%s4435_s27 + $0x38] sm:$0xff]  ;;  %v4149_v14 = vld [vmem:[%s5422_s21] ss:$0 sm:$0xff] }
0x147d   :  { %v2455_v20 = vmul.f32 %v2453_v47, %v2421_v44  ;;  %2720 = vmatpush.msrb.mxu1 %v3984_v8  ;;  %v3983_v44 = vld [vmem:[%s4435_s27 + $0x30] sm:$0xff]  ;;  %v3991_v59 = vld [vmem:[%s4445_s6 + $0x38] sm:$0xff]  ;;  %v3989_v47 = vld [vmem:[%s4445_s6 + $0x28] sm:$0xff]  ;;  %s5433_s27 = sld [smem:[#allocation19_spill]] }
0x147e   :  { %v1364_v34 = vmul.f32 %v4283_v40, %v1362_v42  ;;  %2753 = vmatpush.msrb.mxu2 %v3991_v59  ;;  %v3990_v42 = vld [vmem:[%s4445_s6 + $0x30] sm:$0xff] }
0x147f   :  { %v2461_v53 = vmul.f32 %v4147_v25, %v2455_v20  ;;  %2721 = vmatpush.msrb.mxu1 %v3983_v44  ;;  %v3988_v20 = vld [vmem:[%s4445_s6 + $0x20] sm:$0xff] }
0x1480   :  { %v5171_v27 = vadd.f32 %v4284_v23, %v1364_v34  ;;  %2754 = vmatpush.msrb.mxu2 %v3990_v42 }
0x1481   :  { %v5173_v31 = vadd.f32 %v4148_v9, %v2461_v53  ;;  %2722 = vmatpush.msrb.mxu1 %v3982_v29 }
0x1482   :  { %3972 = vmatmul.msk.f32.gmra.mxu3 %vm150_vm0, %v5171_v27  ;;  %3974 = vmatmul.msk.f32.gmra.mxu0 %vm150_vm0, %v5171_v27 }
0x1483   :  { %3970 = vmatmul.msk.f32.gmra.mxu2 %vm150_vm0, %v5173_v31  ;;  %2723 = vmatpush.msrb.mxu1 %v3981_v18 }
0x1484   :  { %2755 = vmatpush.msrb.mxu2 %v3989_v47 }
0x1486   :  { %2756 = vmatpush.msrb.mxu2 %v3988_v20 }
0x14fd   :  { %v2499_v13 = vpop.f32.mrf.mxu2 }
0x14fe   :  { %v2500_v43 = vadd.f32 %v4149_v14, %v2499_v13 }
0x14ff   :  { %v2572_v25 = vpop.f32.mrf.mxu0 }
0x1500   :  { %v2505_v45 = vmul.f32 0.35355338, %v2500_v43  ;;  %v2573_v49 = vadd.f32 %v5141_v26, %v2572_v25  ;;  %v4150_v43 = vld [vmem:[%s5422_s21 + $0x1] ss:$0 sm:$0xff] }
0x1501   :  { %v4152_v25 = vld [vmem:[%s5420_s13 + $0x1] ss:$0 sm:$0xff] }
0x1502   :  { %3976 = vmatmul.msk.f32.vlgmr.msra.gmra.mxu1 %vm244_vm1, %v2505_v45  ;;  %2691 = vmatpush.msra.mxu0 %v2573_v49 }
0x1505   :  { %v2541_v38 = vpop.f32.mrf.mxu3 }
0x1506   :  { %v2502_v9 = vpop.f32.mrf.mxu2  ;;  %v2542_v56 = vadd.f32 %v5147_v41, %v2541_v38 }
0x1507   :  { %v2503_v57 = vadd.f32 %v4149_v14, %v2502_v9 }
0x1508   :  { %3978 = vmatpush.xpose.msk.msrb.mxu3 %vm244_vm1, %v2542_v56 }
0x1509   :  { %v2506_v21 = vmul.f32 0.35355338, %v2503_v57 }
0x150a   :  { %3986 = vmatmul.msk.f32.vlgmr.msrb.gmra.mxu1 %vm150_vm0, %v5165_v15 }
0x150b   :  { %3979 = vmatmul.msk.f32.vlgmr.msrb.gmra.mxu3 %vm244_vm1, %v2506_v21 }
0x150c   :  { %2784 = vmatpush.msra.mxu3 %v4879_v2 }
0x150e   :  { %2785 = vmatpush.msra.mxu3 %v4882_v3 }
0x1510   :  { %2786 = vmatpush.msra.mxu3 %v4886_v4 }
0x1512   :  { %2787 = vmatpush.msra.mxu3 %v4891_v5  ;;  %3987 = vmatmul.msk.f32.gmra.mxu1 %vm150_vm0, %v5173_v31 }
0x1513   :  { %4000 = vmatmul.msk.f32.vlgmr.msra.gmra.mxu3 %vm150_vm0, %v5127_v51 }
0x1514   :  { %2941 = vmatpush.msrb.mxu3 %v4961_v61  ;;  %v4151_v61 = vld [vmem:[%s5423_s25 + $0x1] ss:$0 sm:$0xff] }
0x1516   :  { %3062 = vmatpush.msra.mxu3 %v4965_v0 }
0x1518   :  { %3063 = vmatpush.msra.mxu3 %v4968_v6 }
0x151a   :  { %3064 = vmatpush.msra.mxu3 %v4972_v7 }
0x151b   :  { %4001 = vmatmul.msk.f32.gmra.mxu3 %vm150_vm0, %v5171_v27 }
0x151c   :  { %3065 = vmatpush.msra.mxu3 %v4976_v11 }
0x157f   :  { %v2598_v2 = vpop.f32.mrf.mxu1 }
0x1580   :  { %v2601_v3 = vsel %vm244_vm1, %v2598_v2, -inf }
0x1581   :  { %2602 = vmax.xlane.f32.xlu2 %v2601_v3 }
0x1587   :  { %v2725_v13 = vpop.f32.mrf.mxu1 }
0x1588   :  { %v2726_v45 = vadd.f32 %v4150_v43, %v2725_v13 }
0x158a   :  { %v2731_v56 = vmul.f32 0.35355338, %v2726_v45 }
0x158e   :  { %v2659_v4 = vpop.f32.mrf.mxu3 }
0x158f   :  { %v2662_v5 = vsel %vm244_vm1, %v2659_v4, -inf  ;;  %v2728_v57 = vpop.f32.mrf.mxu1 }
0x1590   :  { %2663 = vmax.xlane.f32.xlu1 %v2662_v5  ;;  %v2729_v21 = vadd.f32 %v4150_v43, %v2728_v57 }
0x1596   :  { %v2789_v26 = vpop.f32.mrf.mxu3 }
0x1597   :  { %v2790_v0 = vadd.f32 %v4151_v61, %v2789_v26 }
0x159e   :  { %v2792_v34 = vpop.f32.mrf.mxu3 }
0x159f   :  { %v2793_v8 = vadd.f32 %v4151_v61, %v2792_v34 }
0x15f4   :  { %v2603_v6 = vpop.xlane.xlu2 %2602 }
0x15f5   :  { %v2604_v7 = vsub.f32 %v2598_v2, %v2603_v6 }
0x15f7   :  { %v2605_v41 = vmul.f32 1.442695, %v2604_v7 }
0x15f9   :  { %4243 = vpow2.f32 %v2605_v41 }
0x15ff   :  { %v4244_v11 = vpop.eup %4243 }
0x1600   :  { %v2607_v55 = vsel %vm244_vm1, %v4244_v11, 0.0 }
0x1601   :  { %2608 = vadd.xlane.f32.xlu0 %v2607_v55 }
0x1603   :  { %v2664_v58 = vpop.xlane.xlu1 %2663 }
0x1604   :  { %v2665_v32 = vsub.f32 %v2659_v4, %v2664_v58  ;;  %v2732_v4 = vmul.f32 0.35355338, %v2729_v21  ;;  %v4023_v58 = vld [vmem:[%s4445_s6 + $0x58] sm:$0xff]  ;;  %v4155_v21 = vld [vmem:[%s5423_s25 + $0x2] ss:$0 sm:$0xff] }
0x1606   :  { %v2666_v17 = vmul.f32 1.442695, %v2665_v32  ;;  %v4022_v32 = vld [vmem:[%s4445_s6 + $0x50] sm:$0xff] }
0x1608   :  { %4245 = vpow2.f32 %v2666_v17  ;;  %v4021_v17 = vld [vmem:[%s4445_s6 + $0x48] sm:$0xff] }
0x160e   :  { %v4246_v19 = vpop.eup %4245 }
0x160f   :  { %v2668_v50 = vsel %vm244_vm1, %v4246_v19, 0.0 }
0x1610   :  { %2669 = vadd.xlane.f32.xlu2 %v2668_v50 }
0x1674   :  { %v2609_v40 = vpop.xlane.xlu0 %2608 }
0x1675   :  { %4247 = vrcp.f32 %v2609_v40 }
0x167b   :  { %v4248_v53 = vpop.eup %4247 }
0x167c   :  { %v2611_v23 = vmul.f32 %v4248_v53, %v4244_v11 }
0x167e   :  { %3977 = vmatmul.msk.f32.vlgmr.msra.gmra.mxu2 %vm244_vm1, %v2611_v23 }
0x167f   :  { %2911 = vmatpush.msra.mxu2 %v2793_v8 }
0x1683   :  { %v2670_v44 = vpop.xlane.xlu2 %2669 }
0x1684   :  { %4249 = vrcp.f32 %v2670_v44 }
0x1686   :  { %3993 = vmatmul.msk.f32.vlgmr.msrb.gmra.mxu2 %vm150_vm0, %v5127_v51 }
0x1687   :  { %3031 = vmatpush.msrb.mxu2 %v4023_v58 }
0x1689   :  { %3032 = vmatpush.msrb.mxu2 %v4022_v32 }
0x168a   :  { %v4250_v29 = vpop.eup %4249 }
0x168b   :  { %v2672_v18 = vmul.f32 %v4250_v29, %v4246_v19  ;;  %v4020_v19 = vld [vmem:[%s4445_s6 + $0x40] sm:$0xff]  ;;  %3033 = vmatpush.msrb.mxu2 %v4021_v17  ;;  %s5432_s6 = sld [smem:[#allocation17_spill]] }
0x168d   :  { %3980 = vmatmul.msk.f32.vlgmr.msra.gmra.mxu0 %vm244_vm1, %v2672_v18  ;;  %3034 = vmatpush.msrb.mxu2 %v4020_v19  ;;  %v4153_v18 = vld [vmem:[%s5422_s21 + $0x2] ss:$0 sm:$0xff] }
0x168e   :  { %3994 = vmatmul.msk.f32.gmra.mxu2 %vm150_vm0, %v5171_v27 }
0x1701   :  { %v2632_v14 = vpop.f32.mrf.mxu2 }
0x1702   :  { %2635 = vst.msk [vmem:[#allocation2] sm:$0xff] %vm244_vm1, %v2632_v14  ;;  %v4154_v14 = vld [vmem:[%s5420_s13 + $0x2] ss:$0 sm:$0xff] }
0x1709   :  { %v2758_v49 = vpop.f32.mrf.mxu2  ;;  %v2697_v34 = vld [vmem:[#allocation2] sm:$0xff] }
0x170a   :  { %v2759_v38 = vadd.f32 %v4152_v25, %v2758_v49  ;;  %v2693_v9 = vpop.f32.mrf.mxu0 }
0x170b   :  { %2696 = vst.msk [vmem:[#allocation2 + $0x8] sm:$0xff] %vm244_vm1, %v2693_v9 }
0x170c   :  { %4002 = vmatpush.xpose.msk.msrb.mxu0 %vm244_vm1, %v2759_v38 }
0x170f   :  { %4003 = vmatmul.msk.f32.vlgmr.msrb.gmra.mxu0 %vm244_vm1, %v2731_v56 }
0x1710   :  { %2850 = vmatpush.msra.mxu0 %v2790_v0 }
0x1711   :  { %v2761_v2 = vpop.f32.mrf.mxu2 }
0x1712   :  { %2970 = vmatpush.msrb.mxu0 %v4949_v54  ;;  %v2762_v3 = vadd.f32 %v4152_v25, %v2761_v2  ;;  %v2698_v53 = vld [vmem:[#allocation2 + $0x8] sm:$0xff] }
0x1714   :  { %4005 = vmatpush.xpose.msk.msra.mxu1 %vm244_vm1, %v2762_v3 }
0x1717   :  { %4006 = vmatmul.msk.f32.vlgmr.msra.gmra.mxu1 %vm244_vm1, %v2732_v4 }
0x1718   :  { %2998 = vmatpush.msrb.mxu1 %v4913_v62 }
0x171a   :  { %2999 = vmatpush.msrb.mxu1 %v4916_v63 }
0x171c   :  { %3000 = vmatpush.msrb.mxu1 %v4921_v10 }
0x171e   :  { %3001 = vmatpush.msrb.mxu1 %v4925_v1 }
0x171f   :  { %4018 = vmatmul.msk.f32.vlgmr.msrb.gmra.mxu1 %vm150_vm0, %v5165_v15 }
0x1727   :  { %4019 = vmatmul.msk.f32.gmra.mxu1 %vm150_vm0, %v5173_v31 }
0x178c   :  { %v2818_v54 = vpop.f32.mrf.mxu0 }
0x178d   :  { %v2821_v5 = vsel %vm244_vm1, %v2818_v54, -inf }
0x178e   :  { %2822 = vmax.xlane.f32.xlu2 %v2821_v5 }
0x1794   :  { %v2879_v61 = vpop.f32.mrf.mxu1 }
0x1795   :  { %v2882_v62 = vsel %vm244_vm1, %v2879_v61, -inf }
0x1796   :  { %2883 = vmax.xlane.f32.xlu0 %v2882_v62  ;;  %v4156_v62 = vld [vmem:[%s5422_s21 + $0x3] ss:$0 sm:$0xff] }
0x179c   :  { %v3003_v29 = vpop.f32.mrf.mxu1 }
0x179d   :  { %v3004_v13 = vadd.f32 %v4153_v18, %v3003_v29 }
0x1801   :  { %v2823_v63 = vpop.xlane.xlu2 %2822 }
0x1802   :  { %v2824_v10 = vsub.f32 %v2818_v54, %v2823_v63 }
0x1804   :  { %v2825_v1 = vmul.f32 1.442695, %v2824_v10  ;;  %v4157_v10 = vld [vmem:[%s5420_s13 + $0x3] ss:$0 sm:$0xff] }
0x1806   :  { %4251 = vpow2.f32 %v2825_v1 }
0x1809   :  { %v2884_v26 = vpop.xlane.xlu0 %2883 }
0x180a   :  { %v2885_v0 = vsub.f32 %v2879_v61, %v2884_v26 }
0x180c   :  { %v4252_v6 = vpop.eup %4251  ;;  %v2886_v7 = vmul.f32 1.442695, %v2885_v0 }
0x180d   :  { %v2827_v41 = vsel %vm244_vm1, %v4252_v6, 0.0 }
0x180e   :  { %4253 = vpow2.f32 %v2886_v7  ;;  %2828 = vadd.xlane.f32.xlu0 %v2827_v41 }
0x1814   :  { %v4254_v11 = vpop.eup %4253 }
0x1815   :  { %v2888_v55 = vsel %vm244_vm1, %v4254_v11, 0.0 }
0x1816   :  { %2889 = vadd.xlane.f32.xlu1 %v2888_v55 }
0x1881   :  { %v2829_v50 = vpop.xlane.xlu0 %2828 }
0x1882   :  { %4255 = vrcp.f32 %v2829_v50 }
0x1888   :  { %v4256_v59 = vpop.eup %4255 }
0x1889   :  { %v2831_v42 = vmul.f32 %v4256_v59, %v4252_v6  ;;  %v2890_v47 = vpop.xlane.xlu1 %2889 }
0x188a   :  { %4257 = vrcp.f32 %v2890_v47 }
0x188b   :  { %4004 = vmatmul.msk.f32.vlgmr.msra.gmra.mxu0 %vm244_vm1, %v2831_v42 }
0x1890   :  { %v4258_v20 = vpop.eup %4257 }
0x1891   :  { %v2892_v40 = vmul.f32 %v4258_v20, %v4254_v11 }
0x1893   :  { %4007 = vmatmul.msk.f32.vlgmr.msra.gmra.mxu2 %vm244_vm1, %v2892_v40  ;;  %4011 = vmatmul.msk.f32.vlgmr.msrb.gmra.mxu0 %vm244_vm1, %v2697_v34 }
0x189b   :  { %4012 = vmatmul.msk.f32.gmra.mxu0 %vm244_vm1, %v2698_v53  ;;  %4025 = vmatmul.msk.f32.vlgmr.msrb.gmra.mxu2 %vm150_vm0, %v5127_v51 }
0x18a3   :  { %4026 = vmatmul.msk.f32.gmra.mxu2 %vm150_vm0, %v5171_v27 }
0x1908   :  { %v2852_v23 = vpop.f32.mrf.mxu0 }
0x1909   :  { %2855 = vst.msk [vmem:[#allocation2] sm:$0xff] %vm244_vm1, %v2852_v23 }
0x1910   :  { %v2917_v8 = vld [vmem:[#allocation2] sm:$0xff] }
0x1911   :  { %4009 = vmatmul.msk.f32.vlgmr.msrb.gmra.mxu3 %vm244_vm1, %v2917_v8 }
0x1912   :  { %3282 = vmatpush.msrb.mxu3 %v5003_v12  ;;  %v3009_v12 = vmul.f32 0.35355338, %v3004_v13 }
0x1914   :  { %3283 = vmatpush.msrb.mxu3 %v5009_v28  ;;  %v3006_v28 = vpop.f32.mrf.mxu1 }
0x1916   :  { %v2913_v44 = vpop.f32.mrf.mxu2  ;;  %3284 = vmatpush.msrb.mxu3 %v5017_v35  ;;  %v3007_v35 = vadd.f32 %v4153_v18, %v3006_v28  ;;  %v4158_v18 = vld [vmem:[%s5423_s25 + $0x3] ss:$0 sm:$0xff] }
0x1917   :  { %2916 = vst.msk [vmem:[#allocation2 + $0x8] sm:$0xff] %vm244_vm1, %v2913_v44 }
0x1918   :  { %3285 = vmatpush.msrb.mxu3 %v5025_v37  ;;  %v3010_v37 = vmul.f32 0.35355338, %v3007_v35 }
0x191e   :  { %v3036_v43 = vpop.f32.mrf.mxu2  ;;  %v2918_v25 = vld [vmem:[#allocation2 + $0x8] sm:$0xff] }
0x191f   :  { %v3037_v45 = vadd.f32 %v4154_v14, %v3036_v43  ;;  %4010 = vmatmul.msk.f32.gmra.mxu3 %vm244_vm1, %v2918_v25 }
0x1921   :  { %4034 = vmatpush.xpose.msk.msra.mxu0 %vm244_vm1, %v3037_v45 }
0x1924   :  { %4035 = vmatmul.msk.f32.vlgmr.msra.gmra.mxu0 %vm244_vm1, %v3009_v12 }
0x1926   :  { %v3039_v49 = vpop.f32.mrf.mxu2 }
0x1927   :  { %v3040_v38 = vadd.f32 %v4154_v14, %v3039_v49  ;;  %4032 = vmatmul.msk.f32.vlgmr.msra.gmra.mxu3 %vm150_vm0, %v5127_v51 }
0x1929   :  { %4037 = vmatpush.xpose.msk.msra.mxu2 %vm244_vm1, %v3040_v38 }
0x192c   :  { %4038 = vmatmul.msk.f32.vlgmr.msra.gmra.mxu2 %vm244_vm1, %v3010_v37 }
0x192d   :  { %3249 = vmatpush.msrb.mxu2 %v5006_v24  ;;  %v5286_v24 = vpop.f32.mrf.mxu0 }
0x192f   :  { %3250 = vmatpush.msrb.mxu2 %v5014_v30  ;;  %4033 = vmatmul.msk.f32.gmra.mxu3 %vm150_vm0, %v5171_v27 }
0x1931   :  { %3251 = vmatpush.msrb.mxu2 %v5020_v36 }
0x1933   :  { %3252 = vmatpush.msrb.mxu2 %v5033_v39 }
0x1934   :  { %4048 = vmatmul.msk.f32.vlgmr.msrb.gmra.mxu2 %vm150_vm0, %v5165_v15 }
0x1935   :  { %v2975_v30 = vpop.f32.mrf.mxu0 }
0x1937   :  { %4055 = vmatmul.msk.f32.vlgmr.msrb.gmra.mxu3 %vm150_vm0, %v5127_v51 }
0x193c   :  { %4049 = vmatmul.msk.f32.gmra.mxu2 %vm150_vm0, %v5173_v31 }
0x193f   :  { %4056 = vmatmul.msk.f32.gmra.mxu3 %vm150_vm0, %v5171_v27 }
0x1994   :  { %v5288_v9 = vpop.f32.mrf.mxu3 }
0x1995   :  { %v2973_v45 = vadd.f32 %v5286_v24, %v5288_v9 }
0x19a1   :  { %v3096_v36 = vpop.f32.mrf.mxu0 }
0x19a2   :  { %v2946_v39 = vpop.f32.mrf.mxu3  ;;  %v3099_v56 = vsel %vm244_vm1, %v3096_v36, -inf }
0x19a3   :  { %v5291_v57 = vadd.f32 %v2975_v30, %v2946_v39  ;;  %3100 = vmax.xlane.f32.xlu1 %v3099_v56 }
0x19aa   :  { %v3067_v2 = vpop.f32.mrf.mxu3 }
0x19ab   :  { %v3068_v3 = vadd.f32 %v4155_v21, %v3067_v2 }
0x19ad   :  { %3128 = vmatpush.msra.mxu1 %v3068_v3 }
0x19af   :  { %3219 = vmatpush.msrb.mxu1 %v5045_v46  ;;  %v3157_v4 = vpop.f32.mrf.mxu2 }
0x19b0   :  { %v3160_v54 = vsel %vm244_vm1, %v3157_v4, -inf }
0x19b1   :  { %3161 = vmax.xlane.f32.xlu2 %v3160_v54 }
0x19b2   :  { %v3070_v5 = vpop.f32.mrf.mxu3 }
0x19b3   :  { %v3071_v61 = vadd.f32 %v4155_v21, %v3070_v5 }
0x19b5   :  { %3189 = vmatpush.msrb.mxu0 %v3071_v61 }
0x19b7   :  { %3313 = vmatpush.msra.mxu0 %v5062_v16  ;;  %v3254_v63 = vpop.f32.mrf.mxu2 }
0x19b8   :  { %v3255_v1 = vadd.f32 %v4156_v62, %v3254_v63 }
0x19b9   :  { %3314 = vmatpush.msra.mxu0 %v5080_v52 }
0x19ba   :  { %v3287_v26 = vpop.f32.mrf.mxu3 }
0x19bb   :  { %3315 = vmatpush.msra.mxu0 %v5084_v48  ;;  %v3288_v0 = vadd.f32 %v4157_v10, %v3287_v26 }
0x19bd   :  { %3316 = vmatpush.msra.mxu0 %v5087_v60 }
0x19bf   :  { %v3257_v46 = vpop.f32.mrf.mxu2 }
0x19c0   :  { %v3258_v6 = vadd.f32 %v4156_v62, %v3257_v46  ;;  %v3546_v46 = vld [vmem:[%s5430_s19 + $0x10] sm:$0xff] }
0x19c2   :  { %v3290_v7 = vpop.f32.mrf.mxu3  ;;  %v3261_v11 = vmul.f32 0.35355338, %v3258_v6  ;;  %v3545_v6 = vld [vmem:[%s5430_s19 + $0x8] sm:$0xff] }
0x19c3   :  { %v3291_v41 = vadd.f32 %v4157_v10, %v3290_v7  ;;  %v3547_v10 = vld [vmem:[%s5430_s19 + $0x18] sm:$0xff]  ;;  %v3544_v7 = vld [vmem:[%s5430_s19] sm:$0xff] }
0x19c5   :  { %4067 = vmatpush.xpose.msk.msra.mxu3 %vm244_vm1, %v3291_v41  ;;  %v4159_v41 = vld [vmem:[%s5428_s8] ss:$0 sm:$0xff] }
0x19c8   :  { %4068 = vmatmul.msk.f32.vlgmr.msra.gmra.mxu3 %vm244_vm1, %v3261_v11 }
0x1a16   :  { %v3101_v16 = vpop.xlane.xlu1 %3100 }
0x1a17   :  { %v3102_v55 = vsub.f32 %v3096_v36, %v3101_v16 }
0x1a19   :  { %v3103_v58 = vmul.f32 1.442695, %v3102_v55 }
0x1a1b   :  { %4259 = vpow2.f32 %v3103_v58 }
0x1a21   :  { %v4260_v52 = vpop.eup %4259 }
0x1a22   :  { %v3105_v32 = vsel %vm244_vm1, %v4260_v52, 0.0 }
0x1a23   :  { %3106 = vadd.xlane.f32.xlu0 %v3105_v32 }
0x1a24   :  { %v3162_v48 = vpop.xlane.xlu2 %3161 }
0x1a25   :  { %v3163_v17 = vsub.f32 %v3157_v4, %v3162_v48 }
0x1a27   :  { %v3164_v60 = vmul.f32 1.442695, %v3163_v17 }
0x1a29   :  { %4261 = vpow2.f32 %v3164_v60 }
0x1a2f   :  { %v4262_v19 = vpop.eup %4261 }
0x1a30   :  { %v3166_v50 = vsel %vm244_vm1, %v4262_v19, 0.0 }
0x1a31   :  { %3167 = vadd.xlane.f32.xlu1 %v3166_v50  ;;  %v3584_v50 = vld [vmem:[%s5431_s30 + $0x8] sm:$0xff] }
0x1a32   :  { %3609 = vmatpush.msrb.mxu3 %v3584_v50 }
0x1a4b   :  { %v3408_v59 = vpop.f32.mrf.mxu3 }
0x1a4c   :  { %v3411_v42 = vsel %vm244_vm1, %v3408_v59, -inf }
0x1a4d   :  { %3412 = vmax.xlane.f32.xlu0 %v3411_v42 }
0x1a96   :  { %v3107_v47 = vpop.xlane.xlu0 %3106 }
0x1a97   :  { %4263 = vrcp.f32 %v3107_v47 }
0x1a9d   :  { %v4264_v20 = vpop.eup %4263 }
0x1a9e   :  { %v3109_v40 = vmul.f32 %v4264_v20, %v4260_v52 }
0x1aa0   :  { %4036 = vmatmul.msk.f32.vlgmr.msra.gmra.mxu1 %vm244_vm1, %v3109_v40 }
0x1aa1   :  { %4064 = vmatpush.xpose.msk.msra.mxu1 %vm244_vm1, %v3288_v0 }
0x1aa4   :  { %v3168_v34 = vpop.xlane.xlu1 %3167 }
0x1aa5   :  { %4265 = vrcp.f32 %v3168_v34 }
0x1aab   :  { %v4266_v53 = vpop.eup %4265 }
0x1aac   :  { %v3170_v23 = vmul.f32 %v4266_v53, %v4262_v19 }
0x1aae   :  { %4039 = vmatmul.msk.f32.vlgmr.msrb.gmra.mxu0 %vm244_vm1, %v3170_v23  ;;  %v4160_v23 = vld [vmem:[%s5432_s6] ss:$0 sm:$0xff] }
0x1ab6   :  { %4062 = vmatmul.msk.f32.vlgmr.msra.gmra.mxu0 %vm150_vm0, %v5127_v51  ;;  %v3260_v51 = vmul.f32 0.35355338, %v3255_v1 }
0x1abe   :  { %4063 = vmatmul.msk.f32.gmra.mxu0 %vm150_vm0, %v5171_v27 }
0x1ac0   :  { %v3413_v28 = vpop.xlane.xlu0 %3412 }
0x1ac1   :  { %v3414_v35 = vsub.f32 %v3408_v59, %v3413_v28  ;;  %v3583_v59 = vld [vmem:[%s5431_s30] sm:$0xff] }
0x1ac2   :  { %3610 = vmatpush.msrb.mxu3 %v3583_v59 }
0x1ac3   :  { %v3415_v37 = vmul.f32 1.442695, %v3414_v35 }
0x1ac5   :  { %4267 = vpow2.f32 %v3415_v37 }
0x1acb   :  { %v4268_v39 = vpop.eup %4267 }
0x1acc   :  { %v3417_v56 = vsel %vm244_vm1, %v4268_v39, 0.0 }
0x1b1d   :  { %v3130_v8 = vpop.f32.mrf.mxu1 }
0x1b1e   :  { %3133 = vst.msk [vmem:[#allocation2] sm:$0xff] %vm244_vm1, %v3130_v8 }
0x1b25   :  { %v3195_v44 = vld [vmem:[#allocation2] sm:$0xff] }
0x1b26   :  { %4041 = vmatmul.msk.f32.vlgmr.msrb.gmra.mxu1 %vm244_vm1, %v3195_v44 }
0x1b27   :  { %3470 = vmatpush.msrb.mxu1 %v5118_v22 }
0x1b2b   :  { %v3191_v29 = vpop.f32.mrf.mxu0 }
0x1b2c   :  { %3194 = vst.msk [vmem:[#allocation2 + $0x8] sm:$0xff] %vm244_vm1, %v3191_v29 }
0x1b33   :  { %v3318_v14 = vpop.f32.mrf.mxu0  ;;  %v3196_v13 = vld [vmem:[#allocation2 + $0x8] sm:$0xff] }
0x1b34   :  { %v3319_v43 = vadd.f32 %v4158_v18, %v3318_v14  ;;  %4042 = vmatmul.msk.f32.gmra.mxu1 %vm244_vm1, %v3196_v13 }
0x1b36   :  { %3379 = vmatpush.msra.mxu2 %v3319_v43 }
0x1b38   :  { %3570 = vmatpush.msrb.mxu2 %v3547_v10 }
0x1b3a   :  { %3571 = vmatpush.msrb.mxu2 %v3546_v46 }
0x1b3b   :  { %v3321_v27 = vpop.f32.mrf.mxu0 }
0x1b3c   :  { %v3322_v25 = vadd.f32 %v4158_v18, %v3321_v27  ;;  %4065 = vmatmul.msk.f32.vlgmr.msra.gmra.mxu1 %vm244_vm1, %v3260_v51  ;;  %3572 = vmatpush.msrb.mxu2 %v3545_v6 }
0x1b3e   :  { %3440 = vmatpush.msrb.mxu0 %v3322_v25  ;;  %3573 = vmatpush.msrb.mxu2 %v3544_v7 }
0x1ba3   :  { %v3221_v22 = vpop.f32.mrf.mxu1 }
0x1ba4   :  { %v3227_v12 = vadd.f32 %v3221_v22, %v2973_v45 }
0x1bb1   :  { %v3224_v49 = vpop.f32.mrf.mxu1 }
0x1bb2   :  { %v3228_v38 = vadd.f32 %v3224_v49, %v5291_v57 }
0x1bb9   :  { %v3347_v30 = vpop.f32.mrf.mxu1 }
0x1bba   :  { %v3350_v36 = vsel %vm244_vm1, %v3347_v30, -inf }
0x1bbb   :  { %3351 = vmax.xlane.f32.xlu2 %v3350_v36 }
0x1bc3   :  { %3418 = vadd.xlane.f32.xlu2 %v3417_v56 }
0x1c2e   :  { %v3352_v21 = vpop.xlane.xlu2 %3351 }
0x1c2f   :  { %v3353_v2 = vsub.f32 %v3347_v30, %v3352_v21  ;;  %v5356_v21 = vld [vmem:[%s5429_s14] ss:$0 sm:$0xff] }
0x1c31   :  { %v3354_v24 = vmul.f32 1.442695, %v3353_v2 }
0x1c33   :  { %4269 = vpow2.f32 %v3354_v24 }
0x1c36   :  { %v3419_v9 = vpop.xlane.xlu2 %3418 }
0x1c37   :  { %4271 = vrcp.f32 %v3419_v9  ;;  %v4161_v9 = vld [vmem:[%s5433_s27] ss:$0 sm:$0xff] }
0x1c39   :  { %v4270_v3 = vpop.eup %4269 }
0x1c3a   :  { %v3356_v57 = vsel %vm244_vm1, %v4270_v3, 0.0 }
0x1c3b   :  { %3357 = vadd.xlane.f32.xlu1 %v3356_v57  ;;  %v5360_v57 = vld [vmem:[%s4500_s4] ss:$0 sm:$0xff] }
0x1c3d   :  { %v4272_v4 = vpop.eup %4271 }
0x1c3e   :  { %v3421_v54 = vmul.f32 %v4272_v4, %v4268_v39 }
0x1c40   :  { %4069 = vmatmul.msk.f32.vlgmr.msrb.gmra.mxu0 %vm244_vm1, %v3421_v54 }
0x1cae   :  { %v3358_v5 = vpop.xlane.xlu1 %3357 }
0x1caf   :  { %4273 = vrcp.f32 %v3358_v5 }
0x1cb5   :  { %v4274_v61 = vpop.eup %4273 }
0x1cb6   :  { %v3360_v62 = vmul.f32 %v4274_v61, %v4270_v3 }
0x1cb8   :  { %4066 = vmatmul.msk.f32.vlgmr.msra.gmra.mxu2 %vm244_vm1, %v3360_v62 }
0x1cbd   :  { %v3442_v63 = vpop.f32.mrf.mxu0 }
0x1cbe   :  { %3445 = vst.msk [vmem:[#allocation2 + $0x8] sm:$0xff] %vm244_vm1, %v3442_v63 }
0x1cc5   :  { %v3447_v0 = vld [vmem:[#allocation2 + $0x8] sm:$0xff] }
0x1d3b   :  { %v3381_v1 = vpop.f32.mrf.mxu2 }
0x1d3c   :  { %3384 = vst.msk [vmem:[#allocation2] sm:$0xff] %vm244_vm1, %v3381_v1 }
0x1d43   :  { %v3446_v26 = vld [vmem:[#allocation2] sm:$0xff] }
0x1d44   :  { %4071 = vmatmul.msk.f32.vlgmr.msrb.gmra.mxu1 %vm244_vm1, %v3446_v26 }
0x1d4c   :  { %4072 = vmatmul.msk.f32.gmra.mxu1 %vm244_vm1, %v3447_v0 }
0x1dc1   :  { %v3472_v11 = vpop.f32.mrf.mxu1 }
0x1dc2   :  { %v3478_v16 = vadd.f32 %v3472_v11, %v3227_v12 }
0x1dc4   :  { %v3484_v55 = vadd.f32 %v4159_v41, %v3478_v16 }
0x1dc6   :  { %4073 = vmatmul.msk.f32.vlgmr.msrb.gmra.mxu2 %vm150_vm0, %v3484_v55  ;;  %v3486_v58 = vadd.f32 %v3484_v55, %v5165_v15 }
0x1dc8   :  { %v3488_v52 = vsel %vm150_vm0, %v3486_v58, 0.0 }
0x1dc9   :  { %3489 = vadd.xlane.f32.xlu0 %v3488_v52  ;;  %v3475_v32 = vpop.f32.mrf.mxu1 }
0x1dca   :  { %v3479_v48 = vadd.f32 %v3475_v32, %v3228_v38 }
0x1dcc   :  { %v3485_v17 = vadd.f32 %v4159_v41, %v3479_v48 }
0x1dce   :  { %4074 = vmatmul.msk.f32.gmra.mxu2 %vm150_vm0, %v3485_v17  ;;  %v3487_v60 = vadd.f32 %v3485_v17, %v5173_v31 }
0x1dd0   :  { %v3491_v19 = vsel %vm150_vm0, %v3487_v60, 0.0 }
0x1dd1   :  { %3492 = vadd.xlane.f32.xlu1 %v3491_v19 }
0x1e3c   :  { %v3490_v42 = vpop.xlane.xlu0 %3489 }
0x1e3d   :  { %v3494_v15 = vmul.f32 %v3490_v42, %v4719_v33 }
0x1e3f   :  { %v3496_v47 = vsub.f32 %v3486_v58, %v3494_v15  ;;  %v3671_v15 = vld [vmem:[%s4505_s20 + $0x18] sm:$0xff] }
0x1e40   :  { %3694 = vmatpush.msra.mxu0 %v3671_v15 }
0x1e41   :  { %v3498_v20 = vmul.f32 %v3496_v47, %v3496_v47 }
0x1e43   :  { %v3500_v40 = vsel %vm150_vm0, %v3498_v20, 0.0  ;;  %v3669_v20 = vld [vmem:[%s4505_s20 + $0x8] sm:$0xff] }
0x1e44   :  { %3501 = vadd.xlane.f32.xlu2 %v3500_v40  ;;  %v3493_v34 = vpop.xlane.xlu1 %3492  ;;  %v3668_v40 = vld [vmem:[%s4505_s20] sm:$0xff] }
0x1e45   :  { %v3495_v53 = vmul.f32 %v3493_v34, %v4719_v33 }
0x1e47   :  { %v3497_v31 = vsub.f32 %v3487_v60, %v3495_v53 }
0x1e49   :  { %v3575_v8 = vpop.f32.mrf.mxu2  ;;  %v3499_v44 = vmul.f32 %v3497_v31, %v3497_v31 }
0x1e4a   :  { %v3576_v29 = vadd.f32 %v4160_v23, %v3575_v8 }
0x1e4b   :  { %v3503_v18 = vsel %vm150_vm0, %v3499_v44, 0.0 }
0x1e4c   :  { %v3581_v14 = vmax.f32 %v3576_v29, 0.0  ;;  %3504 = vadd.xlane.f32.xlu0 %v3503_v18 }
0x1e4e   :  { %4075 = vmatmul.msk.f32.vlgmr.msrb.gmra.mxu3 %vm1287_vm9, %v3581_v14 }
0x1e51   :  { %v3578_v13 = vpop.f32.mrf.mxu2 }
0x1e52   :  { %v3579_v43 = vadd.f32 %v4160_v23, %v3578_v13 }
0x1e54   :  { %v3582_v51 = vmax.f32 %v3579_v43, 0.0 }
0x1e56   :  { %4076 = vmatmul.msk.f32.gmra.mxu3 %vm1287_vm9, %v3582_v51 }
0x1eb7   :  { %v3502_v27 = vpop.xlane.xlu2 %3501 }
0x1eb8   :  { %v3506_v25 = vmul.f32 %v3502_v27, %v4719_v33 }
0x1eba   :  { %v3508_v45 = vadd.f32 1e-05, %v3506_v25 }
0x1ebc   :  { %4275 = vrsqrt.f32 %v3508_v45  ;;  %vm3516_vm10 = vweird.f32 %v3508_v45 }
0x1ebf   :  { %v3505_v22 = vpop.xlane.xlu0 %3504 }
0x1ec0   :  { %v3507_v12 = vmul.f32 %v3505_v22, %v4719_v33 }
0x1ec2   :  { %v4276_v28 = vpop.eup %4275  ;;  %v3509_v35 = vadd.f32 1e-05, %v3507_v12 }
0x1ec3   :  { %v3511_v49 = vmul.f32 %v4276_v28, %v3508_v45  ;;  %vm3517_vm1 = vweird.f32 %v4276_v28 }
0x1ec4   :  { %4277 = vrsqrt.f32 %v3509_v35  ;;  %vm3518_vm11 = vmor %vm3516_vm10, %vm3517_vm1  ;;  %vm3526_vm13 = vweird.f32 %v3509_v35 }
0x1ec5   :  { %v3512_v38 = vmul.f32 %v4276_v28, %v3511_v49 }
0x1ec7   :  { %v3513_v37 = vmul.f32 0.5, %v3512_v38 }
0x1ec9   :  { %v3514_v30 = vsub.f32 1.5, %v3513_v37 }
0x1eca   :  { %v4278_v36 = vpop.eup %4277 }
0x1ecb   :  { %v3515_v39 = vmul.f32 %v4276_v28, %v3514_v30  ;;  %v3521_v56 = vmul.f32 %v4278_v36, %v3509_v35  ;;  %vm3527_vm12 = vweird.f32 %v4278_v36 }
0x1ecc   :  { %vm3528_vm14 = vmor %vm3526_vm13, %vm3527_vm12 }
0x1ecd   :  { %v3519_v2 = vsel %vm3518_vm11, %v4276_v28, %v3515_v39  ;;  %v3522_v24 = vmul.f32 %v4278_v36, %v3521_v56  ;;  %v4164_v56 = vld [vmem:[%s4510_s24] ss:$0 sm:$0xff]  ;;  %s4301_s24 = scalar_lea.hbm %s4515_s12, 16 }
0x1ece   :  { %v3530_v3 = vmul.f32 %v3519_v2, %v3496_v47  ;;  %v3670_v47 = vld [vmem:[%s4505_s20 + $0x10] sm:$0xff]  ;;  %s4344_s20 = smov [#allocation3]   ;;  %p4303_p2 = scmp.lt.s32.totalorder %s4301_s24, %s4299_s2 }
0x1ecf   :  { %v3523_v4 = vmul.f32 0.5, %v3522_v24  ;;  %3695 = vmatpush.msra.mxu0 %v3670_v47  ;;  %s3711_s4 = sshll.u32 %s4344_s20, 4  ;;  %s3712_s4 = int_to_ptr.vmem [resolvable:$true] %s3711_s4 }
0x1ed0   :  { %v3536_v54 = vmul.f32 %v5356_v21, %v3530_v3  ;;  %p4304_p3 = por %p4303_p2, %p4302_p1 }
0x1ed1   :  { %v3524_v5 = vsub.f32 1.5, %v3523_v4  ;;  %v3612_v61 = vpop.f32.mrf.mxu3  ;;  %3696 = vmatpush.msra.mxu0 %v3669_v20 }
0x1ed2   :  { %v3613_v62 = vadd.f32 %v4161_v9, %v3612_v61  ;;  %v3542_v63 = vadd.f32 %v5360_v57, %v3536_v54  ;;  %p4305_p4 = pnand %p4304_p3, %p4300_p0 }
0x1ed3   :  { %v3525_v10 = vmul.f32 %v4278_v36, %v3524_v5  ;;  %3697 = vmatpush.msra.mxu0 %v3668_v40 }
0x1ed4   :  { %v3618_v1 = vadd.f32 %v3613_v62, %v3542_v63 }
0x1ed5   :  { %v3529_v26 = vsel %vm3528_vm14, %v4278_v36, %v3525_v10 }
0x1ed6   :  { %v3620_v0 = vsel %vm150_vm0, %v3618_v1, 0.0  ;;  %v3531_v46 = vmul.f32 %v3529_v26, %v3497_v31 }
0x1ed7   :  { %3621 = vadd.xlane.f32.xlu1 %v3620_v0 }
0x1ed8   :  { %v3537_v6 = vmul.f32 %v5356_v21, %v3531_v46 }
0x1ed9   :  { %v3615_v7 = vpop.f32.mrf.mxu3 }
0x1eda   :  { %v3616_v41 = vadd.f32 %v4161_v9, %v3615_v7  ;;  %v3543_v11 = vadd.f32 %v5360_v57, %v3537_v6 }
0x1edc   :  { %v3619_v16 = vadd.f32 %v3616_v41, %v3543_v11 }
0x1ede   :  { %v3623_v55 = vsel %vm150_vm0, %v3619_v16, 0.0 }
0x1edf   :  { %3624 = vadd.xlane.f32.xlu2 %v3623_v55 }
0x1f4a   :  { %v3622_v58 = vpop.xlane.xlu1 %3621 }
0x1f4b   :  { %v3626_v52 = vmul.f32 %v3622_v58, %v4719_v33 }
0x1f4d   :  { %v3628_v32 = vsub.f32 %v3618_v1, %v3626_v52 }
0x1f4f   :  { %v3630_v48 = vmul.f32 %v3628_v32, %v3628_v32 }
0x1f51   :  { %v3632_v17 = vsel %vm150_vm0, %v3630_v48, 0.0 }
0x1f52   :  { %v3625_v60 = vpop.xlane.xlu2 %3624  ;;  %3633 = vadd.xlane.f32.xlu0 %v3632_v17 }
0x1f53   :  { %v3627_v19 = vmul.f32 %v3625_v60, %v4719_v33 }
0x1f55   :  { %v3629_v50 = vsub.f32 %v3619_v16, %v3627_v19 }
0x1f57   :  { %v3631_v59 = vmul.f32 %v3629_v50, %v3629_v50 }
0x1f59   :  { %v3635_v42 = vsel %vm150_vm0, %v3631_v59, 0.0 }
0x1f5a   :  { %3636 = vadd.xlane.f32.xlu1 %v3635_v42 }
0x1fc5   :  { %v3634_v34 = vpop.xlane.xlu0 %3633 }
0x1fc6   :  { %v3638_v53 = vmul.f32 %v3634_v34, %v4719_v33 }
0x1fc8   :  { %v3640_v23 = vadd.f32 1e-05, %v3638_v53 }
0x1fca   :  { %4279 = vrsqrt.f32 %v3640_v23  ;;  %vm3648_vm2 = vweird.f32 %v3640_v23 }
0x1fcd   :  { %v3637_v31 = vpop.xlane.xlu1 %3636 }
0x1fce   :  { %v3639_v8 = vmul.f32 %v3637_v31, %v4719_v33 }
0x1fd0   :  { %v4280_v44 = vpop.eup %4279  ;;  %v3641_v29 = vadd.f32 1e-05, %v3639_v8 }
0x1fd1   :  { %v3643_v18 = vmul.f32 %v4280_v44, %v3640_v23  ;;  %vm3649_vm15 = vweird.f32 %v4280_v44 }
0x1fd2   :  { %4281 = vrsqrt.f32 %v3641_v29  ;;  %vm3650_vm3 = vmor %vm3648_vm2, %vm3649_vm15  ;;  %vm3658_vm5 = vweird.f32 %v3641_v29 }
0x1fd3   :  { %v3644_v14 = vmul.f32 %v4280_v44, %v3643_v18 }
0x1fd5   :  { %v3645_v13 = vmul.f32 0.5, %v3644_v14 }
0x1fd7   :  { %v3646_v43 = vsub.f32 1.5, %v3645_v13 }
0x1fd8   :  { %v4282_v51 = vpop.eup %4281 }
0x1fd9   :  { %v3647_v27 = vmul.f32 %v4280_v44, %v3646_v43  ;;  %v3653_v25 = vmul.f32 %v4282_v51, %v3641_v29  ;;  %vm3659_vm4 = vweird.f32 %v4282_v51 }
0x1fda   :  { %vm3660_vm6 = vmor %vm3658_vm5, %vm3659_vm4 }
0x1fdb   :  { %v3651_v45 = vsel %vm3650_vm3, %v4280_v44, %v3647_v27  ;;  %v3654_v22 = vmul.f32 %v4282_v51, %v3653_v25 }
0x1fdc   :  { %v3662_v12 = vmul.f32 %v3651_v45, %v3628_v32 }
0x1fdd   :  { %v3655_v28 = vmul.f32 0.5, %v3654_v22 }
0x1fde   :  { %v3664_v33 = vmul.f32 %v5356_v21, %v3662_v12 }
0x1fdf   :  { %v3656_v35 = vsub.f32 1.5, %v3655_v28 }
0x1fe0   :  { %v3666_v49 = vadd.f32 %v5360_v57, %v3664_v33 }
0x1fe1   :  { %v3657_v38 = vmul.f32 %v4282_v51, %v3656_v35 }
0x1fe2   :  { %4077 = vmatmul.msk.f32.vlgmr.msra.gmra.mxu0 %vm150_vm0, %v3666_v49 }
0x1fe3   :  { %v3661_v37 = vsel %vm3660_vm6, %v4282_v51, %v3657_v38 }
0x1fe4   :  { %v3663_v30 = vmul.f32 %v3661_v37, %v3629_v50 }
0x1fe6   :  { %v3665_v36 = vmul.f32 %v5356_v21, %v3663_v30 }
0x1fe8   :  { %v3667_v39 = vadd.f32 %v5360_v57, %v3665_v36 }
0x1fea   :  { %4078 = vmatmul.msk.f32.gmra.mxu0 %vm150_vm0, %v3667_v39 }
0x205f   :  { %v3699_v2 = vpop.f32.mrf.mxu0 }
0x2060   :  { %v3700_v24 = vadd.f32 %v4164_v56, %v3699_v2 }
0x2062   :  { %3705 = vst.msk [vmem:[#allocation3] sm:$0xff] %vm1287_vm9, %v3700_v24 }
0x2067   :  { %v3702_v9 = vpop.f32.mrf.mxu0 }
0x2068   :  { %v3703_v3 = vadd.f32 %v4164_v56, %v3702_v9 }
0x206a   :  { %3706 = vst.msk [vmem:[#allocation3 + $0x8] sm:$0xff] %vm1287_vm9, %v3703_v3 }
0x206b   :  { %4308 = shalt.err (!%p4305_p4)
}
0x206c   :  { %s4345_s7 = smov 128   ;;  %s4346_s10 = smov 8  }
0x206d   :  { %3719 = dma.vmem_to_hbm [thread:$0]  %s3712_s4, 256, %s3714_s28, [#allocation4], %s4345_s7, %s4345_s7, %s4346_s10  }
0x206e   :  { %4309 = dma.done.wait [#allocation4], 256  }
0x206f   :  { %4310 = vsyncadd [#allocation4], 4294967040 }
0x2070   :  { %3724 = vsyncpa [#allocation4], 1 }

</bundles_post_ra>
